<compile_context>
chip_gen: v7x
topology: tpu7x:2x2x1
jax: 0.10.0
libtpu: 0.0.40
codegen_flags: <defaults>
</compile_context>

<pallas_src>
import functools

import jax
import jax.numpy as jnp
from jax.experimental import pallas as pl
from jax.experimental.pallas import tpu as pltpu


# ------------------------------ Pallas kernels ------------------------------

def _gemm_bn_relu_kernel(x_ref, w_ref, b_ref, g_ref, beta_ref, o_ref, *, eps):
    """o = relu(batchnorm(x @ w + b)) with batch statistics over rows.

    x:(M,K) bf16, w:(K,C) bf16, b/g/beta:(1,C) f32, o:(M,C) bf16.
    Conv GEMM on the MXU with f32 accumulator; per-channel mean/var reduction
    (rows = N*Ho*Wo) plus normalize+ReLU epilogue fused in f32 before the store.
    """
    acc = jnp.dot(x_ref[...], w_ref[...], preferred_element_type=jnp.float32)
    acc = acc + b_ref[...]
    mean = jnp.mean(acc, axis=0, keepdims=True)
    var = jnp.mean(jnp.square(acc - mean), axis=0, keepdims=True)   # biased var
    scale = jax.lax.rsqrt(var + eps) * g_ref[...]
    y = (acc - mean) * scale + beta_ref[...]
    o_ref[...] = jnp.maximum(y, 0.0).astype(o_ref.dtype)


def _gemm_bias_tanh2_kernel(x_ref, w_ref, b_ref, o_ref):
    """o = tanh(x @ w + b) * 2.   x:(M,K) bf16, w:(K,N) bf16, b:(1,N) f32, o f32."""
    acc = jnp.dot(x_ref[...], w_ref[...], preferred_element_type=jnp.float32)
    acc = acc + b_ref[...]
    o_ref[...] = (jnp.tanh(acc) * 2.0).astype(o_ref.dtype)


# ------------------------------ Pallas wrappers ------------------------------

def _full_spec(shape):
    # Full-array block: exempt from the (8,128) divisibility rule.
    return pl.BlockSpec(shape, lambda i: (0,) * len(shape))


_ARB = pltpu.CompilerParams(dimension_semantics=("arbitrary",))


def conv_bn_relu_gemm(cols, w, b, gamma, beta, eps=1e-5):
    """cols:(M,K) bf16 im2col matrix, w:(K,C) bf16, b/gamma/beta:(1,C) f32 -> (M,C) bf16."""
    M, K = cols.shape
    _, C = w.shape
    return pl.pallas_call(
        functools.partial(_gemm_bn_relu_kernel, eps=eps),
        out_shape=jax.ShapeDtypeStruct((M, C), jnp.bfloat16),
        grid=(1,),
        in_specs=[
            _full_spec((M, K)),
            _full_spec((K, C)),
            _full_spec((1, C)),
            _full_spec((1, C)),
            _full_spec((1, C)),
        ],
        out_specs=_full_spec((M, C)),
        compiler_params=_ARB,
    )(cols, w, b, gamma, beta)


def head_gemm_tanh2(x, w, b):
    """x:(M,K) bf16, w:(K,N) bf16, b:(1,N) f32 -> (M,N) f32 = tanh(x@w+b)*2."""
    M, K = x.shape
    _, N = w.shape
    return pl.pallas_call(
        _gemm_bias_tanh2_kernel,
        out_shape=jax.ShapeDtypeStruct((M, N), jnp.float32),
        grid=(1,),
        in_specs=[_full_spec((M, K)), _full_spec((K, N)), _full_spec((1, N))],
        out_specs=_full_spec((M, N)),
        compiler_params=_ARB,
    )(x, w, b)


# ------------------------------ glue (plain JAX) ------------------------------

def im2col(x_nhwc, k=3):
    """Valid 3x3 patches.  Returns (N*Ho*Wo, k*k*C) with (kh, kw, cin) ordering."""
    N, H, W, C = x_nhwc.shape
    Ho, Wo = H - k + 1, W - k + 1
    cols = []
    for di in range(k):
        for dj in range(k):
            cols.append(x_nhwc[:, di:di + Ho, dj:dj + Wo, :])
    p = jnp.stack(cols, axis=3)                       # (N, Ho, Wo, k*k, C)
    return p.reshape(N * Ho * Wo, k * k * C), (N, Ho, Wo)


def init_params(key, height, width, output_action):
    """Deterministic synthetic parameters matching DQN.__init__ shapes (PyTorch layout)."""
    ks = jax.random.split(key, 8)

    def conv(key_w, key_b, cout, cin):
        w = jax.random.normal(key_w, (cout, cin, 3, 3), jnp.float32) * 0.1
        b = jax.random.normal(key_b, (cout,), jnp.float32) * 0.05
        return w, b

    def sz(s):
        return (s - 3) + 1

    convw = sz(sz(sz(width)))
    convh = sz(sz(sz(height)))
    lin_in = convw * convh * 32
    p = {}
    p["conv1_w"], p["conv1_b"] = conv(ks[0], ks[1], 16, 3)
    p["conv2_w"], p["conv2_b"] = conv(ks[2], ks[3], 32, 16)
    p["conv3_w"], p["conv3_b"] = conv(ks[4], ks[5], 32, 32)
    # BatchNorm affine params (PyTorch default init: gamma=1, beta=0)
    p["bn1_g"], p["bn1_b"] = jnp.ones((16,), jnp.float32), jnp.zeros((16,), jnp.float32)
    p["bn2_g"], p["bn2_b"] = jnp.ones((32,), jnp.float32), jnp.zeros((32,), jnp.float32)
    p["bn3_g"], p["bn3_b"] = jnp.ones((32,), jnp.float32), jnp.zeros((32,), jnp.float32)
    p["head_w"] = jax.random.normal(ks[6], (output_action, lin_in), jnp.float32) * 0.02
    p["head_b"] = jax.random.normal(ks[7], (output_action,), jnp.float32) * 0.05
    return p


def prepare_params(p, height, width):
    """One-time layout/dtype conversion of PyTorch-layout params to kernel layout."""
    def conv_w(w_oihw):
        O, I, kh, kw = w_oihw.shape
        # OIHW -> (kh*kw*Cin, Cout), matching im2col (kh, kw, cin) column order.
        return jnp.transpose(w_oihw, (2, 3, 1, 0)).reshape(kh * kw * I, O).astype(jnp.bfloat16)

    def row(v):
        return v.astype(jnp.float32).reshape(1, -1)

    ho, wo = height - 6, width - 6
    A = p["head_w"].shape[0]
    # PyTorch flattens activations in (C, H, W) order; our activations are NHWC.
    # Permute head weight columns once so no runtime transpose is needed.
    hw = p["head_w"].reshape(A, 32, ho, wo)
    hw = jnp.transpose(hw, (2, 3, 1, 0)).reshape(ho * wo * 32, A).astype(jnp.bfloat16)

    return {
        "conv1_w": conv_w(p["conv1_w"]), "conv1_b": row(p["conv1_b"]),
        "conv2_w": conv_w(p["conv2_w"]), "conv2_b": row(p["conv2_b"]),
        "conv3_w": conv_w(p["conv3_w"]), "conv3_b": row(p["conv3_b"]),
        "bn1_g": row(p["bn1_g"]), "bn1_b": row(p["bn1_b"]),
        "bn2_g": row(p["bn2_g"]), "bn2_b": row(p["bn2_b"]),
        "bn3_g": row(p["bn3_g"]), "bn3_b": row(p["bn3_b"]),
        "head_w": hw, "head_b": row(p["head_b"]),
    }


@jax.jit
def dqn_forward(x_nchw, kp):
    """Forward pass equivalent to DQN.forward (training-mode BatchNorm)."""
    x = jnp.transpose(x_nchw, (0, 2, 3, 1)).astype(jnp.bfloat16)   # NCHW -> NHWC bf16

    # conv1 + bn1 + relu  (fused GEMM epilogue)
    cols, (N, Ho, Wo) = im2col(x)
    y = conv_bn_relu_gemm(cols, kp["conv1_w"], kp["conv1_b"], kp["bn1_g"], kp["bn1_b"])
    x = y.reshape(N, Ho, Wo, 16)

    # conv2 + bn2 + relu
    cols, (N, Ho, Wo) = im2col(x)
    y = conv_bn_relu_gemm(cols, kp["conv2_w"], kp["conv2_b"], kp["bn2_g"], kp["bn2_b"])
    x = y.reshape(N, Ho, Wo, 32)

    # conv3 + bn3 + relu
    cols, (N, Ho, Wo) = im2col(x)
    y = conv_bn_relu_gemm(cols, kp["conv3_w"], kp["conv3_b"], kp["bn3_g"], kp["bn3_b"])
    x = y.reshape(N, Ho, Wo, 32)

    # NHWC flatten (head weights were permuted at init to match) + head + tanh*2
    flat = x.reshape(N, Ho * Wo * 32)
    return head_gemm_tanh2(flat, kp["head_w"], kp["head_b"])


# ------------------------------ pure-JAX reference ------------------------------

def dqn_reference(x_nchw, params):
    def conv(x, w, b):
        y = jax.lax.conv_general_dilated(
            x, w, window_strides=(1, 1), padding="VALID",
            dimension_numbers=("NCHW", "OIHW", "NCHW"))
        return y + b[None, :, None, None]

    def bn_relu_ref(x, g, b, eps=1e-5):
        mean = x.mean(axis=(0, 2, 3), keepdims=True)
        var = jnp.square(x - mean).mean(axis=(0, 2, 3), keepdims=True)
        y = (x - mean) * jax.lax.rsqrt(var + eps)
        y = y * g[None, :, None, None] + b[None, :, None, None]
        return jnp.maximum(y, 0.0)

    x = x_nchw.astype(jnp.float32)
    x = bn_relu_ref(conv(x, params["conv1_w"], params["conv1_b"]), params["bn1_g"], params["bn1_b"])
    x = bn_relu_ref(conv(x, params["conv2_w"], params["conv2_b"]), params["bn2_g"], params["bn2_b"])
    x = bn_relu_ref(conv(x, params["conv3_w"], params["conv3_b"]), params["bn3_g"], params["bn3_b"])
    x = x.reshape(x.shape[0], -1)
    x = x @ params["head_w"].T + params["head_b"]
    return jnp.tanh(x) * 2.0


# ------------------------------ main ------------------------------

if __name__ == "__main__":
    HEIGHT, WIDTH, N_ACTIONS, BATCH = 16, 16, 5, 2

    key = jax.random.PRNGKey(0)
    k_x, k_p = jax.random.split(key)
    x = jax.random.normal(k_x, (BATCH, 3, HEIGHT, WIDTH), jnp.float32)
    params = init_params(k_p, HEIGHT, WIDTH, N_ACTIONS)
    kparams = prepare_params(params, HEIGHT, WIDTH)     # one-time layout/bf16 conversion

    out = jax.block_until_ready(dqn_forward(x, kparams))
    ref = jax.block_until_ready(dqn_reference(x, params))

    assert out.shape == (BATCH, N_ACTIONS), out.shape
    # bf16 MXU inputs (f32 accumulation) vs a pure-f32 reference: relaxed tolerance.
    assert jnp.allclose(out, ref, atol=5e-2, rtol=5e-2), (
        f"max abs err = {jnp.max(jnp.abs(out - ref))}")

    print("KERNEL_OK")
</pallas_src>

<mosaic_0001>
module attributes {stable_mosaic.version = 11 : i64} {
  func.func @_gemm_bn_relu_kernel(%arg0: i32, %arg1: memref<392x27xbf16, #tpu.memory_space<vmem>>, %arg2: memref<27x16xbf16, #tpu.memory_space<vmem>>, %arg3: memref<1x16xf32, #tpu.memory_space<vmem>>, %arg4: memref<1x16xf32, #tpu.memory_space<vmem>>, %arg5: memref<1x16xf32, #tpu.memory_space<vmem>>, %arg6: memref<392x16xbf16, #tpu.memory_space<vmem>>) attributes {dimension_semantics = [#tpu.dimension_semantics<arbitrary>], iteration_bounds = array<i64: 1>, scalar_prefetch = 0 : i64, scratch_operands = 0 : i64, tpu.core_type = #tpu.core_type<tc>, window_params = [{pipeline_mode = #tpu.pipeline_mode<synchronous>, transform_indices = @transform_0, window_bounds = array<i64: 392, 27>}, {pipeline_mode = #tpu.pipeline_mode<synchronous>, transform_indices = @transform_1, window_bounds = array<i64: 27, 16>}, {pipeline_mode = #tpu.pipeline_mode<synchronous>, transform_indices = @transform_2, window_bounds = array<i64: 1, 16>}, {pipeline_mode = #tpu.pipeline_mode<synchronous>, transform_indices = @transform_3, window_bounds = array<i64: 1, 16>}, {pipeline_mode = #tpu.pipeline_mode<synchronous>, transform_indices = @transform_4, window_bounds = array<i64: 1, 16>}, {pipeline_mode = #tpu.pipeline_mode<synchronous>, transform_indices = @transform_5, window_bounds = array<i64: 392, 16>}]} {
    %c0 = arith.constant 0 : index
    %c0_0 = arith.constant 0 : index
    %0 = vector.load %arg1[%c0, %c0_0] : memref<392x27xbf16, #tpu.memory_space<vmem>>, vector<392x27xbf16>
    %c0_1 = arith.constant 0 : index
    %c0_2 = arith.constant 0 : index
    %1 = vector.load %arg2[%c0_1, %c0_2] : memref<27x16xbf16, #tpu.memory_space<vmem>>, vector<27x16xbf16>
    %cst = arith.constant dense<0.000000e+00> : vector<392x16xf32>
    %2 = tpu.matmul %0, %1, %cst {dimension_numbers = #tpu.dot_dimension_numbers<[1], [0], [0], [1], [0, 0, 1, 1], [], []>} : vector<392x27xbf16>, vector<27x16xbf16>, vector<392x16xf32> -> vector<392x16xf32>
    %c0_3 = arith.constant 0 : index
    %c0_4 = arith.constant 0 : index
    %3 = vector.load %arg3[%c0_3, %c0_4] : memref<1x16xf32, #tpu.memory_space<vmem>>, vector<1x16xf32>
    %4 = vector.broadcast %3 : vector<1x16xf32> to vector<392x16xf32>
    %5 = arith.addf %2, %4 : vector<392x16xf32>
    %cst_5 = arith.constant dense<0.000000e+00> : vector<16xf32>
    %6 = vector.multi_reduction <add>, %5, %cst_5 [0] : vector<392x16xf32> to vector<16xf32>
    %7 = vector.shape_cast %6 : vector<16xf32> to vector<1x16xf32>
    %cst_6 = arith.constant 3.920000e+02 : f32
    %8 = vector.broadcast %cst_6 : f32 to vector<1x16xf32>
    %9 = arith.divf %7, %8 : vector<1x16xf32>
    %10 = vector.broadcast %9 : vector<1x16xf32> to vector<392x16xf32>
    %11 = arith.subf %5, %10 : vector<392x16xf32>
    %12 = arith.mulf %11, %11 : vector<392x16xf32>
    %cst_7 = arith.constant dense<0.000000e+00> : vector<16xf32>
    %13 = vector.multi_reduction <add>, %12, %cst_7 [0] : vector<392x16xf32> to vector<16xf32>
    %14 = vector.shape_cast %13 : vector<16xf32> to vector<1x16xf32>
    %cst_8 = arith.constant 3.920000e+02 : f32
    %15 = vector.broadcast %cst_8 : f32 to vector<1x16xf32>
    %16 = arith.divf %14, %15 : vector<1x16xf32>
    %cst_9 = arith.constant 9.99999974E-6 : f32
    %17 = vector.broadcast %cst_9 : f32 to vector<1x16xf32>
    %18 = arith.addf %16, %17 : vector<1x16xf32>
    %19 = math.rsqrt %18 : vector<1x16xf32>
    %c0_10 = arith.constant 0 : index
    %c0_11 = arith.constant 0 : index
    %20 = vector.load %arg4[%c0_10, %c0_11] : memref<1x16xf32, #tpu.memory_space<vmem>>, vector<1x16xf32>
    %21 = arith.mulf %19, %20 : vector<1x16xf32>
    %22 = vector.broadcast %9 : vector<1x16xf32> to vector<392x16xf32>
    %23 = arith.subf %5, %22 : vector<392x16xf32>
    %24 = vector.broadcast %21 : vector<1x16xf32> to vector<392x16xf32>
    %25 = arith.mulf %23, %24 : vector<392x16xf32>
    %c0_12 = arith.constant 0 : index
    %c0_13 = arith.constant 0 : index
    %26 = vector.load %arg5[%c0_12, %c0_13] : memref<1x16xf32, #tpu.memory_space<vmem>>, vector<1x16xf32>
    %27 = vector.broadcast %26 : vector<1x16xf32> to vector<392x16xf32>
    %28 = arith.addf %25, %27 : vector<392x16xf32>
    %cst_14 = arith.constant 0.000000e+00 : f32
    %29 = vector.broadcast %cst_14 : f32 to vector<392x16xf32>
    %30 = arith.maximumf %28, %29 : vector<392x16xf32>
    %31 = arith.truncf %30 : vector<392x16xf32> to vector<392x16xbf16>
    %c0_15 = arith.constant 0 : index
    %c0_16 = arith.constant 0 : index
    %32 = vector.load %arg6[%c0_15, %c0_16] : memref<392x16xbf16, #tpu.memory_space<vmem>>, vector<392x16xbf16>
    tpu.vector_store %arg6[%c0_15, %c0_16], %31 {strides = array<i32>} : memref<392x16xbf16, #tpu.memory_space<vmem>>, vector<392x16xbf16>,
    return
  }
  func.func @transform_0(%arg0: i32) -> (i32, i32) {
    %c0_i32 = arith.constant 0 : i32
    %c0_i32_0 = arith.constant 0 : i32
    %c0_i32_1 = arith.constant 0 : i32
    return %c0_i32, %c0_i32_0 : i32, i32
  }
  func.func @transform_1(%arg0: i32) -> (i32, i32) {
    %c0_i32 = arith.constant 0 : i32
    %c0_i32_0 = arith.constant 0 : i32
    %c0_i32_1 = arith.constant 0 : i32
    return %c0_i32, %c0_i32_0 : i32, i32
  }
  func.func @transform_2(%arg0: i32) -> (i32, i32) {
    %c0_i32 = arith.constant 0 : i32
    %c0_i32_0 = arith.constant 0 : i32
    %c0_i32_1 = arith.constant 0 : i32
    return %c0_i32, %c0_i32_0 : i32, i32
  }
  func.func @transform_3(%arg0: i32) -> (i32, i32) {
    %c0_i32 = arith.constant 0 : i32
    %c0_i32_0 = arith.constant 0 : i32
    %c0_i32_1 = arith.constant 0 : i32
    return %c0_i32, %c0_i32_0 : i32, i32
  }
  func.func @transform_4(%arg0: i32) -> (i32, i32) {
    %c0_i32 = arith.constant 0 : i32
    %c0_i32_0 = arith.constant 0 : i32
    %c0_i32_1 = arith.constant 0 : i32
    return %c0_i32, %c0_i32_0 : i32, i32
  }
  func.func @transform_5(%arg0: i32) -> (i32, i32) {
    %c0_i32 = arith.constant 0 : i32
    %c0_i32_0 = arith.constant 0 : i32
    %c0_i32_1 = arith.constant 0 : i32
    return %c0_i32, %c0_i32_0 : i32, i32
  }
}

module attributes {stable_mosaic.version = 11 : i64} {
  func.func @_gemm_bn_relu_kernel(%arg0: i32, %arg1: memref<288x144xbf16, #tpu.memory_space<vmem>>, %arg2: memref<144x32xbf16, #tpu.memory_space<vmem>>, %arg3: memref<1x32xf32, #tpu.memory_space<vmem>>, %arg4: memref<1x32xf32, #tpu.memory_space<vmem>>, %arg5: memref<1x32xf32, #tpu.memory_space<vmem>>, %arg6: memref<288x32xbf16, #tpu.memory_space<vmem>>) attributes {dimension_semantics = [#tpu.dimension_semantics<arbitrary>], iteration_bounds = array<i64: 1>, scalar_prefetch = 0 : i64, scratch_operands = 0 : i64, tpu.core_type = #tpu.core_type<tc>, window_params = [{pipeline_mode = #tpu.pipeline_mode<synchronous>, transform_indices = @transform_0, window_bounds = array<i64: 288, 144>}, {pipeline_mode = #tpu.pipeline_mode<synchronous>, transform_indices = @transform_1, window_bounds = array<i64: 144, 32>}, {pipeline_mode = #tpu.pipeline_mode<synchronous>, transform_indices = @transform_2, window_bounds = array<i64: 1, 32>}, {pipeline_mode = #tpu.pipeline_mode<synchronous>, transform_indices = @transform_3, window_bounds = array<i64: 1, 32>}, {pipeline_mode = #tpu.pipeline_mode<synchronous>, transform_indices = @transform_4, window_bounds = array<i64: 1, 32>}, {pipeline_mode = #tpu.pipeline_mode<synchronous>, transform_indices = @transform_5, window_bounds = array<i64: 288, 32>}]} {
    %c0 = arith.constant 0 : index
    %c0_0 = arith.constant 0 : index
    %0 = vector.load %arg1[%c0, %c0_0] : memref<288x144xbf16, #tpu.memory_space<vmem>>, vector<288x144xbf16>
    %c0_1 = arith.constant 0 : index
    %c0_2 = arith.constant 0 : index
    %1 = vector.load %arg2[%c0_1, %c0_2] : memref<144x32xbf16, #tpu.memory_space<vmem>>, vector<144x32xbf16>
    %cst = arith.constant dense<0.000000e+00> : vector<288x32xf32>
    %2 = tpu.matmul %0, %1, %cst {dimension_numbers = #tpu.dot_dimension_numbers<[1], [0], [0], [1], [0, 0, 1, 1], [], []>} : vector<288x144xbf16>, vector<144x32xbf16>, vector<288x32xf32> -> vector<288x32xf32>
    %c0_3 = arith.constant 0 : index
    %c0_4 = arith.constant 0 : index
    %3 = vector.load %arg3[%c0_3, %c0_4] : memref<1x32xf32, #tpu.memory_space<vmem>>, vector<1x32xf32>
    %4 = vector.broadcast %3 : vector<1x32xf32> to vector<288x32xf32>
    %5 = arith.addf %2, %4 : vector<288x32xf32>
    %cst_5 = arith.constant dense<0.000000e+00> : vector<32xf32>
    %6 = vector.multi_reduction <add>, %5, %cst_5 [0] : vector<288x32xf32> to vector<32xf32>
    %7 = vector.shape_cast %6 : vector<32xf32> to vector<1x32xf32>
    %cst_6 = arith.constant 2.880000e+02 : f32
    %8 = vector.broadcast %cst_6 : f32 to vector<1x32xf32>
    %9 = arith.divf %7, %8 : vector<1x32xf32>
    %10 = vector.broadcast %9 : vector<1x32xf32> to vector<288x32xf32>
    %11 = arith.subf %5, %10 : vector<288x32xf32>
    %12 = arith.mulf %11, %11 : vector<288x32xf32>
    %cst_7 = arith.constant dense<0.000000e+00> : vector<32xf32>
    %13 = vector.multi_reduction <add>, %12, %cst_7 [0] : vector<288x32xf32> to vector<32xf32>
    %14 = vector.shape_cast %13 : vector<32xf32> to vector<1x32xf32>
    %cst_8 = arith.constant 2.880000e+02 : f32
    %15 = vector.broadcast %cst_8 : f32 to vector<1x32xf32>
    %16 = arith.divf %14, %15 : vector<1x32xf32>
    %cst_9 = arith.constant 9.99999974E-6 : f32
    %17 = vector.broadcast %cst_9 : f32 to vector<1x32xf32>
    %18 = arith.addf %16, %17 : vector<1x32xf32>
    %19 = math.rsqrt %18 : vector<1x32xf32>
    %c0_10 = arith.constant 0 : index
    %c0_11 = arith.constant 0 : index
    %20 = vector.load %arg4[%c0_10, %c0_11] : memref<1x32xf32, #tpu.memory_space<vmem>>, vector<1x32xf32>
    %21 = arith.mulf %19, %20 : vector<1x32xf32>
    %22 = vector.broadcast %9 : vector<1x32xf32> to vector<288x32xf32>
    %23 = arith.subf %5, %22 : vector<288x32xf32>
    %24 = vector.broadcast %21 : vector<1x32xf32> to vector<288x32xf32>
    %25 = arith.mulf %23, %24 : vector<288x32xf32>
    %c0_12 = arith.constant 0 : index
    %c0_13 = arith.constant 0 : index
    %26 = vector.load %arg5[%c0_12, %c0_13] : memref<1x32xf32, #tpu.memory_space<vmem>>, vector<1x32xf32>
    %27 = vector.broadcast %26 : vector<1x32xf32> to vector<288x32xf32>
    %28 = arith.addf %25, %27 : vector<288x32xf32>
    %cst_14 = arith.constant 0.000000e+00 : f32
    %29 = vector.broadcast %cst_14 : f32 to vector<288x32xf32>
    %30 = arith.maximumf %28, %29 : vector<288x32xf32>
    %31 = arith.truncf %30 : vector<288x32xf32> to vector<288x32xbf16>
    %c0_15 = arith.constant 0 : index
    %c0_16 = arith.constant 0 : index
    %32 = vector.load %arg6[%c0_15, %c0_16] : memref<288x32xbf16, #tpu.memory_space<vmem>>, vector<288x32xbf16>
    tpu.vector_store %arg6[%c0_15, %c0_16], %31 {strides = array<i32>} : memref<288x32xbf16, #tpu.memory_space<vmem>>, vector<288x32xbf16>,
    return
  }
  func.func @transform_0(%arg0: i32) -> (i32, i32) {
    %c0_i32 = arith.constant 0 : i32
    %c0_i32_0 = arith.constant 0 : i32
    %c0_i32_1 = arith.constant 0 : i32
    return %c0_i32, %c0_i32_0 : i32, i32
  }
  func.func @transform_1(%arg0: i32) -> (i32, i32) {
    %c0_i32 = arith.constant 0 : i32
    %c0_i32_0 = arith.constant 0 : i32
    %c0_i32_1 = arith.constant 0 : i32
    return %c0_i32, %c0_i32_0 : i32, i32
  }
  func.func @transform_2(%arg0: i32) -> (i32, i32) {
    %c0_i32 = arith.constant 0 : i32
    %c0_i32_0 = arith.constant 0 : i32
    %c0_i32_1 = arith.constant 0 : i32
    return %c0_i32, %c0_i32_0 : i32, i32
  }
  func.func @transform_3(%arg0: i32) -> (i32, i32) {
    %c0_i32 = arith.constant 0 : i32
    %c0_i32_0 = arith.constant 0 : i32
    %c0_i32_1 = arith.constant 0 : i32
    return %c0_i32, %c0_i32_0 : i32, i32
  }
  func.func @transform_4(%arg0: i32) -> (i32, i32) {
    %c0_i32 = arith.constant 0 : i32
    %c0_i32_0 = arith.constant 0 : i32
    %c0_i32_1 = arith.constant 0 : i32
    return %c0_i32, %c0_i32_0 : i32, i32
  }
  func.func @transform_5(%arg0: i32) -> (i32, i32) {
    %c0_i32 = arith.constant 0 : i32
    %c0_i32_0 = arith.constant 0 : i32
    %c0_i32_1 = arith.constant 0 : i32
    return %c0_i32, %c0_i32_0 : i32, i32
  }
}

module attributes {stable_mosaic.version = 11 : i64} {
  func.func @_gemm_bn_relu_kernel(%arg0: i32, %arg1: memref<200x288xbf16, #tpu.memory_space<vmem>>, %arg2: memref<288x32xbf16, #tpu.memory_space<vmem>>, %arg3: memref<1x32xf32, #tpu.memory_space<vmem>>, %arg4: memref<1x32xf32, #tpu.memory_space<vmem>>, %arg5: memref<1x32xf32, #tpu.memory_space<vmem>>, %arg6: memref<200x32xbf16, #tpu.memory_space<vmem>>) attributes {dimension_semantics = [#tpu.dimension_semantics<arbitrary>], iteration_bounds = array<i64: 1>, scalar_prefetch = 0 : i64, scratch_operands = 0 : i64, tpu.core_type = #tpu.core_type<tc>, window_params = [{pipeline_mode = #tpu.pipeline_mode<synchronous>, transform_indices = @transform_0, window_bounds = array<i64: 200, 288>}, {pipeline_mode = #tpu.pipeline_mode<synchronous>, transform_indices = @transform_1, window_bounds = array<i64: 288, 32>}, {pipeline_mode = #tpu.pipeline_mode<synchronous>, transform_indices = @transform_2, window_bounds = array<i64: 1, 32>}, {pipeline_mode = #tpu.pipeline_mode<synchronous>, transform_indices = @transform_3, window_bounds = array<i64: 1, 32>}, {pipeline_mode = #tpu.pipeline_mode<synchronous>, transform_indices = @transform_4, window_bounds = array<i64: 1, 32>}, {pipeline_mode = #tpu.pipeline_mode<synchronous>, transform_indices = @transform_5, window_bounds = array<i64: 200, 32>}]} {
    %c0 = arith.constant 0 : index
    %c0_0 = arith.constant 0 : index
    %0 = vector.load %arg1[%c0, %c0_0] : memref<200x288xbf16, #tpu.memory_space<vmem>>, vector<200x288xbf16>
    %c0_1 = arith.constant 0 : index
    %c0_2 = arith.constant 0 : index
    %1 = vector.load %arg2[%c0_1, %c0_2] : memref<288x32xbf16, #tpu.memory_space<vmem>>, vector<288x32xbf16>
    %cst = arith.constant dense<0.000000e+00> : vector<200x32xf32>
    %2 = tpu.matmul %0, %1, %cst {dimension_numbers = #tpu.dot_dimension_numbers<[1], [0], [0], [1], [0, 0, 1, 1], [], []>} : vector<200x288xbf16>, vector<288x32xbf16>, vector<200x32xf32> -> vector<200x32xf32>
    %c0_3 = arith.constant 0 : index
    %c0_4 = arith.constant 0 : index
    %3 = vector.load %arg3[%c0_3, %c0_4] : memref<1x32xf32, #tpu.memory_space<vmem>>, vector<1x32xf32>
    %4 = vector.broadcast %3 : vector<1x32xf32> to vector<200x32xf32>
    %5 = arith.addf %2, %4 : vector<200x32xf32>
    %cst_5 = arith.constant dense<0.000000e+00> : vector<32xf32>
    %6 = vector.multi_reduction <add>, %5, %cst_5 [0] : vector<200x32xf32> to vector<32xf32>
    %7 = vector.shape_cast %6 : vector<32xf32> to vector<1x32xf32>
    %cst_6 = arith.constant 2.000000e+02 : f32
    %8 = vector.broadcast %cst_6 : f32 to vector<1x32xf32>
    %9 = arith.divf %7, %8 : vector<1x32xf32>
    %10 = vector.broadcast %9 : vector<1x32xf32> to vector<200x32xf32>
    %11 = arith.subf %5, %10 : vector<200x32xf32>
    %12 = arith.mulf %11, %11 : vector<200x32xf32>
    %cst_7 = arith.constant dense<0.000000e+00> : vector<32xf32>
    %13 = vector.multi_reduction <add>, %12, %cst_7 [0] : vector<200x32xf32> to vector<32xf32>
    %14 = vector.shape_cast %13 : vector<32xf32> to vector<1x32xf32>
    %cst_8 = arith.constant 2.000000e+02 : f32
    %15 = vector.broadcast %cst_8 : f32 to vector<1x32xf32>
    %16 = arith.divf %14, %15 : vector<1x32xf32>
    %cst_9 = arith.constant 9.99999974E-6 : f32
    %17 = vector.broadcast %cst_9 : f32 to vector<1x32xf32>
    %18 = arith.addf %16, %17 : vector<1x32xf32>
    %19 = math.rsqrt %18 : vector<1x32xf32>
    %c0_10 = arith.constant 0 : index
    %c0_11 = arith.constant 0 : index
    %20 = vector.load %arg4[%c0_10, %c0_11] : memref<1x32xf32, #tpu.memory_space<vmem>>, vector<1x32xf32>
    %21 = arith.mulf %19, %20 : vector<1x32xf32>
    %22 = vector.broadcast %9 : vector<1x32xf32> to vector<200x32xf32>
    %23 = arith.subf %5, %22 : vector<200x32xf32>
    %24 = vector.broadcast %21 : vector<1x32xf32> to vector<200x32xf32>
    %25 = arith.mulf %23, %24 : vector<200x32xf32>
    %c0_12 = arith.constant 0 : index
    %c0_13 = arith.constant 0 : index
    %26 = vector.load %arg5[%c0_12, %c0_13] : memref<1x32xf32, #tpu.memory_space<vmem>>, vector<1x32xf32>
    %27 = vector.broadcast %26 : vector<1x32xf32> to vector<200x32xf32>
    %28 = arith.addf %25, %27 : vector<200x32xf32>
    %cst_14 = arith.constant 0.000000e+00 : f32
    %29 = vector.broadcast %cst_14 : f32 to vector<200x32xf32>
    %30 = arith.maximumf %28, %29 : vector<200x32xf32>
    %31 = arith.truncf %30 : vector<200x32xf32> to vector<200x32xbf16>
    %c0_15 = arith.constant 0 : index
    %c0_16 = arith.constant 0 : index
    %32 = vector.load %arg6[%c0_15, %c0_16] : memref<200x32xbf16, #tpu.memory_space<vmem>>, vector<200x32xbf16>
    tpu.vector_store %arg6[%c0_15, %c0_16], %31 {strides = array<i32>} : memref<200x32xbf16, #tpu.memory_space<vmem>>, vector<200x32xbf16>,
    return
  }
  func.func @transform_0(%arg0: i32) -> (i32, i32) {
    %c0_i32 = arith.constant 0 : i32
    %c0_i32_0 = arith.constant 0 : i32
    %c0_i32_1 = arith.constant 0 : i32
    return %c0_i32, %c0_i32_0 : i32, i32
  }
  func.func @transform_1(%arg0: i32) -> (i32, i32) {
    %c0_i32 = arith.constant 0 : i32
    %c0_i32_0 = arith.constant 0 : i32
    %c0_i32_1 = arith.constant 0 : i32
    return %c0_i32, %c0_i32_0 : i32, i32
  }
  func.func @transform_2(%arg0: i32) -> (i32, i32) {
    %c0_i32 = arith.constant 0 : i32
    %c0_i32_0 = arith.constant 0 : i32
    %c0_i32_1 = arith.constant 0 : i32
    return %c0_i32, %c0_i32_0 : i32, i32
  }
  func.func @transform_3(%arg0: i32) -> (i32, i32) {
    %c0_i32 = arith.constant 0 : i32
    %c0_i32_0 = arith.constant 0 : i32
    %c0_i32_1 = arith.constant 0 : i32
    return %c0_i32, %c0_i32_0 : i32, i32
  }
  func.func @transform_4(%arg0: i32) -> (i32, i32) {
    %c0_i32 = arith.constant 0 : i32
    %c0_i32_0 = arith.constant 0 : i32
    %c0_i32_1 = arith.constant 0 : i32
    return %c0_i32, %c0_i32_0 : i32, i32
  }
  func.func @transform_5(%arg0: i32) -> (i32, i32) {
    %c0_i32 = arith.constant 0 : i32
    %c0_i32_0 = arith.constant 0 : i32
    %c0_i32_1 = arith.constant 0 : i32
    return %c0_i32, %c0_i32_0 : i32, i32
  }
}

module attributes {stable_mosaic.version = 11 : i64} {
  func.func @_gemm_bias_tanh2_kernel(%arg0: i32, %arg1: memref<2x3200xbf16, #tpu.memory_space<vmem>>, %arg2: memref<3200x5xbf16, #tpu.memory_space<vmem>>, %arg3: memref<1x5xf32, #tpu.memory_space<vmem>>, %arg4: memref<2x5xf32, #tpu.memory_space<vmem>>) attributes {dimension_semantics = [#tpu.dimension_semantics<arbitrary>], iteration_bounds = array<i64: 1>, scalar_prefetch = 0 : i64, scratch_operands = 0 : i64, tpu.core_type = #tpu.core_type<tc>, window_params = [{pipeline_mode = #tpu.pipeline_mode<synchronous>, transform_indices = @transform_0, window_bounds = array<i64: 2, 3200>}, {pipeline_mode = #tpu.pipeline_mode<synchronous>, transform_indices = @transform_1, window_bounds = array<i64: 3200, 5>}, {pipeline_mode = #tpu.pipeline_mode<synchronous>, transform_indices = @transform_2, window_bounds = array<i64: 1, 5>}, {pipeline_mode = #tpu.pipeline_mode<synchronous>, transform_indices = @transform_3, window_bounds = array<i64: 2, 5>}]} {
    %c0 = arith.constant 0 : index
    %c0_0 = arith.constant 0 : index
    %0 = vector.load %arg1[%c0, %c0_0] : memref<2x3200xbf16, #tpu.memory_space<vmem>>, vector<2x3200xbf16>
    %c0_1 = arith.constant 0 : index
    %c0_2 = arith.constant 0 : index
    %1 = vector.load %arg2[%c0_1, %c0_2] : memref<3200x5xbf16, #tpu.memory_space<vmem>>, vector<3200x5xbf16>
    %cst = arith.constant dense<0.000000e+00> : vector<2x5xf32>
    %2 = tpu.matmul %0, %1, %cst {dimension_numbers = #tpu.dot_dimension_numbers<[1], [0], [0], [1], [0, 0, 1, 1], [], []>} : vector<2x3200xbf16>, vector<3200x5xbf16>, vector<2x5xf32> -> vector<2x5xf32>
    %c0_3 = arith.constant 0 : index
    %c0_4 = arith.constant 0 : index
    %3 = vector.load %arg3[%c0_3, %c0_4] : memref<1x5xf32, #tpu.memory_space<vmem>>, vector<1x5xf32>
    %4 = vector.broadcast %3 : vector<1x5xf32> to vector<2x5xf32>
    %5 = arith.addf %2, %4 : vector<2x5xf32>
    %6 = math.tanh %5 : vector<2x5xf32>
    %cst_5 = arith.constant 2.000000e+00 : f32
    %7 = vector.broadcast %cst_5 : f32 to vector<2x5xf32>
    %8 = arith.mulf %6, %7 : vector<2x5xf32>
    %c0_6 = arith.constant 0 : index
    %c0_7 = arith.constant 0 : index
    %9 = vector.load %arg4[%c0_6, %c0_7] : memref<2x5xf32, #tpu.memory_space<vmem>>, vector<2x5xf32>
    tpu.vector_store %arg4[%c0_6, %c0_7], %8 {strides = array<i32>} : memref<2x5xf32, #tpu.memory_space<vmem>>, vector<2x5xf32>,
    return
  }
  func.func @transform_0(%arg0: i32) -> (i32, i32) {
    %c0_i32 = arith.constant 0 : i32
    %c0_i32_0 = arith.constant 0 : i32
    %c0_i32_1 = arith.constant 0 : i32
    return %c0_i32, %c0_i32_0 : i32, i32
  }
  func.func @transform_1(%arg0: i32) -> (i32, i32) {
    %c0_i32 = arith.constant 0 : i32
    %c0_i32_0 = arith.constant 0 : i32
    %c0_i32_1 = arith.constant 0 : i32
    return %c0_i32, %c0_i32_0 : i32, i32
  }
  func.func @transform_2(%arg0: i32) -> (i32, i32) {
    %c0_i32 = arith.constant 0 : i32
    %c0_i32_0 = arith.constant 0 : i32
    %c0_i32_1 = arith.constant 0 : i32
    return %c0_i32, %c0_i32_0 : i32, i32
  }
  func.func @transform_3(%arg0: i32) -> (i32, i32) {
    %c0_i32 = arith.constant 0 : i32
    %c0_i32_0 = arith.constant 0 : i32
    %c0_i32_1 = arith.constant 0 : i32
    return %c0_i32, %c0_i32_0 : i32, i32
  }
}

</mosaic_0001>

<bundles_post_ra>
// kernel: dqn_forward.4
= control target key start
LH: loop header
LB: loop body
LE: loop exit
PB: predicated region body
PF: predicated region fallthrough
CT: control target
= control target key end

     0   :  { %vm291_vm0 = vcmask 1044480   ;;  %vm292_vm1 = vcmask 1045504   ;;  %v1570_v0 = vmov 0.0   ;;  %v1571_v2 = vmov 65535   ;;  %s2909_s1 = inlined_call_operand.vmem [shape: bf16[27,16], index: 1, kind: input, shape index: {}]   ;;  %s2910_s0 = inlined_call_operand.vmem [shape: bf16[392,27], index: 0, kind: input, shape index: {}]   ;;  %s2911_s2 = inlined_call_operand.vmem [shape: f32[1,16], index: 2, kind: input, shape index: {}]   ;;  %s2912_s3 = inlined_call_operand.vmem [shape: f32[1,16], index: 3, kind: input, shape index: {}]   ;;  %s2913_s4 = inlined_call_operand.vmem [shape: f32[1,16], index: 4, kind: input, shape index: {}]   ;;  %s2914_s5 = inlined_call_operand.vmem [shape: bf16[392,16], index: 5, kind: output, shape index: {}]  }
   0x1   :  { %1430 = vmatprep.subr.bf16.mxu0 %v1570_v0  ;;  %v1541_v1 = vld [vmem:[%s2909_s1] sm:$0xff]   ;;  %v293_v3 = vsel %vm291_vm0, 4294967295, %v1571_v2  ;;  %1534 = vmatprep.subr.bf16.mxu1 %v1570_v0  ;;  %v1542_v4 = vld [vmem:[%s2909_s1 + $0x8] sm:$0x3f]   ;;  %vm1572_vm2 = vmmov 0   ;;  %vm215_vm3 = vcmask 220160  }
   0x2   :  { %1431 = vmatpush3.bf16.msra.mxu0 %v1541_v1  ;;  %v294_v5 = vsel %vm292_vm1, %v293_v3, 0  ;;  %1536 = vmatpush3.bf16.msra.mxu1 %v1541_v1  ;;  %v1543_v7 = vld [vmem:[%s2910_s0] sm:$0xff]   ;;  %v1550_v8 = vld [vmem:[%s2910_s0 + $0x68] sm:$0xff]   ;;  %v1552_v10 = vld [vmem:[%s2910_s0 + $0x70] sm:$0xff]   ;;  %vm530_vm4 = vcmask 130048   ;;  %vm1197_vm5 = vcmask 125952  }
   0x3   :  { %1432 = vmatprep.subr.bf16.mxu0 %v1570_v0  ;;  %v296_v6 = vand.u32 %v1542_v4, %v294_v5  ;;  %1434 = vmatprep.mubr.msk.bf16.mxu0 %vm1572_vm2, %v1570_v0  ;;  %v1544_v9 = vld [vmem:[%s2910_s0 + $0x8] sm:$0xff]   ;;  %v1545_v11 = vld [vmem:[%s2910_s0 + $0x10] sm:$0xff]   ;;  %v1554_v12 = vld [vmem:[%s2910_s0 + $0x78] sm:$0xff]  }
   0x4   :  { %1535 = vmatprep.subr.bf16.mxu1 %v1570_v0  ;;  %1486 = vmatprep.mubr.msk.bf16.mxu1 %vm1572_vm2, %v1570_v0  ;;  %v1546_v13 = vld [vmem:[%s2910_s0 + $0x18] sm:$0xff]   ;;  %v1556_v14 = vld [vmem:[%s2910_s0 + $0x80] sm:$0xff]   ;;  %v1558_v16 = vld [vmem:[%s2910_s0 + $0x88] sm:$0xff]  }
   0x5   :  { %v1547_v15 = vld [vmem:[%s2910_s0 + $0x20] sm:$0xff]   ;;  %v1548_v17 = vld [vmem:[%s2910_s0 + $0x28] sm:$0xff]   ;;  %v1560_v18 = vld [vmem:[%s2910_s0 + $0x90] sm:$0xff]  }
   0x6   :  { %1433 = vmatpush3.bf16.msra.mxu0 %v296_v6  ;;  %1537 = vmatpush3.bf16.msra.mxu1 %v296_v6  ;;  %v1549_v19 = vld [vmem:[%s2910_s0 + $0x30] sm:$0xff]   ;;  %v1562_v20 = vld [vmem:[%s2910_s0 + $0x98] sm:$0xff]   ;;  %v1563_v22 = vld [vmem:[%s2910_s0 + $0xa0] sm:$0xff]  }
   0x7   :  { %v1551_v21 = vld [vmem:[%s2910_s0 + $0x38] sm:$0xff]   ;;  %v1553_v23 = vld [vmem:[%s2910_s0 + $0x40] sm:$0xff]   ;;  %v1564_v24 = vld [vmem:[%s2910_s0 + $0xa8] sm:$0xff]  }
   0x8   :  { %v1555_v25 = vld [vmem:[%s2910_s0 + $0x48] sm:$0xff]   ;;  %v1565_v26 = vld [vmem:[%s2910_s0 + $0xb0] sm:$0xff]   ;;  %v1566_v28 = vld [vmem:[%s2910_s0 + $0xb8] sm:$0xff]  }
   0x9   :  { %1435 = vmatmul.mubr.msk.bf16.vlgmr.msra.gmra.mrb[0].mxu0 %vm215_vm3, %v1543_v7  ;;  %1487 = vmatmul.mubr.msk.bf16.vlgmr.msra.gmra.mrb[0].mxu1 %vm215_vm3, %v1550_v8  ;;  %v1557_v27 = vld [vmem:[%s2910_s0 + $0x50] sm:$0xff]   ;;  %v1559_v29 = vld [vmem:[%s2910_s0 + $0x58] sm:$0xff]   ;;  %v1567_v30 = vld [vmem:[%s2910_s0 + $0xc0] ss:$0 sps:$4 sm:$0xff]  }
   0xa   :  { %1438 = vmatprep.mubr.msk.bf16.mxu0 %vm1572_vm2, %v1570_v0  ;;  %1490 = vmatprep.mubr.msk.bf16.mxu1 %vm1572_vm2, %v1570_v0  ;;  %v1561_v31 = vld [vmem:[%s2910_s0 + $0x60] sm:$0xff]  }
   0xb   :  { %v1778_v56 = vld [vmem:[%s2911_s2] ss:$0 sm:$0xff] }
  0x11   :  { %1439 = vmatmul.mubr.msk.bf16.gmra.mrb[4].mxu0 %vm215_vm3, %v1544_v9  ;;  %1491 = vmatmul.mubr.msk.bf16.gmra.mrb[4].mxu1 %vm215_vm3, %v1552_v10 }
  0x12   :  { %1442 = vmatprep.mubr.msk.bf16.mxu0 %vm1572_vm2, %v1570_v0  ;;  %1494 = vmatprep.mubr.msk.bf16.mxu1 %vm1572_vm2, %v1570_v0 }
  0x19   :  { %1443 = vmatmul.mubr.msk.bf16.gmra.mrb[8].mxu0 %vm215_vm3, %v1545_v11  ;;  %1495 = vmatmul.mubr.msk.bf16.gmra.mrb[8].mxu1 %vm215_vm3, %v1554_v12 }
  0x1a   :  { %1446 = vmatprep.mubr.msk.bf16.mxu0 %vm1572_vm2, %v1570_v0  ;;  %1498 = vmatprep.mubr.msk.bf16.mxu1 %vm1572_vm2, %v1570_v0 }
  0x21   :  { %1447 = vmatmul.mubr.msk.bf16.gmra.mrb[12].mxu0 %vm215_vm3, %v1546_v13  ;;  %1499 = vmatmul.mubr.msk.bf16.gmra.mrb[12].mxu1 %vm215_vm3, %v1556_v14 }
  0x22   :  { %1450 = vmatprep.mubr.msk.bf16.mxu0 %vm1572_vm2, %v1570_v0  ;;  %1502 = vmatprep.mubr.msk.bf16.mxu1 %vm1572_vm2, %v1570_v0 }
  0x29   :  { %1451 = vmatmul.mubr.msk.bf16.gmra.mrb[16].mxu0 %vm215_vm3, %v1547_v15  ;;  %1503 = vmatmul.mubr.msk.bf16.gmra.mrb[16].mxu1 %vm215_vm3, %v1558_v16 }
  0x2a   :  { %1454 = vmatprep.mubr.msk.bf16.mxu0 %vm1572_vm2, %v1570_v0  ;;  %1506 = vmatprep.mubr.msk.bf16.mxu1 %vm1572_vm2, %v1570_v0 }
  0x31   :  { %1455 = vmatmul.mubr.msk.bf16.gmra.mrb[20].mxu0 %vm215_vm3, %v1548_v17  ;;  %1507 = vmatmul.mubr.msk.bf16.gmra.mrb[20].mxu1 %vm215_vm3, %v1560_v18 }
  0x32   :  { %1458 = vmatprep.mubr.msk.bf16.mxu0 %vm1572_vm2, %v1570_v0  ;;  %1510 = vmatprep.mubr.msk.bf16.mxu1 %vm1572_vm2, %v1570_v0 }
  0x39   :  { %1459 = vmatmul.mubr.msk.bf16.gmra.mrb[24].mxu0 %vm215_vm3, %v1549_v19  ;;  %1511 = vmatmul.mubr.msk.bf16.gmra.mrb[24].mxu1 %vm215_vm3, %v1562_v20 }
  0x3a   :  { %1462 = vmatprep.mubr.msk.bf16.mxu0 %vm1572_vm2, %v1570_v0  ;;  %1514 = vmatprep.mubr.msk.bf16.mxu1 %vm1572_vm2, %v1570_v0 }
  0x41   :  { %1463 = vmatmul.mubr.msk.bf16.gmra.mrb[28].mxu0 %vm215_vm3, %v1551_v21  ;;  %1515 = vmatmul.mubr.msk.bf16.gmra.mrb[28].mxu1 %vm215_vm3, %v1563_v22 }
  0x42   :  { %1466 = vmatprep.mubr.msk.bf16.mxu0 %vm1572_vm2, %v1570_v0  ;;  %1518 = vmatprep.mubr.msk.bf16.mxu1 %vm1572_vm2, %v1570_v0 }
  0x49   :  { %1467 = vmatmul.mubr.msk.bf16.gmra.mrb[32].mxu0 %vm215_vm3, %v1553_v23  ;;  %1519 = vmatmul.mubr.msk.bf16.gmra.mrb[32].mxu1 %vm215_vm3, %v1564_v24 }
  0x4a   :  { %1470 = vmatprep.mubr.msk.bf16.mxu0 %vm1572_vm2, %v1570_v0  ;;  %1522 = vmatprep.mubr.msk.bf16.mxu1 %vm1572_vm2, %v1570_v0 }
  0x51   :  { %1471 = vmatmul.mubr.msk.bf16.gmra.mrb[36].mxu0 %vm215_vm3, %v1555_v25  ;;  %1523 = vmatmul.mubr.msk.bf16.gmra.mrb[36].mxu1 %vm215_vm3, %v1565_v26 }
  0x52   :  { %1474 = vmatprep.mubr.msk.bf16.mxu0 %vm1572_vm2, %v1570_v0  ;;  %1526 = vmatprep.mubr.msk.bf16.mxu1 %vm1572_vm2, %v1570_v0 }
  0x59   :  { %1475 = vmatmul.mubr.msk.bf16.gmra.mrb[40].mxu0 %vm215_vm3, %v1557_v27  ;;  %1527 = vmatmul.mubr.msk.bf16.gmra.mrb[40].mxu1 %vm215_vm3, %v1566_v28 }
  0x5a   :  { %1478 = vmatprep.mubr.msk.bf16.mxu0 %vm1572_vm2, %v1570_v0  ;;  %1530 = vmatprep.mubr.msk.bf16.mxu1 %vm1572_vm2, %v1570_v0 }
  0x61   :  { %1479 = vmatmul.mubr.msk.bf16.gmra.mrb[44].mxu0 %vm215_vm3, %v1559_v29  ;;  %1531 = vmatmul.mubr.msk.bf16.gmra.mrb[44].mxu1 %vm215_vm3, %v1567_v30 }
  0x62   :  { %1482 = vmatprep.mubr.msk.bf16.mxu0 %vm1572_vm2, %v1570_v0 }
  0x69   :  { %1483 = vmatmul.mubr.msk.bf16.gmra.mrb[48].mxu0 %vm215_vm3, %v1561_v31 }
  0xdc   :  { %v332_v32 = vpop.f32.mrb[0].mxu0  ;;  %v1763_v36 = vpop.f32.mrb[0].mxu1 }
  0xdd   :  { %v1436_v33 = vpop.f32.mrb[1].mxu0  ;;  %v1488_v37 = vpop.f32.mrb[1].mxu1  ;;  %v1784_v61 = vadd.f32 %v1778_v56, %v332_v32 }
  0xde   :  { %v335_v34 = vpop.f32.mrb[2].mxu0  ;;  %v1765_v38 = vpop.f32.mrb[2].mxu1 }
  0xdf   :  { %v1437_v35 = vpop.f32.mrb[3].mxu0  ;;  %v1489_v39 = vpop.f32.mrb[3].mxu1  ;;  %v1781_v58 = vadd.f32 %v1778_v56, %v335_v34  ;;  %v531_v5 = vsel %vm530_vm4, %v1784_v61, 0.0 }
  0xe1   :  { %v532_v2 = vsel %vm530_vm4, %v1781_v58, 0.0 }
  0xe2   :  { %v533_v8 = vadd.f32 %v532_v2, %v531_v5 }
  0xe4   :  { %v340_v40 = vpop.f32.mrb[4].mxu0  ;;  %v1767_v44 = vpop.f32.mrb[4].mxu1 }
  0xe5   :  { %v1440_v41 = vpop.f32.mrb[5].mxu0  ;;  %v1492_v45 = vpop.f32.mrb[5].mxu1  ;;  %v1787_v62 = vadd.f32 %v1778_v56, %v340_v40 }
  0xe6   :  { %v343_v42 = vpop.f32.mrb[6].mxu0  ;;  %v1769_v46 = vpop.f32.mrb[6].mxu1 }
  0xe7   :  { %v1441_v43 = vpop.f32.mrb[7].mxu0  ;;  %v1493_v47 = vpop.f32.mrb[7].mxu1  ;;  %v534_v6 = vsel %vm530_vm4, %v1787_v62, 0.0  ;;  %v1800_v7 = vadd.f32 %v1778_v56, %v343_v42 }
  0xe8   :  { %v535_v12 = vadd.f32 %v534_v6, %v533_v8 }
  0xe9   :  { %v536_v14 = vsel %vm530_vm4, %v1800_v7, 0.0 }
  0xea   :  { %v537_v21 = vadd.f32 %v536_v14, %v535_v12 }
  0xec   :  { %v348_v48 = vpop.f32.mrb[8].mxu0  ;;  %v1771_v52 = vpop.f32.mrb[8].mxu1 }
  0xed   :  { %v1444_v49 = vpop.f32.mrb[9].mxu0  ;;  %v1496_v53 = vpop.f32.mrb[9].mxu1  ;;  %v1803_v10 = vadd.f32 %v1778_v56, %v348_v48 }
  0xee   :  { %v351_v50 = vpop.f32.mrb[10].mxu0  ;;  %v1773_v54 = vpop.f32.mrb[10].mxu1 }
  0xef   :  { %v1445_v51 = vpop.f32.mrb[11].mxu0  ;;  %v1497_v55 = vpop.f32.mrb[11].mxu1  ;;  %v538_v18 = vsel %vm530_vm4, %v1803_v10, 0.0  ;;  %v1812_v19 = vadd.f32 %v1778_v56, %v351_v50 }
  0xf0   :  { %v539_v24 = vadd.f32 %v538_v18, %v537_v21 }
  0xf1   :  { %v540_v26 = vsel %vm530_vm4, %v1812_v19, 0.0 }
  0xf2   :  { %v541_v33 = vadd.f32 %v540_v26, %v539_v24 }
  0xf4   :  { %v356_v57 = vpop.f32.mrb[12].mxu0  ;;  %v1789_v0 = vpop.f32.mrb[12].mxu1 }
  0xf5   :  { %v1448_v59 = vpop.f32.mrb[13].mxu0  ;;  %v1500_v1 = vpop.f32.mrb[13].mxu1  ;;  %v1817_v23 = vadd.f32 %v1778_v56, %v356_v57 }
  0xf6   :  { %v359_v60 = vpop.f32.mrb[14].mxu0  ;;  %v1793_v3 = vpop.f32.mrb[14].mxu1 }
  0xf7   :  { %v1449_v63 = vpop.f32.mrb[15].mxu0  ;;  %v1501_v4 = vpop.f32.mrb[15].mxu1  ;;  %v542_v29 = vsel %vm530_vm4, %v1817_v23, 0.0  ;;  %v1824_v30 = vadd.f32 %v1778_v56, %v359_v60 }
  0xf8   :  { %v543_v39 = vadd.f32 %v542_v29, %v541_v33 }
  0xf9   :  { %v544_v41 = vsel %vm530_vm4, %v1824_v30, 0.0 }
  0xfa   :  { %v545_v48 = vadd.f32 %v544_v41, %v543_v39 }
  0xfc   :  { %v364_v9 = vpop.f32.mrb[16].mxu0  ;;  %v1807_v16 = vpop.f32.mrb[16].mxu1 }
  0xfd   :  { %v1452_v11 = vpop.f32.mrb[17].mxu0  ;;  %v1504_v17 = vpop.f32.mrb[17].mxu1  ;;  %v1829_v35 = vadd.f32 %v1778_v56, %v364_v9 }
  0xfe   :  { %v367_v13 = vpop.f32.mrb[18].mxu0  ;;  %v1814_v20 = vpop.f32.mrb[18].mxu1 }
  0xff   :  { %v1453_v15 = vpop.f32.mrb[19].mxu0  ;;  %v1505_v22 = vpop.f32.mrb[19].mxu1  ;;  %v546_v43 = vsel %vm530_vm4, %v1829_v35, 0.0  ;;  %v1838_v45 = vadd.f32 %v1778_v56, %v367_v13 }
 0x100   :  { %v547_v55 = vadd.f32 %v546_v43, %v545_v48 }
 0x101   :  { %v548_v59 = vsel %vm530_vm4, %v1838_v45, 0.0 }
 0x102   :  { %v549_v4 = vadd.f32 %v548_v59, %v547_v55 }
 0x104   :  { %v372_v25 = vpop.f32.mrb[20].mxu0  ;;  %v1826_v32 = vpop.f32.mrb[20].mxu1 }
 0x105   :  { %v1456_v27 = vpop.f32.mrb[21].mxu0  ;;  %v1508_v34 = vpop.f32.mrb[21].mxu1  ;;  %v1841_v50 = vadd.f32 %v1778_v56, %v372_v25 }
 0x106   :  { %v375_v28 = vpop.f32.mrb[22].mxu0  ;;  %v1831_v37 = vpop.f32.mrb[22].mxu1 }
 0x107   :  { %v1457_v31 = vpop.f32.mrb[23].mxu0  ;;  %v1509_v40 = vpop.f32.mrb[23].mxu1  ;;  %v550_v1 = vsel %vm530_vm4, %v1841_v50, 0.0  ;;  %v1852_v2 = vadd.f32 %v1778_v56, %v375_v28 }
 0x108   :  { %v551_v9 = vadd.f32 %v550_v1, %v549_v4 }
 0x109   :  { %v552_v12 = vsel %vm530_vm4, %v1852_v2, 0.0 }
 0x10a   :  { %v553_v22 = vadd.f32 %v552_v12, %v551_v9 }
 0x10c   :  { %v380_v42 = vpop.f32.mrb[24].mxu0  ;;  %v1843_v53 = vpop.f32.mrb[24].mxu1 }
 0x10d   :  { %v1460_v47 = vpop.f32.mrb[25].mxu0  ;;  %v1512_v57 = vpop.f32.mrb[25].mxu1  ;;  %v1855_v6 = vadd.f32 %v1778_v56, %v380_v42 }
 0x10e   :  { %v383_v49 = vpop.f32.mrb[26].mxu0  ;;  %v1847_v60 = vpop.f32.mrb[26].mxu1 }
 0x10f   :  { %v1461_v51 = vpop.f32.mrb[27].mxu0  ;;  %v1513_v63 = vpop.f32.mrb[27].mxu1  ;;  %v554_v17 = vsel %vm530_vm4, %v1855_v6, 0.0  ;;  %v1864_v18 = vadd.f32 %v1778_v56, %v383_v49 }
 0x110   :  { %v555_v26 = vadd.f32 %v554_v17, %v553_v22 }
 0x111   :  { %v556_v28 = vsel %vm530_vm4, %v1864_v18, 0.0 }
 0x112   :  { %v557_v41 = vadd.f32 %v556_v28, %v555_v26 }
 0x114   :  { %v388_v5 = vpop.f32.mrb[28].mxu0  ;;  %v1859_v14 = vpop.f32.mrb[28].mxu1 }
 0x115   :  { %v1464_v8 = vpop.f32.mrb[29].mxu0  ;;  %v1516_v15 = vpop.f32.mrb[29].mxu1  ;;  %v1869_v25 = vadd.f32 %v1778_v56, %v388_v5 }
 0x116   :  { %v391_v11 = vpop.f32.mrb[30].mxu0  ;;  %v1866_v21 = vpop.f32.mrb[30].mxu1 }
 0x117   :  { %v1465_v13 = vpop.f32.mrb[31].mxu0  ;;  %v1517_v24 = vpop.f32.mrb[31].mxu1  ;;  %v558_v33 = vsel %vm530_vm4, %v1869_v25, 0.0  ;;  %v1876_v34 = vadd.f32 %v1778_v56, %v391_v11 }
 0x118   :  { %v559_v48 = vadd.f32 %v558_v33, %v557_v41 }
 0x119   :  { %v560_v51 = vsel %vm530_vm4, %v1876_v34, 0.0 }
 0x11a   :  { %v561_v1 = vadd.f32 %v560_v51, %v559_v48 }
 0x11c   :  { %v396_v27 = vpop.f32.mrb[32].mxu0  ;;  %v1878_v40 = vpop.f32.mrb[32].mxu1 }
 0x11d   :  { %v1468_v29 = vpop.f32.mrb[33].mxu0  ;;  %v1520_v42 = vpop.f32.mrb[33].mxu1  ;;  %v1881_v43 = vadd.f32 %v1778_v56, %v396_v27 }
 0x11e   :  { %v399_v31 = vpop.f32.mrb[34].mxu0  ;;  %v1883_v47 = vpop.f32.mrb[34].mxu1 }
 0x11f   :  { %v1469_v39 = vpop.f32.mrb[35].mxu0  ;;  %v1521_v49 = vpop.f32.mrb[35].mxu1  ;;  %v562_v57 = vsel %vm530_vm4, %v1881_v43, 0.0  ;;  %v1890_v59 = vadd.f32 %v1778_v56, %v399_v31 }
 0x120   :  { %v563_v11 = vadd.f32 %v562_v57, %v561_v1 }
 0x121   :  { %v564_v13 = vsel %vm530_vm4, %v1890_v59, 0.0 }
 0x122   :  { %v565_v26 = vadd.f32 %v564_v13, %v563_v11 }
 0x124   :  { %v404_v55 = vpop.f32.mrb[36].mxu0  ;;  %v1895_v9 = vpop.f32.mrb[36].mxu1 }
 0x125   :  { %v1472_v63 = vpop.f32.mrb[37].mxu0  ;;  %v1893_v5 = vadd.f32 %v1778_v56, %v404_v55  ;;  %v1524_v12 = vpop.f32.mrb[37].mxu1 }
 0x126   :  { %v407_v4 = vpop.f32.mrb[38].mxu0  ;;  %v1899_v15 = vpop.f32.mrb[38].mxu1 }
 0x127   :  { %v1473_v8 = vpop.f32.mrb[39].mxu0  ;;  %v1525_v17 = vpop.f32.mrb[39].mxu1  ;;  %v566_v22 = vsel %vm530_vm4, %v1893_v5, 0.0  ;;  %v1904_v24 = vadd.f32 %v1778_v56, %v407_v4 }
 0x128   :  { %v567_v31 = vadd.f32 %v566_v22, %v565_v26 }
 0x129   :  { %v568_v39 = vsel %vm530_vm4, %v1904_v24, 0.0 }
 0x12a   :  { %v569_v57 = vadd.f32 %v568_v39, %v567_v31 }
 0x12c   :  { %v412_v27 = vpop.f32.mrb[40].mxu0  ;;  %v1911_v42 = vpop.f32.mrb[40].mxu1 }
 0x12d   :  { %v1907_v28 = vadd.f32 %v1778_v56, %v412_v27  ;;  %v1476_v29 = vpop.f32.mrb[41].mxu0  ;;  %v1528_v48 = vpop.f32.mrb[41].mxu1 }
 0x12e   :  { %v415_v33 = vpop.f32.mrb[42].mxu0  ;;  %v1918_v55 = vpop.f32.mrb[42].mxu1 }
 0x12f   :  { %v1477_v41 = vpop.f32.mrb[43].mxu0  ;;  %v570_v49 = vsel %vm530_vm4, %v1907_v28, 0.0  ;;  %v1916_v51 = vadd.f32 %v1778_v56, %v415_v33  ;;  %v1529_v63 = vpop.f32.mrb[43].mxu1 }
 0x130   :  { %v571_v1 = vadd.f32 %v570_v49, %v569_v57 }
 0x131   :  { %v572_v8 = vsel %vm530_vm4, %v1916_v51, 0.0 }
 0x132   :  { %v573_v29 = vadd.f32 %v572_v8, %v571_v1 }
 0x134   :  { %v420_v4 = vpop.f32.mrb[44].mxu0  ;;  %v1930_v27 = vpop.f32.mrb[44].mxu1 }
 0x135   :  { %v1923_v11 = vadd.f32 %v1778_v56, %v420_v4  ;;  %v1480_v12 = vpop.f32.mrb[45].mxu0  ;;  %v1532_v31 = vpop.f32.mrb[45].mxu1 }
 0x136   :  { %v423_v13 = vpop.f32.mrb[46].mxu0  ;;  %v527_v33 = vpop.f32.mrb[46].mxu1 }
 0x137   :  { %v574_v17 = vsel %vm530_vm4, %v1923_v11, 0.0  ;;  %v1928_v22 = vadd.f32 %v1778_v56, %v423_v13  ;;  %v1481_v26 = vpop.f32.mrb[47].mxu0  ;;  %v1533_v41 = vpop.f32.mrb[47].mxu1  ;;  %v1939_v13 = vadd.f32 %v1778_v56, %v1763_v36 }
 0x138   :  { %v575_v39 = vadd.f32 %v574_v17, %v573_v29  ;;  %v1948_v29 = vadd.f32 %v1778_v56, %v1765_v38 }
 0x139   :  { %v576_v48 = vsel %vm530_vm4, %v1928_v22, 0.0  ;;  %v582_v36 = vsel %vm530_vm4, %v1939_v13, 0.0 }
 0x13a   :  { %v577_v4 = vadd.f32 %v576_v48, %v575_v39  ;;  %v1956_v39 = vadd.f32 %v1778_v56, %v1767_v44  ;;  %v584_v48 = vsel %vm530_vm4, %v1948_v29, 0.0 }
 0x13c   :  { %v428_v49 = vpop.f32.mrb[48].mxu0 }
 0x13d   :  { %v1935_v57 = vadd.f32 %v1778_v56, %v428_v49  ;;  %v1484_v63 = vpop.f32.mrb[49].mxu0  ;;  %v1962_v49 = vadd.f32 %v1778_v56, %v1769_v46 }
 0x13e   :  { %v431_v12 = vpop.f32.mrb[50].mxu0  ;;  %v586_v63 = vsel %vm530_vm4, %v1956_v39, 0.0 }
 0x13f   :  { %v578_v1 = vsel %vm530_vm4, %v1935_v57, 0.0  ;;  %v1944_v8 = vadd.f32 %v1778_v56, %v431_v12  ;;  %v1485_v17 = vpop.f32.mrb[51].mxu0  ;;  %v588_v44 = vsel %vm530_vm4, %v1962_v49, 0.0 }
 0x140   :  { %v579_v26 = vadd.f32 %v578_v1, %v577_v4  ;;  %v1968_v4 = vadd.f32 %v1778_v56, %v1771_v52  ;;  %v1974_v1 = vadd.f32 %v1778_v56, %v1773_v54 }
 0x141   :  { %v580_v31 = vsel %vm530_vm4, %v1944_v8, 0.0 }
 0x142   :  { %v581_v33 = vadd.f32 %v580_v31, %v579_v26  ;;  %v590_v46 = vsel %vm530_vm4, %v1968_v4, 0.0  ;;  %v1980_v26 = vadd.f32 %v1778_v56, %v1789_v0  ;;  %v592_v52 = vsel %vm530_vm4, %v1974_v1, 0.0 }
 0x144   :  { %v583_v41 = vadd.f32 %v582_v36, %v581_v33  ;;  %v1986_v33 = vadd.f32 %v1778_v56, %v1793_v3  ;;  %v594_v54 = vsel %vm530_vm4, %v1980_v26, 0.0 }
 0x146   :  { %v585_v38 = vadd.f32 %v584_v48, %v583_v41  ;;  %v1992_v41 = vadd.f32 %v1778_v56, %v1807_v16  ;;  %v596_v0 = vsel %vm530_vm4, %v1986_v33, 0.0 }
 0x148   :  { %v587_v12 = vadd.f32 %v586_v63, %v585_v38  ;;  %v1998_v38 = vadd.f32 %v1778_v56, %v1814_v20  ;;  %v598_v3 = vsel %vm530_vm4, %v1992_v41, 0.0 }
 0x14a   :  { %v589_v17 = vadd.f32 %v588_v44, %v587_v12  ;;  %v2004_v12 = vadd.f32 %v1778_v56, %v1826_v32  ;;  %v600_v16 = vsel %vm530_vm4, %v1998_v38, 0.0 }
 0x14c   :  { %v591_v31 = vadd.f32 %v590_v46, %v589_v17  ;;  %v2010_v17 = vadd.f32 %v1778_v56, %v1831_v37  ;;  %v602_v20 = vsel %vm530_vm4, %v2004_v12, 0.0 }
 0x14e   :  { %v593_v36 = vadd.f32 %v592_v52, %v591_v31  ;;  %v2016_v31 = vadd.f32 %v1778_v56, %v1843_v53  ;;  %v604_v32 = vsel %vm530_vm4, %v2010_v17, 0.0 }
 0x150   :  { %v595_v48 = vadd.f32 %v594_v54, %v593_v36  ;;  %v2022_v36 = vadd.f32 %v1778_v56, %v1847_v60  ;;  %v606_v37 = vsel %vm530_vm4, %v2016_v31, 0.0 }
 0x152   :  { %v597_v63 = vadd.f32 %v596_v0, %v595_v48  ;;  %v2028_v48 = vadd.f32 %v1778_v56, %v1859_v14  ;;  %v608_v53 = vsel %vm530_vm4, %v2022_v36, 0.0 }
 0x154   :  { %v599_v44 = vadd.f32 %v598_v3, %v597_v63  ;;  %v2034_v63 = vadd.f32 %v1778_v56, %v1866_v21  ;;  %v610_v60 = vsel %vm530_vm4, %v2028_v48, 0.0 }
 0x156   :  { %v601_v46 = vadd.f32 %v600_v16, %v599_v44  ;;  %v2040_v44 = vadd.f32 %v1778_v56, %v1878_v40  ;;  %v612_v14 = vsel %vm530_vm4, %v2034_v63, 0.0 }
 0x158   :  { %v603_v52 = vadd.f32 %v602_v20, %v601_v46  ;;  %v2046_v46 = vadd.f32 %v1778_v56, %v1883_v47  ;;  %v614_v21 = vsel %vm530_vm4, %v2040_v44, 0.0 }
 0x15a   :  { %v605_v54 = vadd.f32 %v604_v32, %v603_v52  ;;  %v2052_v52 = vadd.f32 %v1778_v56, %v1895_v9  ;;  %v616_v40 = vsel %vm530_vm4, %v2046_v46, 0.0 }
 0x15c   :  { %v607_v0 = vadd.f32 %v606_v37, %v605_v54  ;;  %v2058_v54 = vadd.f32 %v1778_v56, %v1899_v15  ;;  %v618_v47 = vsel %vm530_vm4, %v2052_v52, 0.0  ;;  %v2074_v15 = vadd.f32 %v1778_v56, %v1930_v27 }
 0x15e   :  { %v609_v3 = vadd.f32 %v608_v53, %v607_v0  ;;  %2921 = vst [vmem:[#allocation2_spill] sm:$0xff] %v2058_v54  ;;  %v2064_v0 = vadd.f32 %v1778_v56, %v1911_v42  ;;  %v620_v9 = vsel %vm530_vm4, %v2058_v54, 0.0 }
 0x160   :  { %v611_v16 = vadd.f32 %v610_v60, %v609_v3  ;;  %v2070_v3 = vadd.f32 %v1778_v56, %v1918_v55 }
 0x162   :  { %v613_v20 = vadd.f32 %v612_v14, %v611_v16  ;;  %v622_v16 = vsel %vm530_vm4, %v2064_v0, 0.0  ;;  %v624_v42 = vsel %vm530_vm4, %v2070_v3, 0.0 }
 0x164   :  { %v615_v32 = vadd.f32 %v614_v21, %v613_v20  ;;  %v626_v20 = vsel %vm530_vm4, %v2074_v15, 0.0 }
 0x166   :  { %v617_v37 = vadd.f32 %v616_v40, %v615_v32 }
 0x168   :  { %v619_v53 = vadd.f32 %v618_v47, %v617_v37 }
 0x16a   :  { %v621_v60 = vadd.f32 %v620_v9, %v619_v53 }
 0x16c   :  { %v623_v14 = vadd.f32 %v622_v16, %v621_v60 }
 0x16e   :  { %v625_v21 = vadd.f32 %v624_v42, %v623_v14 }
 0x170   :  { %v627_v32 = vadd.f32 %v626_v20, %v625_v21 }
 0x172   :  { %v628_v40 = vrot.slane %v627_v32, 4 }
 0x174   :  { %v629_v55 = vadd.f32 %v628_v40, %v627_v32 }
 0x176   :  { %v630_v37 = vrot.slane %v629_v55, 2 }
 0x178   :  { %v631_v47 = vadd.f32 %v630_v37, %v629_v55 }
 0x17a   :  { %v632_v54 = vrot.slane %v631_v47, 1 }
 0x17c   :  { %v633_v56 = vadd.f32 %v632_v54, %v631_v47 }
 0x17e   :  { %v2082_v27 = vmul.f32 0.0025510204, %v633_v56 }
 0x180   :  { %v2086_v53 = vsub.f32 %v1784_v61, %v2082_v27  ;;  %v2090_v9 = vsub.f32 %v1781_v58, %v2082_v27  ;;  %v2094_v60 = vsub.f32 %v1787_v62, %v2082_v27  ;;  %v2098_v16 = vsub.f32 %v1800_v7, %v2082_v27 }
 0x181   :  { %v2106_v61 = vsub.f32 %v1803_v10, %v2082_v27  ;;  %v2112_v62 = vsub.f32 %v1812_v19, %v2082_v27  ;;  %v2120_v32 = vsub.f32 %v1817_v23, %v2082_v27  ;;  %v2127_v19 = vsub.f32 %v1824_v30, %v2082_v27 }
 0x182   :  { %v685_v54 = vmul.f32 %v2086_v53, %v2086_v53  ;;  %v686_v14 = vmul.f32 %v2090_v9, %v2090_v9  ;;  %v687_v58 = vmul.f32 %v2094_v60, %v2094_v60  ;;  %v688_v7 = vmul.f32 %v2098_v16, %v2098_v16 }
 0x183   :  { %v689_v10 = vmul.f32 %v2106_v61, %v2106_v61  ;;  %v690_v37 = vmul.f32 %v2112_v62, %v2112_v62  ;;  %v2134_v23 = vsub.f32 %v1829_v35, %v2082_v27  ;;  %v2141_v30 = vsub.f32 %v1838_v45, %v2082_v27 }
 0x184   :  { %v734_v42 = vsel %vm530_vm4, %v685_v54, 0.0  ;;  %v735_v20 = vsel %vm530_vm4, %v686_v14, 0.0  ;;  %v737_v40 = vsel %vm530_vm4, %v687_v58, 0.0  ;;  %v739_v47 = vsel %vm530_vm4, %v688_v7, 0.0 }
 0x185   :  { %v736_v21 = vadd.f32 %v735_v20, %v734_v42  ;;  %v691_v54 = vmul.f32 %v2120_v32, %v2120_v32  ;;  %v741_v14 = vsel %vm530_vm4, %v689_v10, 0.0  ;;  %v692_v42 = vmul.f32 %v2127_v19, %v2127_v19 }
 0x186   :  { %v743_v7 = vsel %vm530_vm4, %v690_v37, 0.0  ;;  %v2148_v35 = vsub.f32 %v1841_v50, %v2082_v27  ;;  %v2155_v45 = vsub.f32 %v1852_v2, %v2082_v27  ;;  %v2162_v50 = vsub.f32 %v1855_v6, %v2082_v27 }
 0x187   :  { %v738_v55 = vadd.f32 %v737_v40, %v736_v21  ;;  %v693_v21 = vmul.f32 %v2134_v23, %v2134_v23  ;;  %v745_v10 = vsel %vm530_vm4, %v691_v54, 0.0  ;;  %v747_v37 = vsel %vm530_vm4, %v692_v42, 0.0 }
 0x188   :  { %v2169_v2 = vsub.f32 %v1864_v18, %v2082_v27  ;;  %v2176_v6 = vsub.f32 %v1869_v25, %v2082_v27  ;;  %v2183_v18 = vsub.f32 %v1876_v34, %v2082_v27  ;;  %v2190_v25 = vsub.f32 %v1881_v43, %v2082_v27 }
 0x189   :  { %v740_v56 = vadd.f32 %v739_v47, %v738_v55  ;;  %v694_v55 = vmul.f32 %v2141_v30, %v2141_v30  ;;  %v749_v54 = vsel %vm530_vm4, %v693_v21, 0.0  ;;  %v2197_v34 = vsub.f32 %v1890_v59, %v2082_v27 }
 0x18a   :  { %v2204_v43 = vsub.f32 %v1893_v5, %v2082_v27  ;;  %v2211_v59 = vsub.f32 %v1904_v24, %v2082_v27  ;;  %v2218_v5 = vsub.f32 %v1907_v28, %v2082_v27  ;;  %v2225_v24 = vsub.f32 %v1916_v51, %v2082_v27 }
 0x18b   :  { %v742_v58 = vadd.f32 %v741_v14, %v740_v56  ;;  %v695_v56 = vmul.f32 %v2148_v35, %v2148_v35  ;;  %v751_v42 = vsel %vm530_vm4, %v694_v55, 0.0  ;;  %v2232_v28 = vsub.f32 %v1923_v11, %v2082_v27 }
 0x18c   :  { %v2239_v51 = vsub.f32 %v1928_v22, %v2082_v27  ;;  %v2246_v11 = vsub.f32 %v1935_v57, %v2082_v27  ;;  %v2253_v22 = vsub.f32 %v1944_v8, %v2082_v27  ;;  %v2260_v57 = vsub.f32 %v1939_v13, %v2082_v27 }
 0x18d   :  { %v744_v20 = vadd.f32 %v743_v7, %v742_v58  ;;  %v696_v58 = vmul.f32 %v2155_v45, %v2155_v45  ;;  %v753_v21 = vsel %vm530_vm4, %v695_v56, 0.0  ;;  %v2267_v8 = vsub.f32 %v1948_v29, %v2082_v27 }
 0x18e   :  { %v2274_v13 = vsub.f32 %v1956_v39, %v2082_v27  ;;  %v2281_v29 = vsub.f32 %v1962_v49, %v2082_v27  ;;  %v2288_v39 = vsub.f32 %v1968_v4, %v2082_v27  ;;  %v2295_v49 = vsub.f32 %v1974_v1, %v2082_v27 }
 0x18f   :  { %v746_v40 = vadd.f32 %v745_v10, %v744_v20  ;;  %v697_v20 = vmul.f32 %v2162_v50, %v2162_v50  ;;  %v755_v55 = vsel %vm530_vm4, %v696_v58, 0.0  ;;  %v2302_v4 = vsub.f32 %v1980_v26, %v2082_v27 }
 0x190   :  { %v2309_v1 = vsub.f32 %v1986_v33, %v2082_v27  ;;  %v2316_v26 = vsub.f32 %v1992_v41, %v2082_v27  ;;  %v2323_v33 = vsub.f32 %v1998_v38, %v2082_v27  ;;  %v2330_v41 = vsub.f32 %v2004_v12, %v2082_v27 }
 0x191   :  { %v748_v47 = vadd.f32 %v747_v37, %v746_v40  ;;  %v698_v40 = vmul.f32 %v2169_v2, %v2169_v2  ;;  %v757_v56 = vsel %vm530_vm4, %v697_v20, 0.0  ;;  %v2337_v38 = vsub.f32 %v2010_v17, %v2082_v27 }
 0x192   :  { %v2344_v12 = vsub.f32 %v2016_v31, %v2082_v27  ;;  %v2351_v17 = vsub.f32 %v2022_v36, %v2082_v27  ;;  %v2358_v31 = vsub.f32 %v2028_v48, %v2082_v27  ;;  %v2365_v36 = vsub.f32 %v2034_v63, %v2082_v27 }
 0x193   :  { %v750_v14 = vadd.f32 %v749_v54, %v748_v47  ;;  %v699_v47 = vmul.f32 %v2176_v6, %v2176_v6  ;;  %v759_v58 = vsel %vm530_vm4, %v698_v40, 0.0  ;;  %v2372_v48 = vsub.f32 %v2040_v44, %v2082_v27 }
 0x194   :  { %v2379_v63 = vsub.f32 %v2046_v46, %v2082_v27  ;;  %v2386_v44 = vsub.f32 %v2052_v52, %v2082_v27  ;;  %v2400_v52 = vsub.f32 %v2064_v0, %v2082_v27  ;;  %v2414_v0 = vsub.f32 %v2074_v15, %v2082_v27 }
 0x195   :  { %v752_v7 = vadd.f32 %v751_v42, %v750_v14  ;;  %v700_v14 = vmul.f32 %v2183_v18, %v2183_v18  ;;  %v761_v20 = vsel %vm530_vm4, %v699_v47, 0.0 }
 0x196   :  { %2922 = vst [vmem:[#allocation3_spill] sm:$0xff] %v2386_v44  ;;  %2925 = vst [vmem:[#allocation4_spill] sm:$0xff] %v2400_v52 }
 0x197   :  { %v754_v10 = vadd.f32 %v753_v21, %v752_v7  ;;  %v701_v7 = vmul.f32 %v2190_v25, %v2190_v25  ;;  %v763_v40 = vsel %vm530_vm4, %v700_v14, 0.0  ;;  %2927 = vst [vmem:[#allocation6_spill] sm:$0xff] %v2414_v0 }
 0x199   :  { %v756_v37 = vadd.f32 %v755_v55, %v754_v10  ;;  %v702_v10 = vmul.f32 %v2197_v34, %v2197_v34  ;;  %v765_v47 = vsel %vm530_vm4, %v701_v7, 0.0 }
 0x19b   :  { %v758_v54 = vadd.f32 %v757_v56, %v756_v37  ;;  %v703_v37 = vmul.f32 %v2204_v43, %v2204_v43  ;;  %v767_v14 = vsel %vm530_vm4, %v702_v10, 0.0 }
 0x19d   :  { %v760_v42 = vadd.f32 %v759_v58, %v758_v54  ;;  %v704_v54 = vmul.f32 %v2211_v59, %v2211_v59  ;;  %v769_v7 = vsel %vm530_vm4, %v703_v37, 0.0 }
 0x19f   :  { %v762_v21 = vadd.f32 %v761_v20, %v760_v42  ;;  %v705_v42 = vmul.f32 %v2218_v5, %v2218_v5  ;;  %v771_v10 = vsel %vm530_vm4, %v704_v54, 0.0 }
 0x1a1   :  { %v764_v55 = vadd.f32 %v763_v40, %v762_v21  ;;  %v706_v21 = vmul.f32 %v2225_v24, %v2225_v24  ;;  %v773_v37 = vsel %vm530_vm4, %v705_v42, 0.0 }
 0x1a3   :  { %v766_v56 = vadd.f32 %v765_v47, %v764_v55  ;;  %v707_v55 = vmul.f32 %v2232_v28, %v2232_v28  ;;  %v775_v54 = vsel %vm530_vm4, %v706_v21, 0.0 }
 0x1a5   :  { %v768_v58 = vadd.f32 %v767_v14, %v766_v56  ;;  %v708_v56 = vmul.f32 %v2239_v51, %v2239_v51  ;;  %v777_v42 = vsel %vm530_vm4, %v707_v55, 0.0 }
 0x1a7   :  { %v770_v20 = vadd.f32 %v769_v7, %v768_v58  ;;  %v709_v58 = vmul.f32 %v2246_v11, %v2246_v11  ;;  %v779_v21 = vsel %vm530_vm4, %v708_v56, 0.0 }
 0x1a9   :  { %v772_v40 = vadd.f32 %v771_v10, %v770_v20  ;;  %v710_v20 = vmul.f32 %v2253_v22, %v2253_v22  ;;  %v781_v55 = vsel %vm530_vm4, %v709_v58, 0.0 }
 0x1ab   :  { %v774_v47 = vadd.f32 %v773_v37, %v772_v40  ;;  %v711_v40 = vmul.f32 %v2260_v57, %v2260_v57  ;;  %v783_v56 = vsel %vm530_vm4, %v710_v20, 0.0 }
 0x1ad   :  { %v776_v14 = vadd.f32 %v775_v54, %v774_v47  ;;  %v712_v47 = vmul.f32 %v2267_v8, %v2267_v8  ;;  %v785_v58 = vsel %vm530_vm4, %v711_v40, 0.0 }
 0x1af   :  { %v778_v7 = vadd.f32 %v777_v42, %v776_v14  ;;  %v713_v14 = vmul.f32 %v2274_v13, %v2274_v13  ;;  %v787_v20 = vsel %vm530_vm4, %v712_v47, 0.0 }
 0x1b1   :  { %v780_v10 = vadd.f32 %v779_v21, %v778_v7  ;;  %v714_v7 = vmul.f32 %v2281_v29, %v2281_v29  ;;  %v789_v40 = vsel %vm530_vm4, %v713_v14, 0.0 }
 0x1b3   :  { %v782_v37 = vadd.f32 %v781_v55, %v780_v10  ;;  %v715_v10 = vmul.f32 %v2288_v39, %v2288_v39  ;;  %v791_v47 = vsel %vm530_vm4, %v714_v7, 0.0 }
 0x1b5   :  { %v784_v54 = vadd.f32 %v783_v56, %v782_v37  ;;  %v716_v37 = vmul.f32 %v2295_v49, %v2295_v49  ;;  %v793_v14 = vsel %vm530_vm4, %v715_v10, 0.0 }
 0x1b7   :  { %v786_v42 = vadd.f32 %v785_v58, %v784_v54  ;;  %v717_v54 = vmul.f32 %v2302_v4, %v2302_v4  ;;  %v795_v7 = vsel %vm530_vm4, %v716_v37, 0.0 }
 0x1b9   :  { %v788_v21 = vadd.f32 %v787_v20, %v786_v42  ;;  %v718_v42 = vmul.f32 %v2309_v1, %v2309_v1  ;;  %v797_v10 = vsel %vm530_vm4, %v717_v54, 0.0 }
 0x1bb   :  { %v790_v55 = vadd.f32 %v789_v40, %v788_v21  ;;  %v719_v21 = vmul.f32 %v2316_v26, %v2316_v26  ;;  %v799_v37 = vsel %vm530_vm4, %v718_v42, 0.0 }
 0x1bd   :  { %v792_v56 = vadd.f32 %v791_v47, %v790_v55  ;;  %v720_v55 = vmul.f32 %v2323_v33, %v2323_v33  ;;  %v801_v54 = vsel %vm530_vm4, %v719_v21, 0.0 }
 0x1bf   :  { %v794_v58 = vadd.f32 %v793_v14, %v792_v56  ;;  %v721_v56 = vmul.f32 %v2330_v41, %v2330_v41  ;;  %v803_v42 = vsel %vm530_vm4, %v720_v55, 0.0 }
 0x1c1   :  { %v796_v20 = vadd.f32 %v795_v7, %v794_v58  ;;  %v722_v58 = vmul.f32 %v2337_v38, %v2337_v38  ;;  %v805_v21 = vsel %vm530_vm4, %v721_v56, 0.0 }
 0x1c3   :  { %v798_v40 = vadd.f32 %v797_v10, %v796_v20  ;;  %v723_v20 = vmul.f32 %v2344_v12, %v2344_v12  ;;  %v807_v55 = vsel %vm530_vm4, %v722_v58, 0.0 }
 0x1c5   :  { %v800_v47 = vadd.f32 %v799_v37, %v798_v40  ;;  %v724_v40 = vmul.f32 %v2351_v17, %v2351_v17  ;;  %v809_v56 = vsel %vm530_vm4, %v723_v20, 0.0 }
 0x1c7   :  { %v802_v14 = vadd.f32 %v801_v54, %v800_v47  ;;  %v725_v47 = vmul.f32 %v2358_v31, %v2358_v31  ;;  %v811_v58 = vsel %vm530_vm4, %v724_v40, 0.0 }
 0x1c9   :  { %v804_v7 = vadd.f32 %v803_v42, %v802_v14  ;;  %v726_v14 = vmul.f32 %v2365_v36, %v2365_v36  ;;  %v813_v20 = vsel %vm530_vm4, %v725_v47, 0.0 }
 0x1cb   :  { %v806_v10 = vadd.f32 %v805_v21, %v804_v7  ;;  %v727_v7 = vmul.f32 %v2372_v48, %v2372_v48  ;;  %v815_v40 = vsel %vm530_vm4, %v726_v14, 0.0 }
 0x1cd   :  { %v808_v37 = vadd.f32 %v807_v55, %v806_v10  ;;  %v2923_v10 = vld [vmem:[#allocation2_spill] sm:$0xff]  ;;  %v728_v55 = vmul.f32 %v2379_v63, %v2379_v63  ;;  %v817_v47 = vsel %vm530_vm4, %v727_v7, 0.0 }
 0x1ce   :  { %v2393_v46 = vsub.f32 %v2923_v10, %v2082_v27 }
 0x1cf   :  { %v810_v54 = vadd.f32 %v809_v56, %v808_v37  ;;  %v729_v56 = vmul.f32 %v2386_v44, %v2386_v44  ;;  %v819_v14 = vsel %vm530_vm4, %v728_v55, 0.0  ;;  %v733_v55 = vmul.f32 %v2414_v0, %v2414_v0 }
 0x1d0   :  { %2924 = vst [vmem:[#allocation2_spill] sm:$0xff] %v2393_v46 }
 0x1d1   :  { %v812_v42 = vadd.f32 %v811_v58, %v810_v54  ;;  %v2407_v58 = vsub.f32 %v2070_v3, %v2082_v27  ;;  %v821_v7 = vsel %vm530_vm4, %v729_v56, 0.0 }
 0x1d3   :  { %v814_v21 = vadd.f32 %v813_v20, %v812_v42  ;;  %2926 = vst [vmem:[#allocation5_spill] sm:$0xff] %v2407_v58  ;;  %v730_v42 = vmul.f32 %v2393_v46, %v2393_v46  ;;  %v732_v3 = vmul.f32 %v2407_v58, %v2407_v58 }
 0x1d5   :  { %v816_v37 = vadd.f32 %v815_v40, %v814_v21  ;;  %v731_v21 = vmul.f32 %v2400_v52, %v2400_v52  ;;  %v823_v40 = vsel %vm530_vm4, %v730_v42, 0.0  ;;  %v827_v15 = vsel %vm530_vm4, %v732_v3, 0.0 }
 0x1d7   :  { %v818_v54 = vadd.f32 %v817_v47, %v816_v37  ;;  %v825_v47 = vsel %vm530_vm4, %v731_v21, 0.0  ;;  %v840_v21 = vld [vmem:[%s2912_s3] sm:$0x1] }
 0x1d9   :  { %v820_v20 = vadd.f32 %v819_v14, %v818_v54  ;;  %v829_v14 = vsel %vm530_vm4, %v733_v55, 0.0 }
 0x1db   :  { %v822_v10 = vadd.f32 %v821_v7, %v820_v20 }
 0x1dd   :  { %v824_v37 = vadd.f32 %v823_v40, %v822_v10  ;;  %v842_v40 = vlaneseq }
 0x1df   :  { %v826_v54 = vadd.f32 %v825_v47, %v824_v37  ;;  %v843_v0 = vshrl.u32 %v842_v40, 7 }
 0x1e1   :  { %v828_v27 = vadd.f32 %v827_v15, %v826_v54  ;;  %v844_v3 = vsub.s32 0, %v843_v0 }
 0x1e3   :  { %v830_v52 = vadd.f32 %v829_v14, %v828_v27 }
 0x1e5   :  { %v831_v56 = vrot.slane %v830_v52, 4 }
 0x1e7   :  { %v832_v20 = vadd.f32 %v831_v56, %v830_v52 }
 0x1e9   :  { %v833_v7 = vrot.slane %v832_v20, 2 }
 0x1eb   :  { %v834_v46 = vadd.f32 %v833_v7, %v832_v20  ;;  %v2929_v20 = vld [vmem:[#allocation2_spill] sm:$0xff]  ;;  %v2930_v7 = vld [vmem:[#allocation4_spill] sm:$0xff] }
 0x1ed   :  { %v835_v58 = vrot.slane %v834_v46, 1 }
 0x1ef   :  { %v836_v44 = vadd.f32 %v835_v58, %v834_v46 }
 0x1f1   :  { %v837_v42 = vmul.f32 0.0025510204, %v836_v44 }
 0x1f3   :  { %v838_v10 = vadd.f32 1e-05, %v837_v42  ;;  %v2931_v42 = vld [vmem:[#allocation5_spill] sm:$0xff] }
 0x1f5   :  { %1568 = vrsqrt.f32 %v838_v10  ;;  %v2932_v10 = vld [vmem:[#allocation6_spill] sm:$0xff] }
 0x1ff   :  { %v1569_v37 = vpop.eup %1568 }
 0x200   :  { %v841_v47 = vmul.f32 %v1569_v37, %v840_v21 }
 0x202   :  { %v845_v55 = vrot.slane %v841_v47, %v844_v3 }
 0x204   :  { %v846_v54 = vmul.f32 %v845_v55, %v2086_v53  ;;  %v847_v52 = vmul.f32 %v845_v55, %v2090_v9  ;;  %v848_v15 = vmul.f32 %v845_v55, %v2094_v60  ;;  %v849_v44 = vmul.f32 %v845_v55, %v2098_v16 }
 0x205   :  { %v850_v46 = vmul.f32 %v845_v55, %v2106_v61  ;;  %v851_v58 = vmul.f32 %v845_v55, %v2112_v62  ;;  %v852_v27 = vmul.f32 %v845_v55, %v2120_v32  ;;  %v853_v14 = vmul.f32 %v845_v55, %v2127_v19 }
 0x206   :  { %v854_v0 = vmul.f32 %v845_v55, %v2134_v23  ;;  %v855_v56 = vmul.f32 %v845_v55, %v2141_v30  ;;  %v856_v53 = vmul.f32 %v845_v55, %v2148_v35  ;;  %v857_v9 = vmul.f32 %v845_v55, %v2155_v45 }
 0x207   :  { %v858_v60 = vmul.f32 %v845_v55, %v2162_v50  ;;  %v859_v16 = vmul.f32 %v845_v55, %v2169_v2  ;;  %v860_v61 = vmul.f32 %v845_v55, %v2176_v6  ;;  %v861_v62 = vmul.f32 %v845_v55, %v2183_v18 }
 0x208   :  { %v862_v32 = vmul.f32 %v845_v55, %v2190_v25  ;;  %v863_v19 = vmul.f32 %v845_v55, %v2197_v34  ;;  %v864_v23 = vmul.f32 %v845_v55, %v2204_v43  ;;  %v865_v30 = vmul.f32 %v845_v55, %v2211_v59 }
 0x209   :  { %v866_v35 = vmul.f32 %v845_v55, %v2218_v5  ;;  %v867_v45 = vmul.f32 %v845_v55, %v2225_v24  ;;  %v868_v50 = vmul.f32 %v845_v55, %v2232_v28  ;;  %v869_v2 = vmul.f32 %v845_v55, %v2239_v51 }
 0x20a   :  { %v870_v6 = vmul.f32 %v845_v55, %v2246_v11  ;;  %v871_v18 = vmul.f32 %v845_v55, %v2253_v22  ;;  %v872_v25 = vmul.f32 %v845_v55, %v2260_v57  ;;  %v873_v34 = vmul.f32 %v845_v55, %v2267_v8 }
 0x20b   :  { %v874_v43 = vmul.f32 %v845_v55, %v2274_v13  ;;  %v875_v59 = vmul.f32 %v845_v55, %v2281_v29  ;;  %v876_v5 = vmul.f32 %v845_v55, %v2288_v39  ;;  %v877_v24 = vmul.f32 %v845_v55, %v2295_v49  ;;  %v1304_v39 = vld [vmem:[%s2913_s4] ss:$0 sm:$0xff] }
 0x20c   :  { %v878_v28 = vmul.f32 %v845_v55, %v2302_v4  ;;  %v879_v51 = vmul.f32 %v845_v55, %v2309_v1  ;;  %v880_v11 = vmul.f32 %v845_v55, %v2316_v26  ;;  %v881_v22 = vmul.f32 %v845_v55, %v2323_v33  ;;  %v2928_v33 = vld [vmem:[#allocation3_spill] sm:$0xff] }
 0x20d   :  { %v882_v57 = vmul.f32 %v845_v55, %v2330_v41  ;;  %v883_v8 = vmul.f32 %v845_v55, %v2337_v38  ;;  %v884_v13 = vmul.f32 %v845_v55, %v2344_v12  ;;  %v885_v29 = vmul.f32 %v845_v55, %v2351_v17 }
 0x20e   :  { %v886_v49 = vmul.f32 %v845_v55, %v2358_v31  ;;  %v887_v4 = vmul.f32 %v845_v55, %v2365_v36  ;;  %v888_v1 = vmul.f32 %v845_v55, %v2372_v48  ;;  %v889_v26 = vmul.f32 %v845_v55, %v2379_v63 }
 0x20f   :  { %v890_v41 = vmul.f32 %v845_v55, %v2928_v33  ;;  %v891_v38 = vmul.f32 %v845_v55, %v2929_v20  ;;  %v892_v12 = vmul.f32 %v845_v55, %v2930_v7  ;;  %v893_v17 = vmul.f32 %v845_v55, %v2931_v42 }
 0x210   :  { %v894_v40 = vmul.f32 %v845_v55, %v2932_v10  ;;  %v2482_v21 = vadd.f32 %v1304_v39, %v846_v54  ;;  %v2484_v3 = vadd.f32 %v1304_v39, %v847_v52  ;;  %v2486_v31 = vadd.f32 %v1304_v39, %v848_v15 }
 0x211   :  { %v2488_v36 = vadd.f32 %v1304_v39, %v849_v44  ;;  %v2490_v48 = vadd.f32 %v1304_v39, %v850_v46  ;;  %v2492_v63 = vadd.f32 %v1304_v39, %v851_v58  ;;  %v2494_v37 = vadd.f32 %v1304_v39, %v852_v27 }
 0x212   :  { %v2496_v47 = vadd.f32 %v1304_v39, %v853_v14  ;;  %v2498_v33 = vadd.f32 %v1304_v39, %v854_v0  ;;  %v2500_v20 = vadd.f32 %v1304_v39, %v855_v56  ;;  %v2502_v55 = vadd.f32 %v1304_v39, %v856_v53 }
 0x213   :  { %v2504_v54 = vadd.f32 %v1304_v39, %v857_v9  ;;  %v2506_v52 = vadd.f32 %v1304_v39, %v858_v60  ;;  %v2508_v15 = vadd.f32 %v1304_v39, %v859_v16  ;;  %v2510_v44 = vadd.f32 %v1304_v39, %v860_v61 }
 0x214   :  { %v2512_v46 = vadd.f32 %v1304_v39, %v861_v62  ;;  %v2514_v58 = vadd.f32 %v1304_v39, %v862_v32  ;;  %v2516_v27 = vadd.f32 %v1304_v39, %v863_v19  ;;  %v2518_v14 = vadd.f32 %v1304_v39, %v864_v23 }
 0x215   :  { %v2520_v0 = vadd.f32 %v1304_v39, %v865_v30  ;;  %v2522_v56 = vadd.f32 %v1304_v39, %v866_v35  ;;  %v2524_v53 = vadd.f32 %v1304_v39, %v867_v45  ;;  %v2526_v9 = vadd.f32 %v1304_v39, %v868_v50 }
 0x216   :  { %v2528_v60 = vadd.f32 %v1304_v39, %v869_v2  ;;  %v2530_v16 = vadd.f32 %v1304_v39, %v870_v6  ;;  %v2532_v61 = vadd.f32 %v1304_v39, %v871_v18  ;;  %v2534_v62 = vadd.f32 %v1304_v39, %v872_v25 }
 0x217   :  { %v2536_v32 = vadd.f32 %v1304_v39, %v873_v34  ;;  %v2538_v19 = vadd.f32 %v1304_v39, %v874_v43  ;;  %v2540_v23 = vadd.f32 %v1304_v39, %v875_v59  ;;  %v2542_v30 = vadd.f32 %v1304_v39, %v876_v5 }
 0x218   :  { %v2544_v35 = vadd.f32 %v1304_v39, %v877_v24  ;;  %v2546_v45 = vadd.f32 %v1304_v39, %v878_v28  ;;  %v2548_v50 = vadd.f32 %v1304_v39, %v879_v51  ;;  %v2550_v2 = vadd.f32 %v1304_v39, %v880_v11 }
 0x219   :  { %v2552_v6 = vadd.f32 %v1304_v39, %v881_v22  ;;  %v2554_v18 = vadd.f32 %v1304_v39, %v882_v57  ;;  %v2556_v25 = vadd.f32 %v1304_v39, %v883_v8  ;;  %v2558_v34 = vadd.f32 %v1304_v39, %v884_v13 }
 0x21a   :  { %v2560_v43 = vadd.f32 %v1304_v39, %v885_v29  ;;  %v2562_v59 = vadd.f32 %v1304_v39, %v886_v49  ;;  %v2564_v5 = vadd.f32 %v1304_v39, %v887_v4  ;;  %v2566_v24 = vadd.f32 %v1304_v39, %v888_v1 }
 0x21b   :  { %v2568_v28 = vadd.f32 %v1304_v39, %v889_v26  ;;  %v2570_v51 = vadd.f32 %v1304_v39, %v890_v41  ;;  %v2572_v11 = vadd.f32 %v1304_v39, %v891_v38  ;;  %v2574_v22 = vadd.f32 %v1304_v39, %v892_v12 }
 0x21c   :  { %v2576_v57 = vadd.f32 %v1304_v39, %v893_v17  ;;  %v2578_v8 = vadd.f32 %v1304_v39, %v894_v40  ;;  %v951_v13 = vmax.f32 %v2482_v21, 0.0  ;;  %v952_v29 = vmax.f32 %v2484_v3, 0.0 }
 0x21d   :  { %v953_v49 = vmax.f32 %v2486_v31, 0.0  ;;  %v954_v4 = vmax.f32 %v2488_v36, 0.0  ;;  %v955_v1 = vmax.f32 %v2490_v48, 0.0  ;;  %v956_v26 = vmax.f32 %v2492_v63, 0.0 }
 0x21e   :  { %v957_v41 = vmax.f32 %v2494_v37, 0.0  ;;  %v958_v38 = vmax.f32 %v2496_v47, 0.0  ;;  %v959_v7 = vmax.f32 %v2498_v33, 0.0  ;;  %v960_v39 = vmax.f32 %v2500_v20, 0.0 }
 0x21f   :  { %v961_v12 = vmax.f32 %v2502_v55, 0.0  ;;  %v962_v42 = vmax.f32 %v2504_v54, 0.0  ;;  %v963_v17 = vmax.f32 %v2506_v52, 0.0  ;;  %v964_v10 = vmax.f32 %v2508_v15, 0.0 }
 0x220   :  { %v965_v40 = vmax.f32 %v2510_v44, 0.0  ;;  %v966_v21 = vmax.f32 %v2512_v46, 0.0  ;;  %v967_v3 = vmax.f32 %v2514_v58, 0.0  ;;  %v968_v31 = vmax.f32 %v2516_v27, 0.0 }
 0x221   :  { %v969_v36 = vmax.f32 %v2518_v14, 0.0  ;;  %v970_v48 = vmax.f32 %v2520_v0, 0.0  ;;  %v971_v63 = vmax.f32 %v2522_v56, 0.0  ;;  %v994_v14 = vmax.f32 %v2568_v28, 0.0 }
 0x222   :  { %v999_v15 = vmax.f32 %v2578_v8, 0.0  ;;  %v1354_v55 = vpack.c.bf16 %v951_v13, %v951_v13  ;;  %v1355_v44 = vpack.c.bf16 %v952_v29, %v952_v29  ;;  %v1356_v20 = vpack.c.bf16 %v953_v49, %v953_v49 }
 0x223   :  { %v1357_v46 = vpack.c.bf16 %v954_v4, %v954_v4  ;;  %v1358_v33 = vpack.c.bf16 %v955_v1, %v955_v1  ;;  %v1359_v58 = vpack.c.bf16 %v956_v26, %v956_v26  ;;  %v1360_v47 = vpack.c.bf16 %v957_v41, %v957_v41 }
 0x224   :  { %v1361_v27 = vpack.c.bf16 %v958_v38, %v958_v38  ;;  %v1362_v37 = vpack.c.bf16 %v959_v7, %v959_v7  ;;  %1198 = vst.msk [vmem:[%s2914_s5] sm:$0xf] %vm1197_vm5, %v1354_v55  ;;  %v1363_v56 = vpack.c.bf16 %v960_v39, %v960_v39  ;;  %v1364_v54 = vpack.c.bf16 %v961_v12, %v961_v12 }
 0x225   :  { %v1365_v0 = vpack.c.bf16 %v962_v42, %v962_v42  ;;  %v1366_v52 = vpack.c.bf16 %v963_v17, %v963_v17  ;;  %1199 = vst.msk [vmem:[%s2914_s5 + $0x4] sm:$0xf] %vm1197_vm5, %v1355_v44  ;;  %1200 = vst.msk [vmem:[%s2914_s5 + $0x8] sm:$0xf] %vm1197_vm5, %v1356_v20  ;;  %v1367_v13 = vpack.c.bf16 %v964_v10, %v964_v10  ;;  %v2933_v7 = vmax.f32 %v2524_v53, 0.0 }
 0x226   :  { %1201 = vst.msk [vmem:[%s2914_s5 + $0xc] sm:$0xf] %vm1197_vm5, %v1357_v46  ;;  %1202 = vst.msk [vmem:[%s2914_s5 + $0x10] sm:$0xf] %vm1197_vm5, %v1358_v33  ;;  %v1368_v29 = vpack.c.bf16 %v965_v40, %v965_v40  ;;  %v1369_v49 = vpack.c.bf16 %v966_v21, %v966_v21  ;;  %v1370_v4 = vpack.c.bf16 %v967_v3, %v967_v3  ;;  %v2934_v12 = vmax.f32 %v2526_v9, 0.0 }
 0x227   :  { %1203 = vst.msk [vmem:[%s2914_s5 + $0x14] sm:$0xf] %vm1197_vm5, %v1359_v58  ;;  %1204 = vst.msk [vmem:[%s2914_s5 + $0x18] sm:$0xf] %vm1197_vm5, %v1360_v47  ;;  %v1371_v1 = vpack.c.bf16 %v968_v31, %v968_v31  ;;  %v1372_v26 = vpack.c.bf16 %v969_v36, %v969_v36  ;;  %v1373_v41 = vpack.c.bf16 %v970_v48, %v970_v48  ;;  %v2935_v17 = vmax.f32 %v2528_v60, 0.0 }
 0x228   :  { %1205 = vst.msk [vmem:[%s2914_s5 + $0x1c] sm:$0xf] %vm1197_vm5, %v1361_v27  ;;  %1206 = vst.msk [vmem:[%s2914_s5 + $0x20] sm:$0xf] %vm1197_vm5, %v1362_v37  ;;  %v1374_v38 = vpack.c.bf16 %v971_v63, %v971_v63  ;;  %v1375_v39 = vpack.c.bf16 %v2933_v7, %v2933_v7  ;;  %v1376_v42 = vpack.c.bf16 %v2934_v12, %v2934_v12  ;;  %v2936_v40 = vmax.f32 %v2530_v16, 0.0 }
 0x229   :  { %1207 = vst.msk [vmem:[%s2914_s5 + $0x24] sm:$0xf] %vm1197_vm5, %v1363_v56  ;;  %1208 = vst.msk [vmem:[%s2914_s5 + $0x28] sm:$0xf] %vm1197_vm5, %v1364_v54  ;;  %v1377_v10 = vpack.c.bf16 %v2935_v17, %v2935_v17  ;;  %v2937_v53 = vmax.f32 %v2532_v61, 0.0  ;;  %v2938_v60 = vmax.f32 %v2534_v62, 0.0 }
 0x22a   :  { %1209 = vst.msk [vmem:[%s2914_s5 + $0x2c] sm:$0xf] %vm1197_vm5, %v1365_v0  ;;  %1210 = vst.msk [vmem:[%s2914_s5 + $0x30] sm:$0xf] %vm1197_vm5, %v1366_v52  ;;  %v1378_v21 = vpack.c.bf16 %v2936_v40, %v2936_v40  ;;  %v2939_v3 = vmax.f32 %v2536_v32, 0.0  ;;  %v2940_v36 = vmax.f32 %v2538_v19, 0.0  ;;  %v1397_v0 = vpack.c.bf16 %v994_v14, %v994_v14 }
 0x22b   :  { %1211 = vst.msk [vmem:[%s2914_s5 + $0x34] sm:$0xf] %vm1197_vm5, %v1367_v13  ;;  %1212 = vst.msk [vmem:[%s2914_s5 + $0x38] sm:$0xf] %vm1197_vm5, %v1368_v29  ;;  %v1379_v9 = vpack.c.bf16 %v2937_v53, %v2937_v53  ;;  %v1380_v16 = vpack.c.bf16 %v2938_v60, %v2938_v60  ;;  %v2941_v61 = vmax.f32 %v2540_v23, 0.0  ;;  %v2942_v32 = vmax.f32 %v2542_v30, 0.0 }
 0x22c   :  { %1213 = vst.msk [vmem:[%s2914_s5 + $0x3c] sm:$0xf] %vm1197_vm5, %v1369_v49  ;;  %1214 = vst.msk [vmem:[%s2914_s5 + $0x40] sm:$0xf] %vm1197_vm5, %v1370_v4  ;;  %v1381_v31 = vpack.c.bf16 %v2939_v3, %v2939_v3  ;;  %v1382_v48 = vpack.c.bf16 %v2940_v36, %v2940_v36  ;;  %v2943_v63 = vmax.f32 %v2544_v35, 0.0  ;;  %v2944_v47 = vmax.f32 %v2546_v45, 0.0 }
 0x22d   :  { %1215 = vst.msk [vmem:[%s2914_s5 + $0x44] sm:$0xf] %vm1197_vm5, %v1371_v1  ;;  %1216 = vst.msk [vmem:[%s2914_s5 + $0x48] sm:$0xf] %vm1197_vm5, %v1372_v26  ;;  %v1383_v62 = vpack.c.bf16 %v2941_v61, %v2941_v61  ;;  %v1384_v19 = vpack.c.bf16 %v2942_v32, %v2942_v32  ;;  %v2945_v23 = vmax.f32 %v2548_v50, 0.0  ;;  %v2946_v35 = vmax.f32 %v2550_v2, 0.0 }
 0x22e   :  { %1217 = vst.msk [vmem:[%s2914_s5 + $0x4c] sm:$0xf] %vm1197_vm5, %v1373_v41  ;;  %1218 = vst.msk [vmem:[%s2914_s5 + $0x50] sm:$0xf] %vm1197_vm5, %v1374_v38  ;;  %v1385_v37 = vpack.c.bf16 %v2943_v63, %v2943_v63  ;;  %v1386_v33 = vpack.c.bf16 %v2944_v47, %v2944_v47  ;;  %v2947_v20 = vmax.f32 %v2552_v6, 0.0  ;;  %v2948_v54 = vmax.f32 %v2554_v18, 0.0 }
 0x22f   :  { %1219 = vst.msk [vmem:[%s2914_s5 + $0x54] sm:$0xf] %vm1197_vm5, %v1375_v39  ;;  %1220 = vst.msk [vmem:[%s2914_s5 + $0x58] sm:$0xf] %vm1197_vm5, %v1376_v42  ;;  %v1387_v30 = vpack.c.bf16 %v2945_v23, %v2945_v23  ;;  %v1388_v45 = vpack.c.bf16 %v2946_v35, %v2946_v35  ;;  %v2949_v50 = vmax.f32 %v2556_v25, 0.0  ;;  %v2950_v6 = vmax.f32 %v2558_v34, 0.0 }
 0x230   :  { %1221 = vst.msk [vmem:[%s2914_s5 + $0x5c] sm:$0xf] %vm1197_vm5, %v1377_v10  ;;  %1222 = vst.msk [vmem:[%s2914_s5 + $0x60] sm:$0xf] %vm1197_vm5, %v1378_v21  ;;  %v1389_v55 = vpack.c.bf16 %v2947_v20, %v2947_v20  ;;  %v1390_v52 = vpack.c.bf16 %v2948_v54, %v2948_v54  ;;  %v2951_v44 = vmax.f32 %v2560_v43, 0.0  ;;  %v2952_v58 = vmax.f32 %v2562_v59, 0.0 }
 0x231   :  { %1223 = vst.msk [vmem:[%s2914_s5 + $0x64] sm:$0xf] %vm1197_vm5, %v1379_v9  ;;  %1224 = vst.msk [vmem:[%s2914_s5 + $0x68] sm:$0xf] %vm1197_vm5, %v1380_v16  ;;  %v1391_v2 = vpack.c.bf16 %v2949_v50, %v2949_v50  ;;  %v1392_v18 = vpack.c.bf16 %v2950_v6, %v2950_v6  ;;  %v2953_v25 = vmax.f32 %v2564_v5, 0.0  ;;  %v2954_v43 = vmax.f32 %v2566_v24, 0.0 }
 0x232   :  { %1225 = vst.msk [vmem:[%s2914_s5 + $0x6c] sm:$0xf] %vm1197_vm5, %v1381_v31  ;;  %1226 = vst.msk [vmem:[%s2914_s5 + $0x70] sm:$0xf] %vm1197_vm5, %v1382_v48  ;;  %v1393_v46 = vpack.c.bf16 %v2951_v44, %v2951_v44  ;;  %v1394_v27 = vpack.c.bf16 %v2952_v58, %v2952_v58  ;;  %v2955_v56 = vmax.f32 %v2570_v51, 0.0  ;;  %v2956_v5 = vmax.f32 %v2572_v11, 0.0 }
 0x233   :  { %1227 = vst.msk [vmem:[%s2914_s5 + $0x74] sm:$0xf] %vm1197_vm5, %v1383_v62  ;;  %1228 = vst.msk [vmem:[%s2914_s5 + $0x78] sm:$0xf] %vm1197_vm5, %v1384_v19  ;;  %v1395_v34 = vpack.c.bf16 %v2953_v25, %v2953_v25  ;;  %v1396_v59 = vpack.c.bf16 %v2954_v43, %v2954_v43  ;;  %v2957_v28 = vmax.f32 %v2574_v22, 0.0  ;;  %v2958_v14 = vmax.f32 %v2576_v57, 0.0 }
 0x234   :  { %1229 = vst.msk [vmem:[%s2914_s5 + $0x7c] sm:$0xf] %vm1197_vm5, %v1385_v37  ;;  %1230 = vst.msk [vmem:[%s2914_s5 + $0x80] sm:$0xf] %vm1197_vm5, %v1386_v33  ;;  %v1398_v13 = vpack.c.bf16 %v2955_v56, %v2955_v56  ;;  %v1399_v24 = vpack.c.bf16 %v2956_v5, %v2956_v5  ;;  %v1402_v49 = vpack.c.bf16 %v999_v15, %v999_v15 }
 0x235   :  { %1231 = vst.msk [vmem:[%s2914_s5 + $0x84] sm:$0xf] %vm1197_vm5, %v1387_v30  ;;  %1232 = vst.msk [vmem:[%s2914_s5 + $0x88] sm:$0xf] %vm1197_vm5, %v1388_v45  ;;  %v1400_v51 = vpack.c.bf16 %v2957_v28, %v2957_v28  ;;  %v1401_v29 = vpack.c.bf16 %v2958_v14, %v2958_v14 }
 0x236   :  { %1233 = vst.msk [vmem:[%s2914_s5 + $0x8c] sm:$0xf] %vm1197_vm5, %v1389_v55  ;;  %1234 = vst.msk [vmem:[%s2914_s5 + $0x90] sm:$0xf] %vm1197_vm5, %v1390_v52 }
 0x237   :  { %1235 = vst.msk [vmem:[%s2914_s5 + $0x94] sm:$0xf] %vm1197_vm5, %v1391_v2  ;;  %1236 = vst.msk [vmem:[%s2914_s5 + $0x98] sm:$0xf] %vm1197_vm5, %v1392_v18 }
 0x238   :  { %1237 = vst.msk [vmem:[%s2914_s5 + $0x9c] sm:$0xf] %vm1197_vm5, %v1393_v46  ;;  %1238 = vst.msk [vmem:[%s2914_s5 + $0xa0] sm:$0xf] %vm1197_vm5, %v1394_v27 }
 0x239   :  { %1239 = vst.msk [vmem:[%s2914_s5 + $0xa4] sm:$0xf] %vm1197_vm5, %v1395_v34  ;;  %1240 = vst.msk [vmem:[%s2914_s5 + $0xa8] sm:$0xf] %vm1197_vm5, %v1396_v59 }
 0x23a   :  { %1241 = vst.msk [vmem:[%s2914_s5 + $0xac] sm:$0xf] %vm1197_vm5, %v1397_v0  ;;  %1242 = vst.msk [vmem:[%s2914_s5 + $0xb0] sm:$0xf] %vm1197_vm5, %v1398_v13 }
 0x23b   :  { %1243 = vst.msk [vmem:[%s2914_s5 + $0xb4] sm:$0xf] %vm1197_vm5, %v1399_v24  ;;  %1244 = vst.msk [vmem:[%s2914_s5 + $0xb8] sm:$0xf] %vm1197_vm5, %v1400_v51 }
 0x23c   :  { %1245 = vst.msk [vmem:[%s2914_s5 + $0xbc] sm:$0xf] %vm1197_vm5, %v1401_v29  ;;  %1246 = vst.msk [vmem:[%s2914_s5 + $0xc0] sm:$0xf] %vm1197_vm5, %v1402_v49 }

// kernel: dqn_forward.5
= control target key start
LH: loop header
LB: loop body
LE: loop exit
PB: predicated region body
PF: predicated region fallthrough
CT: control target
= control target key end

     0   :  { %v1289_v0 = vmov 0   ;;  %vm298_vm0 = vcmask 130048   ;;  %vm530_vm1 = vcmask 261120   ;;  %vm1027_vm2 = vcmask 257024   ;;  %s2246_s1 = inlined_call_operand.vmem [shape: bf16[144,32], index: 1, kind: input, shape index: {}]   ;;  %s2247_s0 = inlined_call_operand.vmem [shape: bf16[288,144], index: 0, kind: input, shape index: {}]   ;;  %s2248_s2 = inlined_call_operand.vmem [shape: f32[1,32], index: 2, kind: input, shape index: {}]   ;;  %s2249_s3 = inlined_call_operand.vmem [shape: f32[1,32], index: 3, kind: input, shape index: {}]   ;;  %s2250_s4 = inlined_call_operand.vmem [shape: f32[1,32], index: 4, kind: input, shape index: {}]   ;;  %s2251_s5 = inlined_call_operand.vmem [shape: bf16[288,32], index: 5, kind: output, shape index: {}]  }
   0x1   :  { %353 = vmatprep.subr.bf16.mxu0 %v1289_v0  ;;  %v1224_v1 = vld [vmem:[%s2246_s1] sm:$0xff]   ;;  %1205 = vmatprep.subr.bf16.mxu1 %v1289_v0  ;;  %v1225_v2 = vld [vmem:[%s2246_s1 + $0x8] sm:$0xff]   ;;  %v1226_v3 = vld [vmem:[%s2246_s1 + $0x10] sm:$0xff]  }
   0x2   :  { %354 = vmatpush1.bf16.msra.mxu0 %v1224_v1  ;;  %1214 = vmatpush1.bf16.msra.mxu1 %v1224_v1  ;;  %v1227_v4 = vld [vmem:[%s2246_s1 + $0x18] sm:$0xff]   ;;  %v1235_v5 = vld [vmem:[%s2247_s0 + $0x4] ss:$8 sps:$4 sm:$0xff]   ;;  %v1230_v9 = vld [vmem:[%s2246_s1 + $0x30] sm:$0xff]  }
   0x3   :  { %355 = vmatprep.subr.bf16.mxu0 %v1289_v0  ;;  %1206 = vmatprep.subr.bf16.mxu1 %v1289_v0  ;;  %v1228_v6 = vld [vmem:[%s2246_s1 + $0x20] sm:$0xff]   ;;  %v1250_v7 = vld [vmem:[%s2247_s0 + $0x94] ss:$8 sps:$4 sm:$0xff]   ;;  %v1229_v8 = vld [vmem:[%s2246_s1 + $0x28] sm:$0xff]  }
   0x4   :  { %1114 = vmatprep.mubr.msk.bf16.mxu0 %vm298_vm0, %v1235_v5  ;;  %1123 = vmatprep.mubr.msk.bf16.mxu1 %vm298_vm0, %v1250_v7  ;;  %v1231_v10 = vld [vmem:[%s2246_s1 + $0x38] sm:$0xff]   ;;  %v1232_v11 = vld [vmem:[%s2246_s1 + $0x40] sm:$0xff]  }
   0x5   :  { %v1233_v12 = vld [vmem:[%s2247_s0] ss:$8 sps:$4 sm:$0xff]   ;;  %v1248_v13 = vld [vmem:[%s2247_s0 + $0x90] ss:$8 sps:$4 sm:$0xff]   ;;  %v1236_v14 = vld [vmem:[%s2247_s0 + $0x14] ss:$8 sps:$4 sm:$0xff]  }
   0x6   :  { %356 = vmatpush1.bf16.msra.mxu0 %v1225_v2  ;;  %1215 = vmatpush1.bf16.msra.mxu1 %v1225_v2  ;;  %v1254_v15 = vld [vmem:[%s2247_s0 + $0xa4] ss:$8 sps:$4 sm:$0xff]   ;;  %v1238_v16 = vld [vmem:[%s2247_s0 + $0x10] ss:$8 sps:$4 sm:$0xff]   ;;  %v1256_v17 = vld [vmem:[%s2247_s0 + $0xa0] ss:$8 sps:$4 sm:$0xff]  }
   0x7   :  { %357 = vmatprep.subr.bf16.mxu0 %v1289_v0  ;;  %1207 = vmatprep.subr.bf16.mxu1 %v1289_v0  ;;  %v1239_v18 = vld [vmem:[%s2247_s0 + $0x24] ss:$8 sps:$4 sm:$0xff]   ;;  %v1260_v19 = vld [vmem:[%s2247_s0 + $0xb4] ss:$8 sps:$4 sm:$0xff]   ;;  %v1241_v20 = vld [vmem:[%s2247_s0 + $0x20] ss:$8 sps:$4 sm:$0xff]  }
   0x8   :  { %v1262_v21 = vld [vmem:[%s2247_s0 + $0xb0] ss:$8 sps:$4 sm:$0xff]   ;;  %v1242_v22 = vld [vmem:[%s2247_s0 + $0x34] ss:$8 sps:$4 sm:$0xff]   ;;  %v1266_v23 = vld [vmem:[%s2247_s0 + $0xc4] ss:$8 sps:$4 sm:$0xff]  }
   0x9   :  { %v1244_v24 = vld [vmem:[%s2247_s0 + $0x30] ss:$8 sps:$4 sm:$0xff]   ;;  %v1268_v25 = vld [vmem:[%s2247_s0 + $0xc0] ss:$8 sps:$4 sm:$0xff]   ;;  %v1245_v26 = vld [vmem:[%s2247_s0 + $0x44] ss:$8 sps:$4 sm:$0xff]  }
   0xa   :  { %358 = vmatpush1.bf16.msra.mxu0 %v1226_v3  ;;  %1216 = vmatpush1.bf16.msra.mxu1 %v1226_v3  ;;  %v1272_v27 = vld [vmem:[%s2247_s0 + $0xd4] ss:$8 sps:$4 sm:$0xff]   ;;  %v1247_v28 = vld [vmem:[%s2247_s0 + $0x40] ss:$8 sps:$4 sm:$0xff]   ;;  %v1274_v29 = vld [vmem:[%s2247_s0 + $0xd0] ss:$8 sps:$4 sm:$0xff]  }
   0xb   :  { %359 = vmatprep.subr.bf16.mxu0 %v1289_v0  ;;  %1208 = vmatprep.subr.bf16.mxu1 %v1289_v0  ;;  %v1251_v30 = vld [vmem:[%s2247_s0 + $0x54] ss:$8 sps:$4 sm:$0xff]   ;;  %v1275_v31 = vld [vmem:[%s2247_s0 + $0xe4] ss:$8 sps:$4 sm:$0xff]   ;;  %v1253_v32 = vld [vmem:[%s2247_s0 + $0x50] ss:$8 sps:$4 sm:$0xff]  }
   0xc   :  { %v1277_v33 = vld [vmem:[%s2247_s0 + $0xe0] ss:$8 sps:$4 sm:$0xff]   ;;  %v1257_v34 = vld [vmem:[%s2247_s0 + $0x64] ss:$8 sps:$4 sm:$0xff]   ;;  %v1278_v35 = vld [vmem:[%s2247_s0 + $0xf4] ss:$8 sps:$4 sm:$0xff]  }
   0xd   :  { %v1259_v36 = vld [vmem:[%s2247_s0 + $0x60] ss:$8 sps:$4 sm:$0xff]   ;;  %v1280_v37 = vld [vmem:[%s2247_s0 + $0xf0] ss:$8 sps:$4 sm:$0xff]   ;;  %v1263_v38 = vld [vmem:[%s2247_s0 + $0x74] ss:$8 sps:$4 sm:$0xff]  }
   0xe   :  { %360 = vmatpush1.bf16.msra.mxu0 %v1227_v4  ;;  %1217 = vmatpush1.bf16.msra.mxu1 %v1227_v4  ;;  %v1281_v39 = vld [vmem:[%s2247_s0 + $0x104] ss:$8 sps:$4 sm:$0xff]   ;;  %v1265_v40 = vld [vmem:[%s2247_s0 + $0x70] ss:$8 sps:$4 sm:$0xff]   ;;  %v1283_v41 = vld [vmem:[%s2247_s0 + $0x100] ss:$8 sps:$4 sm:$0xff]  }
   0xf   :  { %361 = vmatprep.subr.bf16.mxu0 %v1289_v0  ;;  %1209 = vmatprep.subr.bf16.mxu1 %v1289_v0  ;;  %v1269_v42 = vld [vmem:[%s2247_s0 + $0x84] ss:$8 sps:$4 sm:$0xff]   ;;  %v1284_v43 = vld [vmem:[%s2247_s0 + $0x114] ss:$8 sps:$4 sm:$0xff]   ;;  %v1271_v44 = vld [vmem:[%s2247_s0 + $0x80] ss:$8 sps:$4 sm:$0xff]  }
  0x10   :  { %v1286_v45 = vld [vmem:[%s2247_s0 + $0x110] ss:$8 sps:$4 sm:$0xff]   ;;  %v1484_v62 = vld [vmem:[%s2248_s2] ss:$0 sm:$0xff] }
  0x12   :  { %362 = vmatpush1.bf16.msra.mxu0 %v1228_v6  ;;  %1218 = vmatpush1.bf16.msra.mxu1 %v1228_v6 }
  0x13   :  { %363 = vmatprep.subr.bf16.mxu0 %v1289_v0  ;;  %1210 = vmatprep.subr.bf16.mxu1 %v1289_v0 }
  0x16   :  { %364 = vmatpush1.bf16.msra.mxu0 %v1229_v8  ;;  %1219 = vmatpush1.bf16.msra.mxu1 %v1229_v8 }
  0x17   :  { %365 = vmatprep.subr.bf16.mxu0 %v1289_v0  ;;  %1211 = vmatprep.subr.bf16.mxu1 %v1289_v0 }
  0x1a   :  { %366 = vmatpush1.bf16.msra.mxu0 %v1230_v9  ;;  %1220 = vmatpush1.bf16.msra.mxu1 %v1230_v9 }
  0x1b   :  { %367 = vmatprep.subr.bf16.mxu0 %v1289_v0  ;;  %1212 = vmatprep.subr.bf16.mxu1 %v1289_v0 }
  0x1e   :  { %368 = vmatpush1.bf16.msra.mxu0 %v1231_v10  ;;  %1221 = vmatpush1.bf16.msra.mxu1 %v1231_v10 }
  0x1f   :  { %369 = vmatprep.subr.bf16.mxu0 %v1289_v0  ;;  %1213 = vmatprep.subr.bf16.mxu1 %v1289_v0 }
  0x22   :  { %370 = vmatpush1.bf16.msra.mxu0 %v1232_v11  ;;  %1222 = vmatpush1.bf16.msra.mxu1 %v1232_v11 }
  0x25   :  { %386 = vmatmul.mubr.bf16.vlgmr.msra.gmra.mrb[0].mxu0 %v1233_v12  ;;  %458 = vmatmul.mubr.bf16.vlgmr.msra.gmra.mrb[0].mxu1 %v1248_v13 }
  0x26   :  { %1115 = vmatprep.mubr.msk.bf16.mxu0 %vm298_vm0, %v1236_v14  ;;  %1124 = vmatprep.mubr.msk.bf16.mxu1 %vm298_vm0, %v1254_v15 }
  0x2d   :  { %394 = vmatmul.mubr.bf16.gmra.mrb[4].mxu0 %v1238_v16  ;;  %466 = vmatmul.mubr.bf16.gmra.mrb[4].mxu1 %v1256_v17 }
  0x2e   :  { %1116 = vmatprep.mubr.msk.bf16.mxu0 %vm298_vm0, %v1239_v18  ;;  %1125 = vmatprep.mubr.msk.bf16.mxu1 %vm298_vm0, %v1260_v19 }
  0x35   :  { %402 = vmatmul.mubr.bf16.gmra.mrb[8].mxu0 %v1241_v20  ;;  %474 = vmatmul.mubr.bf16.gmra.mrb[8].mxu1 %v1262_v21 }
  0x36   :  { %1117 = vmatprep.mubr.msk.bf16.mxu0 %vm298_vm0, %v1242_v22  ;;  %1126 = vmatprep.mubr.msk.bf16.mxu1 %vm298_vm0, %v1266_v23 }
  0x3d   :  { %410 = vmatmul.mubr.bf16.gmra.mrb[12].mxu0 %v1244_v24  ;;  %482 = vmatmul.mubr.bf16.gmra.mrb[12].mxu1 %v1268_v25 }
  0x3e   :  { %1118 = vmatprep.mubr.msk.bf16.mxu0 %vm298_vm0, %v1245_v26  ;;  %1127 = vmatprep.mubr.msk.bf16.mxu1 %vm298_vm0, %v1272_v27 }
  0x45   :  { %418 = vmatmul.mubr.bf16.gmra.mrb[16].mxu0 %v1247_v28  ;;  %490 = vmatmul.mubr.bf16.gmra.mrb[16].mxu1 %v1274_v29 }
  0x46   :  { %1119 = vmatprep.mubr.msk.bf16.mxu0 %vm298_vm0, %v1251_v30  ;;  %1128 = vmatprep.mubr.msk.bf16.mxu1 %vm298_vm0, %v1275_v31 }
  0x4d   :  { %426 = vmatmul.mubr.bf16.gmra.mrb[20].mxu0 %v1253_v32  ;;  %498 = vmatmul.mubr.bf16.gmra.mrb[20].mxu1 %v1277_v33 }
  0x4e   :  { %1120 = vmatprep.mubr.msk.bf16.mxu0 %vm298_vm0, %v1257_v34  ;;  %1129 = vmatprep.mubr.msk.bf16.mxu1 %vm298_vm0, %v1278_v35 }
  0x55   :  { %434 = vmatmul.mubr.bf16.gmra.mrb[24].mxu0 %v1259_v36  ;;  %506 = vmatmul.mubr.bf16.gmra.mrb[24].mxu1 %v1280_v37 }
  0x56   :  { %1121 = vmatprep.mubr.msk.bf16.mxu0 %vm298_vm0, %v1263_v38  ;;  %1130 = vmatprep.mubr.msk.bf16.mxu1 %vm298_vm0, %v1281_v39 }
  0x5d   :  { %442 = vmatmul.mubr.bf16.gmra.mrb[28].mxu0 %v1265_v40  ;;  %514 = vmatmul.mubr.bf16.gmra.mrb[28].mxu1 %v1283_v41 }
  0x5e   :  { %1122 = vmatprep.mubr.msk.bf16.mxu0 %vm298_vm0, %v1269_v42  ;;  %1131 = vmatprep.mubr.msk.bf16.mxu1 %vm298_vm0, %v1284_v43 }
  0x65   :  { %450 = vmatmul.mubr.bf16.gmra.mrb[32].mxu0 %v1271_v44  ;;  %522 = vmatmul.mubr.bf16.gmra.mrb[32].mxu1 %v1286_v45 }
  0xf8   :  { %v387_v46 = vpop.f32.mrb[0].mxu0  ;;  %v1473_v47 = vpop.f32.mrb[0].mxu1 }
  0xf9   :  { %v389_v48 = vpop.f32.mrb[1].mxu0  ;;  %v461_v49 = vpop.f32.mrb[1].mxu1  ;;  %v1494_v6 = vadd.f32 %v1484_v62, %v387_v46 }
  0xfa   :  { %v390_v50 = vpop.f32.mrb[2].mxu0  ;;  %v1475_v51 = vpop.f32.mrb[2].mxu1 }
  0xfb   :  { %v392_v52 = vpop.f32.mrb[3].mxu0  ;;  %v464_v53 = vpop.f32.mrb[3].mxu1  ;;  %v1489_v1 = vadd.f32 %v1484_v62, %v390_v50  ;;  %v531_v11 = vsel %vm530_vm1, %v1494_v6, 0.0 }
  0xfd   :  { %v532_v10 = vsel %vm530_vm1, %v1489_v1, 0.0 }
  0xfe   :  { %v533_v14 = vadd.f32 %v532_v10, %v531_v11 }
 0x100   :  { %v395_v54 = vpop.f32.mrb[4].mxu0  ;;  %v1477_v55 = vpop.f32.mrb[4].mxu1 }
 0x101   :  { %v397_v56 = vpop.f32.mrb[5].mxu0  ;;  %v469_v57 = vpop.f32.mrb[5].mxu1  ;;  %v1497_v7 = vadd.f32 %v1484_v62, %v395_v54 }
 0x102   :  { %v398_v58 = vpop.f32.mrb[6].mxu0  ;;  %v1479_v59 = vpop.f32.mrb[6].mxu1 }
 0x103   :  { %v400_v60 = vpop.f32.mrb[7].mxu0  ;;  %v472_v61 = vpop.f32.mrb[7].mxu1  ;;  %v534_v12 = vsel %vm530_vm1, %v1497_v7, 0.0  ;;  %v1506_v13 = vadd.f32 %v1484_v62, %v398_v58 }
 0x104   :  { %v535_v20 = vadd.f32 %v534_v12, %v533_v14 }
 0x105   :  { %v536_v23 = vsel %vm530_vm1, %v1506_v13, 0.0 }
 0x106   :  { %v537_v28 = vadd.f32 %v536_v23, %v535_v20 }
 0x108   :  { %v403_v63 = vpop.f32.mrb[8].mxu0  ;;  %v1486_v0 = vpop.f32.mrb[8].mxu1 }
 0x109   :  { %v405_v2 = vpop.f32.mrb[9].mxu0  ;;  %v477_v3 = vpop.f32.mrb[9].mxu1  ;;  %v1511_v17 = vadd.f32 %v1484_v62, %v403_v63 }
 0x10a   :  { %v406_v4 = vpop.f32.mrb[10].mxu0  ;;  %v1491_v5 = vpop.f32.mrb[10].mxu1 }
 0x10b   :  { %v408_v8 = vpop.f32.mrb[11].mxu0  ;;  %v480_v9 = vpop.f32.mrb[11].mxu1  ;;  %v538_v26 = vsel %vm530_vm1, %v1511_v17, 0.0  ;;  %v1520_v27 = vadd.f32 %v1484_v62, %v406_v4 }
 0x10c   :  { %v539_v30 = vadd.f32 %v538_v26, %v537_v28 }
 0x10d   :  { %v540_v33 = vsel %vm530_vm1, %v1520_v27, 0.0 }
 0x10e   :  { %v541_v42 = vadd.f32 %v540_v33, %v539_v30 }
 0x110   :  { %v411_v15 = vpop.f32.mrb[12].mxu0  ;;  %v1508_v16 = vpop.f32.mrb[12].mxu1 }
 0x111   :  { %v413_v18 = vpop.f32.mrb[13].mxu0  ;;  %v485_v19 = vpop.f32.mrb[13].mxu1  ;;  %v1523_v29 = vadd.f32 %v1484_v62, %v411_v15 }
 0x112   :  { %v414_v21 = vpop.f32.mrb[14].mxu0  ;;  %v1513_v22 = vpop.f32.mrb[14].mxu1 }
 0x113   :  { %v416_v24 = vpop.f32.mrb[15].mxu0  ;;  %v488_v25 = vpop.f32.mrb[15].mxu1  ;;  %v542_v38 = vsel %vm530_vm1, %v1523_v29, 0.0  ;;  %v1534_v39 = vadd.f32 %v1484_v62, %v414_v21 }
 0x114   :  { %v543_v44 = vadd.f32 %v542_v38, %v541_v42 }
 0x115   :  { %v544_v45 = vsel %vm530_vm1, %v1534_v39, 0.0 }
 0x116   :  { %v545_v54 = vadd.f32 %v544_v45, %v543_v44 }
 0x118   :  { %v419_v31 = vpop.f32.mrb[16].mxu0  ;;  %v1525_v32 = vpop.f32.mrb[16].mxu1 }
 0x119   :  { %v421_v34 = vpop.f32.mrb[17].mxu0  ;;  %v493_v35 = vpop.f32.mrb[17].mxu1  ;;  %v1537_v43 = vadd.f32 %v1484_v62, %v419_v31 }
 0x11a   :  { %v422_v36 = vpop.f32.mrb[18].mxu0  ;;  %v1529_v37 = vpop.f32.mrb[18].mxu1 }
 0x11b   :  { %v424_v40 = vpop.f32.mrb[19].mxu0  ;;  %v496_v41 = vpop.f32.mrb[19].mxu1  ;;  %v546_v49 = vsel %vm530_vm1, %v1537_v43, 0.0  ;;  %v1546_v50 = vadd.f32 %v1484_v62, %v422_v36 }
 0x11c   :  { %v547_v63 = vadd.f32 %v546_v49, %v545_v54 }
 0x11d   :  { %v548_v2 = vsel %vm530_vm1, %v1546_v50, 0.0 }
 0x11e   :  { %v549_v8 = vadd.f32 %v548_v2, %v547_v63 }
 0x120   :  { %v427_v46 = vpop.f32.mrb[20].mxu0  ;;  %v1541_v48 = vpop.f32.mrb[20].mxu1 }
 0x121   :  { %v429_v52 = vpop.f32.mrb[21].mxu0  ;;  %v501_v53 = vpop.f32.mrb[21].mxu1  ;;  %v1551_v58 = vadd.f32 %v1484_v62, %v427_v46 }
 0x122   :  { %v430_v56 = vpop.f32.mrb[22].mxu0  ;;  %v1548_v57 = vpop.f32.mrb[22].mxu1 }
 0x123   :  { %v432_v60 = vpop.f32.mrb[23].mxu0  ;;  %v504_v61 = vpop.f32.mrb[23].mxu1  ;;  %v550_v3 = vsel %vm530_vm1, %v1551_v58, 0.0  ;;  %v1558_v4 = vadd.f32 %v1484_v62, %v430_v56 }
 0x124   :  { %v551_v15 = vadd.f32 %v550_v3, %v549_v8  ;;  %v1595_v8 = vadd.f32 %v1484_v62, %v1473_v47 }
 0x125   :  { %v552_v20 = vsel %vm530_vm1, %v1558_v4, 0.0 }
 0x126   :  { %v553_v26 = vadd.f32 %v552_v20, %v551_v15  ;;  %v1604_v20 = vadd.f32 %v1484_v62, %v1475_v51  ;;  %v566_v47 = vsel %vm530_vm1, %v1595_v8, 0.0 }
 0x128   :  { %v435_v9 = vpop.f32.mrb[24].mxu0  ;;  %v1560_v10 = vpop.f32.mrb[24].mxu1 }
 0x129   :  { %v1563_v11 = vadd.f32 %v1484_v62, %v435_v9  ;;  %v437_v12 = vpop.f32.mrb[25].mxu0  ;;  %v509_v14 = vpop.f32.mrb[25].mxu1 }
 0x12a   :  { %v438_v18 = vpop.f32.mrb[26].mxu0  ;;  %v1565_v19 = vpop.f32.mrb[26].mxu1 }
 0x12b   :  { %v440_v21 = vpop.f32.mrb[27].mxu0  ;;  %v512_v23 = vpop.f32.mrb[27].mxu1  ;;  %v554_v24 = vsel %vm530_vm1, %v1563_v11, 0.0  ;;  %v1572_v25 = vadd.f32 %v1484_v62, %v438_v18 }
 0x12c   :  { %v555_v28 = vadd.f32 %v554_v24, %v553_v26  ;;  %v1612_v24 = vadd.f32 %v1484_v62, %v1477_v55 }
 0x12d   :  { %v556_v33 = vsel %vm530_vm1, %v1572_v25, 0.0 }
 0x12e   :  { %v557_v46 = vadd.f32 %v556_v33, %v555_v28  ;;  %v568_v28 = vsel %vm530_vm1, %v1604_v20, 0.0  ;;  %v570_v33 = vsel %vm530_vm1, %v1612_v24, 0.0 }
 0x130   :  { %v443_v30 = vpop.f32.mrb[28].mxu0  ;;  %v1574_v31 = vpop.f32.mrb[28].mxu1 }
 0x131   :  { %v1579_v34 = vadd.f32 %v1484_v62, %v443_v30  ;;  %v445_v35 = vpop.f32.mrb[29].mxu0  ;;  %v517_v36 = vpop.f32.mrb[29].mxu1  ;;  %v1618_v30 = vadd.f32 %v1484_v62, %v1479_v59 }
 0x132   :  { %v446_v38 = vpop.f32.mrb[30].mxu0  ;;  %v1581_v40 = vpop.f32.mrb[30].mxu1  ;;  %v1624_v35 = vadd.f32 %v1484_v62, %v1486_v0 }
 0x133   :  { %v558_v41 = vsel %vm530_vm1, %v1579_v34, 0.0  ;;  %v1586_v42 = vadd.f32 %v1484_v62, %v446_v38  ;;  %v448_v44 = vpop.f32.mrb[31].mxu0  ;;  %v520_v45 = vpop.f32.mrb[31].mxu1  ;;  %v572_v55 = vsel %vm530_vm1, %v1618_v30, 0.0  ;;  %v1630_v38 = vadd.f32 %v1484_v62, %v1491_v5 }
 0x134   :  { %v559_v49 = vadd.f32 %v558_v41, %v557_v46  ;;  %v574_v59 = vsel %vm530_vm1, %v1624_v35, 0.0  ;;  %v1636_v44 = vadd.f32 %v1484_v62, %v1508_v16  ;;  %v1642_v46 = vadd.f32 %v1484_v62, %v1513_v22 }
 0x135   :  { %v560_v52 = vsel %vm530_vm1, %v1586_v42, 0.0  ;;  %v576_v0 = vsel %vm530_vm1, %v1630_v38, 0.0 }
 0x136   :  { %v561_v63 = vadd.f32 %v560_v52, %v559_v49  ;;  %v578_v5 = vsel %vm530_vm1, %v1636_v44, 0.0  ;;  %v1648_v52 = vadd.f32 %v1484_v62, %v1525_v32  ;;  %v580_v16 = vsel %vm530_vm1, %v1642_v46, 0.0 }
 0x138   :  { %v451_v53 = vpop.f32.mrb[32].mxu0  ;;  %v523_v54 = vpop.f32.mrb[32].mxu1  ;;  %v582_v22 = vsel %vm530_vm1, %v1648_v52, 0.0 }
 0x139   :  { %v1591_v56 = vadd.f32 %v1484_v62, %v451_v53  ;;  %v453_v60 = vpop.f32.mrb[33].mxu0  ;;  %v525_v61 = vpop.f32.mrb[33].mxu1 }
 0x13a   :  { %v454_v2 = vpop.f32.mrb[34].mxu0  ;;  %v526_v3 = vpop.f32.mrb[34].mxu1  ;;  %v1654_v60 = vadd.f32 %v1484_v62, %v1529_v37 }
 0x13b   :  { %v562_v9 = vsel %vm530_vm1, %v1591_v56, 0.0  ;;  %v1600_v12 = vadd.f32 %v1484_v62, %v454_v2  ;;  %v456_v14 = vpop.f32.mrb[35].mxu0  ;;  %v528_v15 = vpop.f32.mrb[35].mxu1 }
 0x13c   :  { %v563_v18 = vadd.f32 %v562_v9, %v561_v63  ;;  %v1660_v63 = vadd.f32 %v1484_v62, %v1541_v48  ;;  %v584_v32 = vsel %vm530_vm1, %v1654_v60, 0.0  ;;  %v1666_v9 = vadd.f32 %v1484_v62, %v1548_v57 }
 0x13d   :  { %v564_v21 = vsel %vm530_vm1, %v1600_v12, 0.0  ;;  %v1672_v15 = vadd.f32 %v1484_v62, %v1560_v10 }
 0x13e   :  { %v565_v23 = vadd.f32 %v564_v21, %v563_v18  ;;  %v586_v37 = vsel %vm530_vm1, %v1660_v63, 0.0  ;;  %v588_v48 = vsel %vm530_vm1, %v1666_v9, 0.0  ;;  %v1678_v21 = vadd.f32 %v1484_v62, %v1565_v19 }
 0x13f   :  { %v590_v57 = vsel %vm530_vm1, %v1672_v15, 0.0 }
 0x140   :  { %v567_v26 = vadd.f32 %v566_v47, %v565_v23  ;;  %v1684_v47 = vadd.f32 %v1484_v62, %v1574_v31  ;;  %v592_v10 = vsel %vm530_vm1, %v1678_v21, 0.0 }
 0x142   :  { %v569_v51 = vadd.f32 %v568_v28, %v567_v26  ;;  %v1690_v28 = vadd.f32 %v1484_v62, %v1581_v40 }
 0x144   :  { %v571_v36 = vadd.f32 %v570_v33, %v569_v51  ;;  %v524_v51 = vadd.f32 %v1484_v62, %v523_v54  ;;  %v594_v33 = vsel %vm530_vm1, %v1684_v47, 0.0 }
 0x146   :  { %v573_v41 = vadd.f32 %v572_v55, %v571_v36  ;;  %v596_v55 = vsel %vm530_vm1, %v1690_v28, 0.0  ;;  %v598_v31 = vsel %vm530_vm1, %v524_v51, 0.0 }
 0x148   :  { %v575_v45 = vadd.f32 %v574_v59, %v573_v41  ;;  %v527_v41 = vadd.f32 %v1484_v62, %v526_v3 }
 0x14a   :  { %v577_v49 = vadd.f32 %v576_v0, %v575_v45  ;;  %v600_v0 = vsel %vm530_vm1, %v527_v41, 0.0 }
 0x14c   :  { %v579_v53 = vadd.f32 %v578_v5, %v577_v49 }
 0x14e   :  { %v581_v61 = vadd.f32 %v580_v16, %v579_v53 }
 0x150   :  { %v583_v2 = vadd.f32 %v582_v22, %v581_v61 }
 0x152   :  { %v585_v14 = vadd.f32 %v584_v32, %v583_v2 }
 0x154   :  { %v587_v18 = vadd.f32 %v586_v37, %v585_v14 }
 0x156   :  { %v589_v23 = vadd.f32 %v588_v48, %v587_v18 }
 0x158   :  { %v591_v26 = vadd.f32 %v590_v57, %v589_v23 }
 0x15a   :  { %v593_v19 = vadd.f32 %v592_v10, %v591_v26 }
 0x15c   :  { %v595_v36 = vadd.f32 %v594_v33, %v593_v19 }
 0x15e   :  { %v597_v59 = vadd.f32 %v596_v55, %v595_v36 }
 0x160   :  { %v599_v45 = vadd.f32 %v598_v31, %v597_v59 }
 0x162   :  { %v601_v40 = vadd.f32 %v600_v0, %v599_v45 }
 0x164   :  { %v602_v49 = vrot.slane %v601_v40, 4 }
 0x166   :  { %v603_v5 = vadd.f32 %v602_v49, %v601_v40 }
 0x168   :  { %v604_v54 = vrot.slane %v603_v5, 2 }
 0x16a   :  { %v605_v53 = vadd.f32 %v604_v54, %v603_v5 }
 0x16c   :  { %v606_v16 = vrot.slane %v605_v53, 1 }
 0x16e   :  { %v607_v61 = vadd.f32 %v606_v16, %v605_v53 }
 0x170   :  { %v1700_v22 = vmul.f32 0.0034722222, %v607_v61 }
 0x172   :  { %v1704_v2 = vsub.f32 %v1586_v42, %v1700_v22  ;;  %v1708_v62 = vsub.f32 %v1591_v56, %v1700_v22  ;;  %v1712_v3 = vsub.f32 %v1600_v12, %v1700_v22  ;;  %v1715_v32 = vsub.f32 %v524_v51, %v1700_v22 }
 0x173   :  { %v1718_v14 = vsub.f32 %v527_v41, %v1700_v22  ;;  %v1722_v37 = vsub.f32 %v1494_v6, %v1700_v22  ;;  %v1726_v42 = vsub.f32 %v1489_v1, %v1700_v22  ;;  %v1730_v56 = vsub.f32 %v1497_v7, %v1700_v22 }
 0x174   :  { %v1734_v12 = vsub.f32 %v1506_v13, %v1700_v22  ;;  %v1742_v6 = vsub.f32 %v1511_v17, %v1700_v22  ;;  %v1748_v7 = vsub.f32 %v1520_v27, %v1700_v22  ;;  %v1756_v10 = vsub.f32 %v1523_v29, %v1700_v22 }
 0x175   :  { %v646_v18 = vmul.f32 %v1722_v37, %v1722_v37  ;;  %v647_v48 = vmul.f32 %v1726_v42, %v1726_v42  ;;  %v648_v1 = vmul.f32 %v1730_v56, %v1730_v56  ;;  %v1763_v27 = vsub.f32 %v1534_v39, %v1700_v22 }
 0x176   :  { %v649_v13 = vmul.f32 %v1734_v12, %v1734_v12  ;;  %v650_v17 = vmul.f32 %v1742_v6, %v1742_v6  ;;  %v651_v33 = vmul.f32 %v1748_v7, %v1748_v7  ;;  %v1770_v29 = vsub.f32 %v1537_v43, %v1700_v22 }
 0x177   :  { %v682_v23 = vsel %vm530_vm1, %v646_v18, 0.0  ;;  %v683_v57 = vsel %vm530_vm1, %v647_v48, 0.0  ;;  %v685_v51 = vsel %vm530_vm1, %v648_v1, 0.0  ;;  %v652_v31 = vmul.f32 %v1756_v10, %v1756_v10 }
 0x178   :  { %v684_v26 = vadd.f32 %v683_v57, %v682_v23  ;;  %v687_v36 = vsel %vm530_vm1, %v649_v13, 0.0  ;;  %v689_v41 = vsel %vm530_vm1, %v650_v17, 0.0  ;;  %v1777_v39 = vsub.f32 %v1546_v50, %v1700_v22 }
 0x179   :  { %v653_v45 = vmul.f32 %v1763_v27, %v1763_v27  ;;  %v691_v0 = vsel %vm530_vm1, %v651_v33, 0.0  ;;  %v1784_v43 = vsub.f32 %v1551_v58, %v1700_v22  ;;  %v654_v49 = vmul.f32 %v1770_v29, %v1770_v29 }
 0x17a   :  { %v686_v19 = vadd.f32 %v685_v51, %v684_v26  ;;  %v693_v5 = vsel %vm530_vm1, %v652_v31, 0.0  ;;  %v1791_v50 = vsub.f32 %v1558_v4, %v1700_v22  ;;  %v655_v53 = vmul.f32 %v1777_v39, %v1777_v39 }
 0x17b   :  { %v695_v16 = vsel %vm530_vm1, %v653_v45, 0.0  ;;  %v1798_v58 = vsub.f32 %v1563_v11, %v1700_v22  ;;  %v656_v18 = vmul.f32 %v1784_v43, %v1784_v43  ;;  %v697_v48 = vsel %vm530_vm1, %v654_v49, 0.0 }
 0x17c   :  { %v688_v55 = vadd.f32 %v687_v36, %v686_v19  ;;  %v1805_v4 = vsub.f32 %v1572_v25, %v1700_v22  ;;  %v657_v13 = vmul.f32 %v1791_v50, %v1791_v50  ;;  %v699_v23 = vsel %vm530_vm1, %v655_v53, 0.0 }
 0x17d   :  { %v1812_v11 = vsub.f32 %v1579_v34, %v1700_v22  ;;  %v658_v26 = vmul.f32 %v1798_v58, %v1798_v58  ;;  %v701_v17 = vsel %vm530_vm1, %v656_v18, 0.0  ;;  %v661_v34 = vmul.f32 %v1704_v2, %v1704_v2 }
 0x17e   :  { %v690_v59 = vadd.f32 %v689_v41, %v688_v55  ;;  %v659_v25 = vmul.f32 %v1805_v4, %v1805_v4  ;;  %v703_v19 = vsel %vm530_vm1, %v657_v13, 0.0  ;;  %v1828_v45 = vsub.f32 %v1595_v8, %v1700_v22 }
 0x17f   :  { %v660_v36 = vmul.f32 %v1812_v11, %v1812_v11  ;;  %v705_v55 = vsel %vm530_vm1, %v658_v26, 0.0  ;;  %v711_v53 = vsel %vm530_vm1, %v661_v34, 0.0  ;;  %v1842_v8 = vsub.f32 %v1612_v24, %v1700_v22 }
 0x180   :  { %v692_v40 = vadd.f32 %v691_v0, %v690_v59  ;;  %v707_v41 = vsel %vm530_vm1, %v659_v25, 0.0  ;;  %v662_v0 = vmul.f32 %v1708_v62, %v1708_v62  ;;  %v1856_v24 = vsub.f32 %v1624_v35, %v1700_v22 }
 0x181   :  { %v1870_v35 = vsub.f32 %v1636_v44, %v1700_v22  ;;  %v1884_v44 = vsub.f32 %v1648_v52, %v1700_v22  ;;  %v1898_v52 = vsub.f32 %v1660_v63, %v1700_v22  ;;  %v1912_v63 = vsub.f32 %v1672_v15, %v1700_v22 }
 0x182   :  { %v694_v54 = vadd.f32 %v693_v5, %v692_v40  ;;  %v709_v40 = vsel %vm530_vm1, %v660_v36, 0.0  ;;  %v1835_v5 = vsub.f32 %v1604_v20, %v1700_v22  ;;  %v713_v18 = vsel %vm530_vm1, %v662_v0, 0.0 }
 0x183   :  { %v1849_v20 = vsub.f32 %v1618_v30, %v1700_v22  ;;  %v1863_v30 = vsub.f32 %v1630_v38, %v1700_v22  ;;  %v1877_v38 = vsub.f32 %v1642_v46, %v1700_v22  ;;  %v1891_v46 = vsub.f32 %v1654_v60, %v1700_v22 }
 0x184   :  { %v696_v61 = vadd.f32 %v695_v16, %v694_v54  ;;  %v663_v54 = vmul.f32 %v1712_v3, %v1712_v3  ;;  %v1905_v60 = vsub.f32 %v1666_v9, %v1700_v22  ;;  %v1919_v9 = vsub.f32 %v1678_v21, %v1700_v22 }
 0x185   :  { %v1926_v15 = vsub.f32 %v1684_v47, %v1700_v22  ;;  %v1933_v21 = vsub.f32 %v1690_v28, %v1700_v22  ;;  %v680_v28 = vmul.f32 %v1715_v32, %v1715_v32 }
 0x186   :  { %v698_v1 = vadd.f32 %v697_v48, %v696_v61  ;;  %v664_v61 = vmul.f32 %v1828_v45, %v1828_v45  ;;  %v715_v13 = vsel %vm530_vm1, %v663_v54, 0.0 }
 0x187   :  { %v678_v47 = vmul.f32 %v1926_v15, %v1926_v15 }
 0x188   :  { %v700_v57 = vadd.f32 %v699_v23, %v698_v1  ;;  %v665_v1 = vmul.f32 %v1835_v5, %v1835_v5  ;;  %v717_v26 = vsel %vm530_vm1, %v664_v61, 0.0 }
 0x189   :  { %v745_v22 = vsel %vm530_vm1, %v678_v47, 0.0 }
 0x18a   :  { %v702_v51 = vadd.f32 %v701_v17, %v700_v57  ;;  %v666_v57 = vmul.f32 %v1842_v8, %v1842_v8  ;;  %v719_v25 = vsel %vm530_vm1, %v665_v1, 0.0 }
 0x18c   :  { %v704_v33 = vadd.f32 %v703_v19, %v702_v51  ;;  %v667_v51 = vmul.f32 %v1849_v20, %v1849_v20  ;;  %v721_v36 = vsel %vm530_vm1, %v666_v57, 0.0 }
 0x18e   :  { %v706_v31 = vadd.f32 %v705_v55, %v704_v33  ;;  %v668_v33 = vmul.f32 %v1856_v24, %v1856_v24  ;;  %v723_v34 = vsel %vm530_vm1, %v667_v51, 0.0 }
 0x190   :  { %v708_v59 = vadd.f32 %v707_v41, %v706_v31  ;;  %v669_v31 = vmul.f32 %v1863_v30, %v1863_v30  ;;  %v725_v0 = vsel %vm530_vm1, %v668_v33, 0.0 }
 0x192   :  { %v710_v49 = vadd.f32 %v709_v40, %v708_v59  ;;  %v670_v59 = vmul.f32 %v1870_v35, %v1870_v35  ;;  %v727_v54 = vsel %vm530_vm1, %v669_v31, 0.0 }
 0x194   :  { %v712_v16 = vadd.f32 %v711_v53, %v710_v49  ;;  %v671_v49 = vmul.f32 %v1877_v38, %v1877_v38  ;;  %v729_v61 = vsel %vm530_vm1, %v670_v59, 0.0 }
 0x196   :  { %v714_v48 = vadd.f32 %v713_v18, %v712_v16  ;;  %v672_v16 = vmul.f32 %v1884_v44, %v1884_v44  ;;  %v731_v1 = vsel %vm530_vm1, %v671_v49, 0.0 }
 0x198   :  { %v716_v23 = vadd.f32 %v715_v13, %v714_v48  ;;  %v673_v48 = vmul.f32 %v1891_v46, %v1891_v46  ;;  %v733_v57 = vsel %vm530_vm1, %v672_v16, 0.0 }
 0x19a   :  { %v718_v17 = vadd.f32 %v717_v26, %v716_v23  ;;  %v674_v23 = vmul.f32 %v1898_v52, %v1898_v52  ;;  %v735_v51 = vsel %vm530_vm1, %v673_v48, 0.0 }
 0x19c   :  { %v720_v19 = vadd.f32 %v719_v25, %v718_v17  ;;  %v675_v17 = vmul.f32 %v1905_v60, %v1905_v60  ;;  %v737_v33 = vsel %vm530_vm1, %v674_v23, 0.0 }
 0x19e   :  { %v722_v55 = vadd.f32 %v721_v36, %v720_v19  ;;  %v676_v19 = vmul.f32 %v1912_v63, %v1912_v63  ;;  %v739_v31 = vsel %vm530_vm1, %v675_v17, 0.0 }
 0x1a0   :  { %v724_v41 = vadd.f32 %v723_v34, %v722_v55  ;;  %v677_v55 = vmul.f32 %v1919_v9, %v1919_v9 }
 0x1a2   :  { %v726_v40 = vadd.f32 %v725_v0, %v724_v41  ;;  %v741_v41 = vsel %vm530_vm1, %v676_v19, 0.0  ;;  %v679_v0 = vmul.f32 %v1933_v21, %v1933_v21 }
 0x1a4   :  { %v728_v53 = vadd.f32 %v727_v54, %v726_v40  ;;  %v743_v40 = vsel %vm530_vm1, %v677_v55, 0.0  ;;  %v747_v16 = vsel %vm530_vm1, %v679_v0, 0.0 }
 0x1a6   :  { %v730_v18 = vadd.f32 %v729_v61, %v728_v53  ;;  %v681_v53 = vmul.f32 %v1718_v14, %v1718_v14 }
 0x1a8   :  { %v732_v13 = vadd.f32 %v731_v1, %v730_v18  ;;  %v749_v18 = vsel %vm530_vm1, %v680_v28, 0.0  ;;  %v751_v1 = vsel %vm530_vm1, %v681_v53, 0.0 }
 0x1aa   :  { %v734_v26 = vadd.f32 %v733_v57, %v732_v13 }
 0x1ac   :  { %v736_v25 = vadd.f32 %v735_v51, %v734_v26 }
 0x1ae   :  { %v738_v36 = vadd.f32 %v737_v33, %v736_v25 }
 0x1b0   :  { %v740_v34 = vadd.f32 %v739_v31, %v738_v36  ;;  %v764_v36 = vlaneseq  ;;  %v762_v31 = vld [vmem:[%s2249_s3] sm:$0x1] }
 0x1b2   :  { %v742_v59 = vadd.f32 %v741_v41, %v740_v34  ;;  %v765_v55 = vshrl.u32 %v764_v36, 7 }
 0x1b4   :  { %v744_v49 = vadd.f32 %v743_v40, %v742_v59  ;;  %v766_v34 = vsub.s32 0, %v765_v55 }
 0x1b6   :  { %v746_v54 = vadd.f32 %v745_v22, %v744_v49 }
 0x1b8   :  { %v748_v61 = vadd.f32 %v747_v16, %v746_v54 }
 0x1ba   :  { %v750_v48 = vadd.f32 %v749_v18, %v748_v61 }
 0x1bc   :  { %v752_v13 = vadd.f32 %v751_v1, %v750_v48 }
 0x1be   :  { %v753_v23 = vrot.slane %v752_v13, 4 }
 0x1c0   :  { %v754_v57 = vadd.f32 %v753_v23, %v752_v13 }
 0x1c2   :  { %v755_v26 = vrot.slane %v754_v57, 2 }
 0x1c4   :  { %v756_v17 = vadd.f32 %v755_v26, %v754_v57 }
 0x1c6   :  { %v757_v51 = vrot.slane %v756_v17, 1 }
 0x1c8   :  { %v758_v25 = vadd.f32 %v757_v51, %v756_v17 }
 0x1ca   :  { %v759_v19 = vmul.f32 0.0034722222, %v758_v25 }
 0x1cc   :  { %v760_v33 = vadd.f32 1e-05, %v759_v19 }
 0x1ce   :  { %1287 = vrsqrt.f32 %v760_v33 }
 0x1d8   :  { %v1288_v47 = vpop.eup %1287 }
 0x1d9   :  { %v763_v41 = vmul.f32 %v1288_v47, %v762_v31 }
 0x1db   :  { %v767_v59 = vrot.slane %v763_v41, %v766_v34 }
 0x1dd   :  { %v768_v0 = vmul.f32 %v767_v59, %v1722_v37  ;;  %v769_v40 = vmul.f32 %v767_v59, %v1726_v42  ;;  %v770_v49 = vmul.f32 %v767_v59, %v1730_v56  ;;  %v771_v28 = vmul.f32 %v767_v59, %v1734_v12 }
 0x1de   :  { %v772_v22 = vmul.f32 %v767_v59, %v1742_v6  ;;  %v773_v54 = vmul.f32 %v767_v59, %v1748_v7  ;;  %v774_v53 = vmul.f32 %v767_v59, %v1756_v10  ;;  %v775_v16 = vmul.f32 %v767_v59, %v1763_v27 }
 0x1df   :  { %v776_v61 = vmul.f32 %v767_v59, %v1770_v29  ;;  %v777_v18 = vmul.f32 %v767_v59, %v1777_v39  ;;  %v778_v37 = vmul.f32 %v767_v59, %v1784_v43  ;;  %v779_v42 = vmul.f32 %v767_v59, %v1791_v50 }
 0x1e0   :  { %v780_v56 = vmul.f32 %v767_v59, %v1798_v58  ;;  %v781_v12 = vmul.f32 %v767_v59, %v1805_v4  ;;  %v782_v6 = vmul.f32 %v767_v59, %v1812_v11  ;;  %v783_v7 = vmul.f32 %v767_v59, %v1704_v2 }
 0x1e1   :  { %v784_v10 = vmul.f32 %v767_v59, %v1708_v62  ;;  %v785_v27 = vmul.f32 %v767_v59, %v1712_v3  ;;  %v786_v29 = vmul.f32 %v767_v59, %v1828_v45  ;;  %v787_v39 = vmul.f32 %v767_v59, %v1835_v5  ;;  %v1132_v45 = vld [vmem:[%s2250_s4] ss:$0 sm:$0xff] }
 0x1e2   :  { %v788_v43 = vmul.f32 %v767_v59, %v1842_v8  ;;  %v789_v50 = vmul.f32 %v767_v59, %v1849_v20  ;;  %v790_v58 = vmul.f32 %v767_v59, %v1856_v24  ;;  %v791_v4 = vmul.f32 %v767_v59, %v1863_v30 }
 0x1e3   :  { %v792_v11 = vmul.f32 %v767_v59, %v1870_v35  ;;  %v793_v2 = vmul.f32 %v767_v59, %v1877_v38  ;;  %v794_v62 = vmul.f32 %v767_v59, %v1884_v44  ;;  %v795_v3 = vmul.f32 %v767_v59, %v1891_v46 }
 0x1e4   :  { %v796_v5 = vmul.f32 %v767_v59, %v1898_v52  ;;  %v797_v8 = vmul.f32 %v767_v59, %v1905_v60  ;;  %v798_v20 = vmul.f32 %v767_v59, %v1912_v63  ;;  %v799_v24 = vmul.f32 %v767_v59, %v1919_v9 }
 0x1e5   :  { %v800_v30 = vmul.f32 %v767_v59, %v1926_v15  ;;  %v801_v35 = vmul.f32 %v767_v59, %v1933_v21  ;;  %v802_v38 = vmul.f32 %v767_v59, %v1715_v32  ;;  %v803_v44 = vmul.f32 %v767_v59, %v1718_v14 }
 0x1e6   :  { %v1994_v46 = vadd.f32 %v1132_v45, %v768_v0  ;;  %v1996_v48 = vadd.f32 %v1132_v45, %v769_v40  ;;  %v1998_v1 = vadd.f32 %v1132_v45, %v770_v49  ;;  %v2000_v52 = vadd.f32 %v1132_v45, %v771_v28 }
 0x1e7   :  { %v2002_v60 = vadd.f32 %v1132_v45, %v772_v22  ;;  %v2004_v63 = vadd.f32 %v1132_v45, %v773_v54  ;;  %v2006_v9 = vadd.f32 %v1132_v45, %v774_v53  ;;  %v2008_v15 = vadd.f32 %v1132_v45, %v775_v16 }
 0x1e8   :  { %v2010_v21 = vadd.f32 %v1132_v45, %v776_v61  ;;  %v2012_v32 = vadd.f32 %v1132_v45, %v777_v18  ;;  %v2014_v14 = vadd.f32 %v1132_v45, %v778_v37  ;;  %v2016_v13 = vadd.f32 %v1132_v45, %v779_v42 }
 0x1e9   :  { %v2018_v23 = vadd.f32 %v1132_v45, %v780_v56  ;;  %v2020_v57 = vadd.f32 %v1132_v45, %v781_v12  ;;  %v2022_v26 = vadd.f32 %v1132_v45, %v782_v6  ;;  %v2024_v17 = vadd.f32 %v1132_v45, %v783_v7 }
 0x1ea   :  { %v2026_v51 = vadd.f32 %v1132_v45, %v784_v10  ;;  %v2028_v25 = vadd.f32 %v1132_v45, %v785_v27  ;;  %v2030_v19 = vadd.f32 %v1132_v45, %v786_v29  ;;  %v2032_v33 = vadd.f32 %v1132_v45, %v787_v39 }
 0x1eb   :  { %v2034_v36 = vadd.f32 %v1132_v45, %v788_v43  ;;  %v2036_v55 = vadd.f32 %v1132_v45, %v789_v50  ;;  %v2038_v31 = vadd.f32 %v1132_v45, %v790_v58  ;;  %v2040_v34 = vadd.f32 %v1132_v45, %v791_v4 }
 0x1ec   :  { %v2042_v47 = vadd.f32 %v1132_v45, %v792_v11  ;;  %v2044_v41 = vadd.f32 %v1132_v45, %v793_v2  ;;  %v2046_v59 = vadd.f32 %v1132_v45, %v794_v62  ;;  %v2048_v0 = vadd.f32 %v1132_v45, %v795_v3 }
 0x1ed   :  { %v2050_v40 = vadd.f32 %v1132_v45, %v796_v5  ;;  %v2052_v49 = vadd.f32 %v1132_v45, %v797_v8  ;;  %v2054_v28 = vadd.f32 %v1132_v45, %v798_v20  ;;  %v2056_v22 = vadd.f32 %v1132_v45, %v799_v24 }
 0x1ee   :  { %v2058_v54 = vadd.f32 %v1132_v45, %v800_v30  ;;  %v2060_v53 = vadd.f32 %v1132_v45, %v801_v35  ;;  %v2062_v16 = vadd.f32 %v1132_v45, %v802_v38  ;;  %v2064_v61 = vadd.f32 %v1132_v45, %v803_v44 }
 0x1ef   :  { %v847_v18 = vmax.f32 %v1994_v46, 0.0  ;;  %v848_v37 = vmax.f32 %v1996_v48, 0.0  ;;  %v849_v42 = vmax.f32 %v1998_v1, 0.0  ;;  %v850_v56 = vmax.f32 %v2000_v52, 0.0 }
 0x1f0   :  { %v851_v12 = vmax.f32 %v2002_v60, 0.0  ;;  %v852_v6 = vmax.f32 %v2004_v63, 0.0  ;;  %v853_v7 = vmax.f32 %v2006_v9, 0.0  ;;  %v854_v10 = vmax.f32 %v2008_v15, 0.0 }
 0x1f1   :  { %v855_v27 = vmax.f32 %v2010_v21, 0.0  ;;  %v856_v29 = vmax.f32 %v2012_v32, 0.0  ;;  %v857_v39 = vmax.f32 %v2014_v14, 0.0  ;;  %v858_v43 = vmax.f32 %v2016_v13, 0.0 }
 0x1f2   :  { %v859_v50 = vmax.f32 %v2018_v23, 0.0  ;;  %v860_v58 = vmax.f32 %v2020_v57, 0.0  ;;  %v861_v4 = vmax.f32 %v2022_v26, 0.0  ;;  %v862_v11 = vmax.f32 %v2024_v17, 0.0 }
 0x1f3   :  { %v863_v2 = vmax.f32 %v2026_v51, 0.0  ;;  %v864_v62 = vmax.f32 %v2028_v25, 0.0  ;;  %v865_v3 = vmax.f32 %v2030_v19, 0.0  ;;  %v866_v45 = vmax.f32 %v2032_v33, 0.0 }
 0x1f4   :  { %v867_v5 = vmax.f32 %v2034_v36, 0.0  ;;  %v868_v8 = vmax.f32 %v2036_v55, 0.0  ;;  %v869_v20 = vmax.f32 %v2038_v31, 0.0  ;;  %v870_v24 = vmax.f32 %v2040_v34, 0.0 }
 0x1f5   :  { %v871_v30 = vmax.f32 %v2042_v47, 0.0  ;;  %v872_v35 = vmax.f32 %v2044_v41, 0.0  ;;  %v873_v38 = vmax.f32 %v2046_v59, 0.0  ;;  %v874_v44 = vmax.f32 %v2048_v0, 0.0 }
 0x1f6   :  { %v875_v46 = vmax.f32 %v2050_v40, 0.0  ;;  %v876_v48 = vmax.f32 %v2052_v49, 0.0  ;;  %v877_v1 = vmax.f32 %v2054_v28, 0.0  ;;  %v878_v52 = vmax.f32 %v2056_v22, 0.0 }
 0x1f7   :  { %v879_v60 = vmax.f32 %v2058_v54, 0.0  ;;  %v880_v63 = vmax.f32 %v2060_v53, 0.0  ;;  %v881_v9 = vmax.f32 %v2062_v16, 0.0  ;;  %v882_v15 = vmax.f32 %v2064_v61, 0.0 }
 0x1f8   :  { %v1169_v21 = vpack.c.bf16 %v847_v18, %v847_v18  ;;  %v1170_v32 = vpack.c.bf16 %v848_v37, %v848_v37  ;;  %v1171_v14 = vpack.c.bf16 %v849_v42, %v849_v42  ;;  %v1172_v13 = vpack.c.bf16 %v850_v56, %v850_v56 }
 0x1f9   :  { %v1173_v23 = vpack.c.bf16 %v851_v12, %v851_v12  ;;  %v1174_v57 = vpack.c.bf16 %v852_v6, %v852_v6  ;;  %v1175_v26 = vpack.c.bf16 %v853_v7, %v853_v7  ;;  %v1176_v17 = vpack.c.bf16 %v854_v10, %v854_v10 }
 0x1fa   :  { %v1177_v51 = vpack.c.bf16 %v855_v27, %v855_v27  ;;  %v1178_v25 = vpack.c.bf16 %v856_v29, %v856_v29  ;;  %v1179_v19 = vpack.c.bf16 %v857_v39, %v857_v39  ;;  %v1180_v33 = vpack.c.bf16 %v858_v43, %v858_v43  ;;  %1028 = vst.msk [vmem:[%s2251_s5] sm:$0xf] %vm1027_vm2, %v1169_v21 }
 0x1fb   :  { %1029 = vst.msk [vmem:[%s2251_s5 + $0x4] sm:$0xf] %vm1027_vm2, %v1170_v32  ;;  %1030 = vst.msk [vmem:[%s2251_s5 + $0x8] sm:$0xf] %vm1027_vm2, %v1171_v14  ;;  %v1181_v36 = vpack.c.bf16 %v859_v50, %v859_v50  ;;  %v1182_v55 = vpack.c.bf16 %v860_v58, %v860_v58  ;;  %v1183_v31 = vpack.c.bf16 %v861_v4, %v861_v4 }
 0x1fc   :  { %1031 = vst.msk [vmem:[%s2251_s5 + $0xc] sm:$0xf] %vm1027_vm2, %v1172_v13  ;;  %v1184_v34 = vpack.c.bf16 %v862_v11, %v862_v11  ;;  %1032 = vst.msk [vmem:[%s2251_s5 + $0x10] sm:$0xf] %vm1027_vm2, %v1173_v23  ;;  %v1185_v47 = vpack.c.bf16 %v863_v2, %v863_v2  ;;  %v1186_v41 = vpack.c.bf16 %v864_v62, %v864_v62 }
 0x1fd   :  { %1033 = vst.msk [vmem:[%s2251_s5 + $0x14] sm:$0xf] %vm1027_vm2, %v1174_v57  ;;  %1034 = vst.msk [vmem:[%s2251_s5 + $0x18] sm:$0xf] %vm1027_vm2, %v1175_v26  ;;  %v1187_v59 = vpack.c.bf16 %v865_v3, %v865_v3  ;;  %v1188_v0 = vpack.c.bf16 %v866_v45, %v866_v45  ;;  %v1189_v40 = vpack.c.bf16 %v867_v5, %v867_v5 }
 0x1fe   :  { %1035 = vst.msk [vmem:[%s2251_s5 + $0x1c] sm:$0xf] %vm1027_vm2, %v1176_v17  ;;  %1036 = vst.msk [vmem:[%s2251_s5 + $0x20] sm:$0xf] %vm1027_vm2, %v1177_v51  ;;  %v1190_v49 = vpack.c.bf16 %v868_v8, %v868_v8  ;;  %v1191_v28 = vpack.c.bf16 %v869_v20, %v869_v20  ;;  %v1192_v22 = vpack.c.bf16 %v870_v24, %v870_v24 }
 0x1ff   :  { %1037 = vst.msk [vmem:[%s2251_s5 + $0x24] sm:$0xf] %vm1027_vm2, %v1178_v25  ;;  %1038 = vst.msk [vmem:[%s2251_s5 + $0x28] sm:$0xf] %vm1027_vm2, %v1179_v19  ;;  %v1193_v54 = vpack.c.bf16 %v871_v30, %v871_v30  ;;  %v1194_v53 = vpack.c.bf16 %v872_v35, %v872_v35  ;;  %v1195_v16 = vpack.c.bf16 %v873_v38, %v873_v38 }
 0x200   :  { %1039 = vst.msk [vmem:[%s2251_s5 + $0x2c] sm:$0xf] %vm1027_vm2, %v1180_v33  ;;  %1040 = vst.msk [vmem:[%s2251_s5 + $0x30] sm:$0xf] %vm1027_vm2, %v1181_v36  ;;  %v1196_v61 = vpack.c.bf16 %v874_v44, %v874_v44  ;;  %v1197_v18 = vpack.c.bf16 %v875_v46, %v875_v46  ;;  %v1198_v37 = vpack.c.bf16 %v876_v48, %v876_v48 }
 0x201   :  { %1041 = vst.msk [vmem:[%s2251_s5 + $0x34] sm:$0xf] %vm1027_vm2, %v1182_v55  ;;  %1042 = vst.msk [vmem:[%s2251_s5 + $0x38] sm:$0xf] %vm1027_vm2, %v1183_v31  ;;  %v1199_v42 = vpack.c.bf16 %v877_v1, %v877_v1  ;;  %v1200_v56 = vpack.c.bf16 %v878_v52, %v878_v52  ;;  %v1201_v12 = vpack.c.bf16 %v879_v60, %v879_v60 }
 0x202   :  { %1043 = vst.msk [vmem:[%s2251_s5 + $0x3c] sm:$0xf] %vm1027_vm2, %v1184_v34  ;;  %1044 = vst.msk [vmem:[%s2251_s5 + $0x40] sm:$0xf] %vm1027_vm2, %v1185_v47  ;;  %v1202_v6 = vpack.c.bf16 %v880_v63, %v880_v63  ;;  %v1203_v7 = vpack.c.bf16 %v881_v9, %v881_v9  ;;  %v1204_v10 = vpack.c.bf16 %v882_v15, %v882_v15 }
 0x203   :  { %1045 = vst.msk [vmem:[%s2251_s5 + $0x44] sm:$0xf] %vm1027_vm2, %v1186_v41  ;;  %1046 = vst.msk [vmem:[%s2251_s5 + $0x48] sm:$0xf] %vm1027_vm2, %v1187_v59 }
 0x204   :  { %1047 = vst.msk [vmem:[%s2251_s5 + $0x4c] sm:$0xf] %vm1027_vm2, %v1188_v0  ;;  %1048 = vst.msk [vmem:[%s2251_s5 + $0x50] sm:$0xf] %vm1027_vm2, %v1189_v40 }
 0x205   :  { %1049 = vst.msk [vmem:[%s2251_s5 + $0x54] sm:$0xf] %vm1027_vm2, %v1190_v49  ;;  %1050 = vst.msk [vmem:[%s2251_s5 + $0x58] sm:$0xf] %vm1027_vm2, %v1191_v28 }
 0x206   :  { %1051 = vst.msk [vmem:[%s2251_s5 + $0x5c] sm:$0xf] %vm1027_vm2, %v1192_v22  ;;  %1052 = vst.msk [vmem:[%s2251_s5 + $0x60] sm:$0xf] %vm1027_vm2, %v1193_v54 }
 0x207   :  { %1053 = vst.msk [vmem:[%s2251_s5 + $0x64] sm:$0xf] %vm1027_vm2, %v1194_v53  ;;  %1054 = vst.msk [vmem:[%s2251_s5 + $0x68] sm:$0xf] %vm1027_vm2, %v1195_v16 }
 0x208   :  { %1055 = vst.msk [vmem:[%s2251_s5 + $0x6c] sm:$0xf] %vm1027_vm2, %v1196_v61  ;;  %1056 = vst.msk [vmem:[%s2251_s5 + $0x70] sm:$0xf] %vm1027_vm2, %v1197_v18 }
 0x209   :  { %1057 = vst.msk [vmem:[%s2251_s5 + $0x74] sm:$0xf] %vm1027_vm2, %v1198_v37  ;;  %1058 = vst.msk [vmem:[%s2251_s5 + $0x78] sm:$0xf] %vm1027_vm2, %v1199_v42 }
 0x20a   :  { %1059 = vst.msk [vmem:[%s2251_s5 + $0x7c] sm:$0xf] %vm1027_vm2, %v1200_v56  ;;  %1060 = vst.msk [vmem:[%s2251_s5 + $0x80] sm:$0xf] %vm1027_vm2, %v1201_v12 }
 0x20b   :  { %1061 = vst.msk [vmem:[%s2251_s5 + $0x84] sm:$0xf] %vm1027_vm2, %v1202_v6  ;;  %1062 = vst.msk [vmem:[%s2251_s5 + $0x88] sm:$0xf] %vm1027_vm2, %v1203_v7 }
 0x20c   :  { %1063 = vst.msk [vmem:[%s2251_s5 + $0x8c] sm:$0xf] %vm1027_vm2, %v1204_v10 }

// kernel: dqn_forward.6
= control target key start
LH: loop header
LB: loop body
LE: loop exit
PB: predicated region body
PF: predicated region fallthrough
CT: control target
= control target key end

     0   :  { %v1468_v1 = vmov 0.0   ;;  %vm1469_vm0 = vmmov 0   ;;  %vm412_vm1 = vcmask 261120   ;;  %vm1078_vm2 = vcmask 257024   ;;  %s2112_s1 = inlined_call_operand.vmem [shape: bf16[288,32], index: 1, kind: input, shape index: {}]   ;;  %s2113_s0 = inlined_call_operand.vmem [shape: bf16[200,288], index: 0, kind: input, shape index: {}]   ;;  %s2114_s2 = inlined_call_operand.vmem [shape: f32[1,32], index: 2, kind: input, shape index: {}]   ;;  %s2115_s3 = inlined_call_operand.vmem [shape: f32[1,32], index: 3, kind: input, shape index: {}]   ;;  %s2116_s4 = inlined_call_operand.vmem [shape: f32[1,32], index: 4, kind: input, shape index: {}]   ;;  %s2117_s5 = inlined_call_operand.vmem [shape: bf16[200,32], index: 5, kind: output, shape index: {}]  }
   0x1   :  { %v1397_v0 = vld [vmem:[%s2112_s1 + $0x40] sm:$0xff]   ;;  %1339 = vmatprep.subr.bf16.mxu1 %v1468_v1  ;;  %1343 = vmatprep.mubr.msk.bf16.mxu1 %vm1469_vm0, %v1468_v1  ;;  %v1399_v3 = vld [vmem:[%s2112_s1 + $0x48] sm:$0xff]   ;;  %v1401_v5 = vld [vmem:[%s2112_s1 + $0x50] sm:$0xff]  }
   0x2   :  { %v1398_v2 = vld [vmem:[%s2112_s1] sm:$0xff]   ;;  %1230 = vmatprep.subr.bf16.mxu0 %v1397_v0  ;;  %v1400_v4 = vld [vmem:[%s2112_s1 + $0x8] sm:$0xff]   ;;  %v1402_v6 = vld [vmem:[%s2112_s1 + $0x10] sm:$0xff]  }
   0x3   :  { %1231 = vmatpush3.bf16.msra.mxu0 %v1398_v2  ;;  %v1403_v7 = vld [vmem:[%s2112_s1 + $0x58] sm:$0xff]   ;;  %v1405_v9 = vld [vmem:[%s2112_s1 + $0x60] sm:$0xff]   ;;  %v1407_v12 = vld [vmem:[%s2112_s1 + $0x68] sm:$0xff]  }
   0x4   :  { %1232 = vmatprep.subr.bf16.mxu0 %v1399_v3  ;;  %v1404_v8 = vld [vmem:[%s2112_s1 + $0x18] sm:$0xff]   ;;  %v1411_v10 = vld [vmem:[%s2112_s1 + $0x80] sm:$0xff]   ;;  %v1408_v13 = vld [vmem:[%s2112_s1 + $0x28] sm:$0xff]  }
   0x5   :  { %v1406_v11 = vld [vmem:[%s2112_s1 + $0x20] sm:$0xff]   ;;  %1340 = vmatpush3.bf16.msra.mxu1 %v1411_v10  ;;  %v1409_v14 = vld [vmem:[%s2112_s1 + $0x70] sm:$0xff]   ;;  %v1417_v16 = vld [vmem:[%s2112_s1 + $0x88] sm:$0xff]  }
   0x6   :  { %1341 = vmatprep.subr.bf16.mxu1 %v1468_v1  ;;  %v1416_v15 = vld [vmem:[%s2113_s0 + $0x4] ss:$12 sps:$4 sm:$0xff]   ;;  %v1418_v17 = vld [vmem:[%s2113_s0 + $0x8] ss:$12 sps:$4 sm:$0xff]   ;;  %v1412_v19 = vld [vmem:[%s2112_s1 + $0x78] sm:$0xff]  }
   0x7   :  { %1233 = vmatpush3.bf16.msra.mxu0 %v1400_v4  ;;  %484 = vmatprep.mubr.bf16.mxu0 %v1416_v15  ;;  %v1410_v18 = vld [vmem:[%s2112_s1 + $0x30] sm:$0xff]   ;;  %v1413_v20 = vld [vmem:[%s2112_s1 + $0x38] sm:$0xff]   ;;  %v1422_v21 = vld [vmem:[%s2113_s0 + $0x20] ss:$12 sps:$4 sm:$0xff]  }
   0x8   :  { %1234 = vmatprep.subr.bf16.mxu0 %v1401_v5  ;;  %v1414_v22 = vld [vmem:[%s2113_s0] ss:$12 sps:$4 sm:$0xff]   ;;  %v1419_v23 = vld [vmem:[%s2113_s0 + $0x1c] ss:$12 sps:$4 sm:$0xff]   ;;  %v1426_v24 = vld [vmem:[%s2113_s0 + $0x38] ss:$12 sps:$4 sm:$0xff]  }
   0x9   :  { %1342 = vmatpush3.bf16.msra.mxu1 %v1417_v16  ;;  %v1421_v25 = vld [vmem:[%s2113_s0 + $0x18] ss:$12 sps:$4 sm:$0xff]   ;;  %v1423_v26 = vld [vmem:[%s2113_s0 + $0x34] ss:$12 sps:$4 sm:$0xff]   ;;  %v1430_v27 = vld [vmem:[%s2113_s0 + $0x50] ss:$12 sps:$4 sm:$0xff]  }
   0xa   :  { %v1425_v28 = vld [vmem:[%s2113_s0 + $0x30] ss:$12 sps:$4 sm:$0xff]   ;;  %v1427_v29 = vld [vmem:[%s2113_s0 + $0x4c] ss:$12 sps:$4 sm:$0xff]   ;;  %v1434_v30 = vld [vmem:[%s2113_s0 + $0x68] ss:$12 sps:$4 sm:$0xff]  }
   0xb   :  { %1235 = vmatpush3.bf16.msra.mxu0 %v1402_v6  ;;  %v1429_v31 = vld [vmem:[%s2113_s0 + $0x48] ss:$12 sps:$4 sm:$0xff]   ;;  %v1431_v32 = vld [vmem:[%s2113_s0 + $0x64] ss:$12 sps:$4 sm:$0xff]   ;;  %v1438_v33 = vld [vmem:[%s2113_s0 + $0x80] ss:$12 sps:$4 sm:$0xff]  }
   0xc   :  { %1236 = vmatprep.subr.bf16.mxu0 %v1403_v7  ;;  %1344 = vmatmul.mubr.msk.bf16.vlgmr.msra.gmra.mrb[0].mxu1 %vm412_vm1, %v1418_v17  ;;  %v1433_v34 = vld [vmem:[%s2113_s0 + $0x60] ss:$12 sps:$4 sm:$0xff]   ;;  %v1435_v35 = vld [vmem:[%s2113_s0 + $0x7c] ss:$12 sps:$4 sm:$0xff]   ;;  %v1442_v36 = vld [vmem:[%s2113_s0 + $0x98] ss:$12 sps:$4 sm:$0xff]  }
   0xd   :  { %1347 = vmatprep.mubr.msk.bf16.mxu1 %vm1469_vm0, %v1468_v1  ;;  %v1437_v37 = vld [vmem:[%s2113_s0 + $0x78] ss:$12 sps:$4 sm:$0xff]   ;;  %v1439_v38 = vld [vmem:[%s2113_s0 + $0x94] ss:$12 sps:$4 sm:$0xff]   ;;  %v1446_v39 = vld [vmem:[%s2113_s0 + $0xb0] ss:$12 sps:$4 sm:$0xff]  }
   0xe   :  { %v1441_v40 = vld [vmem:[%s2113_s0 + $0x90] ss:$12 sps:$4 sm:$0xff]   ;;  %v1443_v41 = vld [vmem:[%s2113_s0 + $0xac] ss:$12 sps:$4 sm:$0xff]   ;;  %v1450_v42 = vld [vmem:[%s2113_s0 + $0xc8] ss:$12 sps:$4 sm:$0xff]  }
   0xf   :  { %1237 = vmatpush3.bf16.msra.mxu0 %v1404_v8  ;;  %v1445_v43 = vld [vmem:[%s2113_s0 + $0xa8] ss:$12 sps:$4 sm:$0xff]   ;;  %v1447_v44 = vld [vmem:[%s2113_s0 + $0xc4] ss:$12 sps:$4 sm:$0xff]   ;;  %v1454_v45 = vld [vmem:[%s2113_s0 + $0xe0] ss:$12 sps:$4 sm:$0xff]  }
  0x10   :  { %1238 = vmatprep.subr.bf16.mxu0 %v1405_v9  ;;  %v1449_v46 = vld [vmem:[%s2113_s0 + $0xc0] ss:$12 sps:$4 sm:$0xff]   ;;  %v1451_v47 = vld [vmem:[%s2113_s0 + $0xdc] ss:$12 sps:$4 sm:$0xff]   ;;  %v1458_v48 = vld [vmem:[%s2113_s0 + $0xf8] ss:$12 sps:$4 sm:$0xff]  }
  0x11   :  { %v1453_v49 = vld [vmem:[%s2113_s0 + $0xd8] ss:$12 sps:$4 sm:$0xff]   ;;  %v1455_v50 = vld [vmem:[%s2113_s0 + $0xf4] ss:$12 sps:$4 sm:$0xff]   ;;  %v1462_v51 = vld [vmem:[%s2113_s0 + $0x110] ss:$12 sps:$4 sm:$0xff]  }
  0x12   :  { %v1457_v52 = vld [vmem:[%s2113_s0 + $0xf0] ss:$12 sps:$4 sm:$0xff]   ;;  %v1459_v53 = vld [vmem:[%s2113_s0 + $0x10c] ss:$12 sps:$4 sm:$0xff]   ;;  %v69_v54 = vld [vmem:[%s2113_s0 + $0x120] sm:$0xff] }
  0x13   :  { %1239 = vmatpush3.bf16.msra.mxu0 %v1406_v11  ;;  %v1465_v55 = vld [vmem:[%s2113_s0 + $0x128] ss:$0 sps:$4 sm:$0xff]   ;;  %v1146_v57 = vcombine.high %v69_v54, %v69_v54  ;;  %v1145_v58 = vcombine.low %v69_v54, %v69_v54  ;;  %v1712_v4 = vld [vmem:[%s2114_s2] ss:$0 sm:$0xff] }
  0x14   :  { %1240 = vmatprep.subr.bf16.mxu0 %v1407_v12  ;;  %1348 = vmatmul.mubr.msk.bf16.gmra.mrb[4].mxu1 %vm412_vm1, %v1422_v21  ;;  %v1461_v56 = vld [vmem:[%s2113_s0 + $0x108] ss:$12 sps:$4 sm:$0xff]  }
  0x15   :  { %1351 = vmatprep.mubr.msk.bf16.mxu1 %vm1469_vm0, %v1468_v1 }
  0x17   :  { %1241 = vmatpush3.bf16.msra.mxu0 %v1408_v13 }
  0x18   :  { %1242 = vmatprep.subr.bf16.mxu0 %v1409_v14 }
  0x1b   :  { %1243 = vmatpush3.bf16.msra.mxu0 %v1410_v18 }
  0x1c   :  { %1244 = vmatprep.subr.bf16.mxu0 %v1412_v19  ;;  %1352 = vmatmul.mubr.msk.bf16.gmra.mrb[8].mxu1 %vm412_vm1, %v1426_v24 }
  0x1d   :  { %1355 = vmatprep.mubr.msk.bf16.mxu1 %vm1469_vm0, %v1468_v1 }
  0x1f   :  { %1245 = vmatpush3.bf16.msra.mxu0 %v1413_v20 }
  0x22   :  { %485 = vmatmul.mubr.bf16.vlgmr.msra.gmra.mrb[0].mxu0 %v1414_v22 }
  0x23   :  { %492 = vmatprep.mubr.bf16.mxu0 %v1419_v23 }
  0x24   :  { %1356 = vmatmul.mubr.msk.bf16.gmra.mrb[12].mxu1 %vm412_vm1, %v1430_v27 }
  0x25   :  { %1359 = vmatprep.mubr.msk.bf16.mxu1 %vm1469_vm0, %v1468_v1 }
  0x2a   :  { %493 = vmatmul.mubr.bf16.gmra.mrb[4].mxu0 %v1421_v25 }
  0x2b   :  { %500 = vmatprep.mubr.bf16.mxu0 %v1423_v26 }
  0x2c   :  { %1360 = vmatmul.mubr.msk.bf16.gmra.mrb[16].mxu1 %vm412_vm1, %v1434_v30 }
  0x2d   :  { %1363 = vmatprep.mubr.msk.bf16.mxu1 %vm1469_vm0, %v1468_v1 }
  0x32   :  { %501 = vmatmul.mubr.bf16.gmra.mrb[8].mxu0 %v1425_v28 }
  0x33   :  { %508 = vmatprep.mubr.bf16.mxu0 %v1427_v29 }
  0x34   :  { %1364 = vmatmul.mubr.msk.bf16.gmra.mrb[20].mxu1 %vm412_vm1, %v1438_v33 }
  0x35   :  { %1367 = vmatprep.mubr.msk.bf16.mxu1 %vm1469_vm0, %v1468_v1 }
  0x3a   :  { %509 = vmatmul.mubr.bf16.gmra.mrb[12].mxu0 %v1429_v31 }
  0x3b   :  { %516 = vmatprep.mubr.bf16.mxu0 %v1431_v32 }
  0x3c   :  { %1368 = vmatmul.mubr.msk.bf16.gmra.mrb[24].mxu1 %vm412_vm1, %v1442_v36 }
  0x3d   :  { %1371 = vmatprep.mubr.msk.bf16.mxu1 %vm1469_vm0, %v1468_v1 }
  0x42   :  { %517 = vmatmul.mubr.bf16.gmra.mrb[16].mxu0 %v1433_v34 }
  0x43   :  { %524 = vmatprep.mubr.bf16.mxu0 %v1435_v35 }
  0x44   :  { %1372 = vmatmul.mubr.msk.bf16.gmra.mrb[28].mxu1 %vm412_vm1, %v1446_v39 }
  0x45   :  { %1375 = vmatprep.mubr.msk.bf16.mxu1 %vm1469_vm0, %v1468_v1 }
  0x4a   :  { %525 = vmatmul.mubr.bf16.gmra.mrb[20].mxu0 %v1437_v37 }
  0x4b   :  { %532 = vmatprep.mubr.bf16.mxu0 %v1439_v38 }
  0x4c   :  { %1376 = vmatmul.mubr.msk.bf16.gmra.mrb[32].mxu1 %vm412_vm1, %v1450_v42 }
  0x4d   :  { %1379 = vmatprep.mubr.msk.bf16.mxu1 %vm1469_vm0, %v1468_v1 }
  0x52   :  { %533 = vmatmul.mubr.bf16.gmra.mrb[24].mxu0 %v1441_v40 }
  0x53   :  { %540 = vmatprep.mubr.bf16.mxu0 %v1443_v41 }
  0x54   :  { %1380 = vmatmul.mubr.msk.bf16.gmra.mrb[36].mxu1 %vm412_vm1, %v1454_v45 }
  0x55   :  { %1383 = vmatprep.mubr.msk.bf16.mxu1 %vm1469_vm0, %v1468_v1 }
  0x5a   :  { %541 = vmatmul.mubr.bf16.gmra.mrb[28].mxu0 %v1445_v43 }
  0x5b   :  { %548 = vmatprep.mubr.bf16.mxu0 %v1447_v44 }
  0x5c   :  { %1384 = vmatmul.mubr.msk.bf16.gmra.mrb[40].mxu1 %vm412_vm1, %v1458_v48 }
  0x5d   :  { %1387 = vmatprep.mubr.msk.bf16.mxu1 %vm1469_vm0, %v1468_v1 }
  0x62   :  { %549 = vmatmul.mubr.bf16.gmra.mrb[32].mxu0 %v1449_v46 }
  0x63   :  { %556 = vmatprep.mubr.bf16.mxu0 %v1451_v47 }
  0x64   :  { %1388 = vmatmul.mubr.msk.bf16.gmra.mrb[44].mxu1 %vm412_vm1, %v1462_v51 }
  0x65   :  { %1391 = vmatprep.mubr.msk.bf16.mxu1 %vm1469_vm0, %v1468_v1 }
  0x6a   :  { %557 = vmatmul.mubr.bf16.gmra.mrb[36].mxu0 %v1453_v49 }
  0x6b   :  { %564 = vmatprep.mubr.bf16.mxu0 %v1455_v50 }
  0x6c   :  { %1392 = vmatmul.mubr.msk.bf16.gmra.mrb[48].mxu1 %vm412_vm1, %v1465_v55 }
  0x72   :  { %565 = vmatmul.mubr.bf16.gmra.mrb[40].mxu0 %v1457_v52 }
  0x73   :  { %572 = vmatprep.mubr.bf16.mxu0 %v1459_v53 }
  0x7a   :  { %573 = vmatmul.mubr.bf16.gmra.mrb[44].mxu0 %v1461_v56 }
  0x7b   :  { %580 = vmatprep.mubr.bf16.mxu0 %v1146_v57 }
  0x82   :  { %581 = vmatmul.mubr.bf16.gmra.mrb[48].mxu0 %v1145_v58 }
  0xdf   :  { %v622_v59 = vpop.f32.mrb[0].mxu1 }
  0xe0   :  { %v1345_v60 = vpop.f32.mrb[1].mxu1 }
  0xe1   :  { %v625_v61 = vpop.f32.mrb[2].mxu1 }
  0xe2   :  { %v1346_v62 = vpop.f32.mrb[3].mxu1 }
  0xe7   :  { %v630_v63 = vpop.f32.mrb[4].mxu1 }
  0xe8   :  { %v1349_v0 = vpop.f32.mrb[5].mxu1 }
  0xe9   :  { %v633_v2 = vpop.f32.mrb[6].mxu1 }
  0xea   :  { %v1350_v5 = vpop.f32.mrb[7].mxu1 }
  0xef   :  { %v638_v13 = vpop.f32.mrb[8].mxu1 }
  0xf0   :  { %v1353_v14 = vpop.f32.mrb[9].mxu1 }
  0xf1   :  { %v641_v17 = vpop.f32.mrb[10].mxu1 }
  0xf2   :  { %v1354_v19 = vpop.f32.mrb[11].mxu1 }
  0xf5   :  { %v1246_v1 = vpop.f32.mrb[0].mxu0 }
  0xf6   :  { %v1247_v3 = vpop.f32.mrb[1].mxu0 }
  0xf7   :  { %v1248_v6 = vadd.f32 %v1247_v3, %v1246_v1  ;;  %v1249_v7 = vpop.f32.mrb[2].mxu0  ;;  %v646_v30 = vpop.f32.mrb[12].mxu1 }
  0xf8   :  { %v1250_v8 = vpop.f32.mrb[3].mxu0  ;;  %v1357_v31 = vpop.f32.mrb[13].mxu1 }
  0xf9   :  { %v487_v9 = vadd.f32 %v1248_v6, %v1712_v4  ;;  %v1251_v10 = vadd.f32 %v1250_v8, %v1249_v7  ;;  %v649_v35 = vpop.f32.mrb[14].mxu1 }
  0xfa   :  { %v1358_v38 = vpop.f32.mrb[15].mxu1 }
  0xfb   :  { %v1715_v11 = vadd.f32 %v622_v59, %v487_v9  ;;  %v490_v12 = vadd.f32 %v1251_v10, %v1712_v4 }
  0xfd   :  { %v1718_v15 = vadd.f32 %v625_v61, %v490_v12  ;;  %v1252_v16 = vpop.f32.mrb[4].mxu0  ;;  %v724_v20 = vsel %vm412_vm1, %v1715_v11, 0.0 }
  0xfe   :  { %v1253_v18 = vpop.f32.mrb[5].mxu0 }
  0xff   :  { %v725_v21 = vsel %vm412_vm1, %v1718_v15, 0.0  ;;  %v1254_v22 = vadd.f32 %v1253_v18, %v1252_v16  ;;  %v1255_v23 = vpop.f32.mrb[6].mxu0  ;;  %v654_v48 = vpop.f32.mrb[16].mxu1 }
 0x100   :  { %v726_v24 = vadd.f32 %v725_v21, %v724_v20  ;;  %v1256_v25 = vpop.f32.mrb[7].mxu0  ;;  %v1361_v49 = vpop.f32.mrb[17].mxu1 }
 0x101   :  { %v495_v26 = vadd.f32 %v1254_v22, %v1712_v4  ;;  %v1257_v27 = vadd.f32 %v1256_v25, %v1255_v23  ;;  %v657_v53 = vpop.f32.mrb[18].mxu1 }
 0x102   :  { %v1362_v56 = vpop.f32.mrb[19].mxu1 }
 0x103   :  { %v1725_v28 = vadd.f32 %v630_v63, %v495_v26  ;;  %v498_v29 = vadd.f32 %v1257_v27, %v1712_v4 }
 0x105   :  { %v727_v32 = vsel %vm412_vm1, %v1725_v28, 0.0  ;;  %v1730_v33 = vadd.f32 %v633_v2, %v498_v29  ;;  %v1258_v34 = vpop.f32.mrb[8].mxu0 }
 0x106   :  { %v728_v36 = vadd.f32 %v727_v32, %v726_v24  ;;  %v1259_v37 = vpop.f32.mrb[9].mxu0 }
 0x107   :  { %v729_v39 = vsel %vm412_vm1, %v1730_v33, 0.0  ;;  %v1260_v40 = vadd.f32 %v1259_v37, %v1258_v34  ;;  %v1261_v41 = vpop.f32.mrb[10].mxu0  ;;  %v662_v2 = vpop.f32.mrb[20].mxu1 }
 0x108   :  { %v730_v42 = vadd.f32 %v729_v39, %v728_v36  ;;  %v1262_v43 = vpop.f32.mrb[11].mxu0  ;;  %v1365_v3 = vpop.f32.mrb[21].mxu1 }
 0x109   :  { %v503_v44 = vadd.f32 %v1260_v40, %v1712_v4  ;;  %v1263_v45 = vadd.f32 %v1262_v43, %v1261_v41  ;;  %v665_v8 = vpop.f32.mrb[22].mxu1 }
 0x10a   :  { %v1366_v12 = vpop.f32.mrb[23].mxu1 }
 0x10b   :  { %v1735_v46 = vadd.f32 %v638_v13, %v503_v44  ;;  %v506_v47 = vadd.f32 %v1263_v45, %v1712_v4 }
 0x10d   :  { %v731_v50 = vsel %vm412_vm1, %v1735_v46, 0.0  ;;  %v1740_v51 = vadd.f32 %v641_v17, %v506_v47  ;;  %v1264_v52 = vpop.f32.mrb[12].mxu0 }
 0x10e   :  { %v732_v54 = vadd.f32 %v731_v50, %v730_v42  ;;  %v1265_v55 = vpop.f32.mrb[13].mxu0 }
 0x10f   :  { %v733_v57 = vsel %vm412_vm1, %v1740_v51, 0.0  ;;  %v1266_v58 = vadd.f32 %v1265_v55, %v1264_v52  ;;  %v1267_v59 = vpop.f32.mrb[14].mxu0  ;;  %v670_v23 = vpop.f32.mrb[24].mxu1 }
 0x110   :  { %v734_v60 = vadd.f32 %v733_v57, %v732_v54  ;;  %v1268_v61 = vpop.f32.mrb[15].mxu0  ;;  %v1369_v24 = vpop.f32.mrb[25].mxu1 }
 0x111   :  { %v511_v62 = vadd.f32 %v1266_v58, %v1712_v4  ;;  %v1269_v63 = vadd.f32 %v1268_v61, %v1267_v59  ;;  %v673_v29 = vpop.f32.mrb[26].mxu1 }
 0x112   :  { %v1370_v32 = vpop.f32.mrb[27].mxu1 }
 0x113   :  { %v1745_v0 = vadd.f32 %v646_v30, %v511_v62  ;;  %v514_v1 = vadd.f32 %v1269_v63, %v1712_v4 }
 0x115   :  { %v735_v5 = vsel %vm412_vm1, %v1745_v0, 0.0  ;;  %v1750_v6 = vadd.f32 %v649_v35, %v514_v1  ;;  %v1270_v7 = vpop.f32.mrb[16].mxu0 }
 0x116   :  { %v736_v9 = vadd.f32 %v735_v5, %v734_v60  ;;  %v1271_v10 = vpop.f32.mrb[17].mxu0 }
 0x117   :  { %v737_v13 = vsel %vm412_vm1, %v1750_v6, 0.0  ;;  %v1272_v14 = vadd.f32 %v1271_v10, %v1270_v7  ;;  %v1273_v16 = vpop.f32.mrb[18].mxu0  ;;  %v678_v43 = vpop.f32.mrb[28].mxu1 }
 0x118   :  { %v738_v17 = vadd.f32 %v737_v13, %v736_v9  ;;  %v1274_v18 = vpop.f32.mrb[19].mxu0  ;;  %v1373_v44 = vpop.f32.mrb[29].mxu1 }
 0x119   :  { %v519_v19 = vadd.f32 %v1272_v14, %v1712_v4  ;;  %v1275_v20 = vadd.f32 %v1274_v18, %v1273_v16  ;;  %v681_v49 = vpop.f32.mrb[30].mxu1 }
 0x11b   :  { %v1755_v21 = vadd.f32 %v654_v48, %v519_v19  ;;  %v522_v22 = vadd.f32 %v1275_v20, %v1712_v4 }
 0x11d   :  { %v739_v25 = vsel %vm412_vm1, %v1755_v21, 0.0  ;;  %v1760_v26 = vadd.f32 %v657_v53, %v522_v22  ;;  %v1276_v27 = vpop.f32.mrb[20].mxu0  ;;  %v1374_v53 = vpop.f32.mrb[31].mxu1 }
 0x11e   :  { %v740_v30 = vadd.f32 %v739_v25, %v738_v17  ;;  %v1277_v31 = vpop.f32.mrb[21].mxu0 }
 0x11f   :  { %v741_v34 = vsel %vm412_vm1, %v1760_v26, 0.0  ;;  %v1278_v35 = vadd.f32 %v1277_v31, %v1276_v27  ;;  %v1279_v36 = vpop.f32.mrb[22].mxu0  ;;  %v686_v63 = vpop.f32.mrb[32].mxu1 }
 0x120   :  { %v742_v37 = vadd.f32 %v741_v34, %v740_v30  ;;  %v1280_v38 = vpop.f32.mrb[23].mxu0  ;;  %v1377_v1 = vpop.f32.mrb[33].mxu1 }
 0x121   :  { %v527_v39 = vadd.f32 %v1278_v35, %v1712_v4  ;;  %v1281_v40 = vadd.f32 %v1280_v38, %v1279_v36  ;;  %v689_v7 = vpop.f32.mrb[34].mxu1 }
 0x122   :  { %v1378_v10 = vpop.f32.mrb[35].mxu1 }
 0x123   :  { %v1765_v41 = vadd.f32 %v662_v2, %v527_v39  ;;  %v530_v42 = vadd.f32 %v1281_v40, %v1712_v4 }
 0x125   :  { %v743_v45 = vsel %vm412_vm1, %v1765_v41, 0.0  ;;  %v1770_v47 = vadd.f32 %v665_v8, %v530_v42  ;;  %v1282_v48 = vpop.f32.mrb[24].mxu0 }
 0x126   :  { %v744_v50 = vadd.f32 %v743_v45, %v742_v37  ;;  %v1283_v52 = vpop.f32.mrb[25].mxu0 }
 0x127   :  { %v745_v54 = vsel %vm412_vm1, %v1770_v47, 0.0  ;;  %v1284_v55 = vadd.f32 %v1283_v52, %v1282_v48  ;;  %v1285_v56 = vpop.f32.mrb[26].mxu0 }
 0x128   :  { %v746_v57 = vadd.f32 %v745_v54, %v744_v50  ;;  %v1286_v58 = vpop.f32.mrb[27].mxu0 }
 0x129   :  { %v535_v59 = vadd.f32 %v1284_v55, %v1712_v4  ;;  %v1287_v60 = vadd.f32 %v1286_v58, %v1285_v56 }
 0x12b   :  { %v1775_v61 = vadd.f32 %v670_v23, %v535_v59  ;;  %v538_v62 = vadd.f32 %v1287_v60, %v1712_v4  ;;  %v694_v23 = vpop.f32.mrb[36].mxu1 }
 0x12c   :  { %v1381_v24 = vpop.f32.mrb[37].mxu1 }
 0x12d   :  { %v747_v2 = vsel %vm412_vm1, %v1775_v61, 0.0  ;;  %v1780_v3 = vadd.f32 %v673_v29, %v538_v62  ;;  %v1288_v5 = vpop.f32.mrb[28].mxu0  ;;  %v697_v30 = vpop.f32.mrb[38].mxu1 }
 0x12e   :  { %v748_v8 = vadd.f32 %v747_v2, %v746_v57  ;;  %v1289_v9 = vpop.f32.mrb[29].mxu0  ;;  %v1382_v34 = vpop.f32.mrb[39].mxu1 }
 0x12f   :  { %v749_v12 = vsel %vm412_vm1, %v1780_v3, 0.0  ;;  %v1290_v13 = vadd.f32 %v1289_v9, %v1288_v5  ;;  %v1291_v14 = vpop.f32.mrb[30].mxu0  ;;  %v702_v45 = vpop.f32.mrb[40].mxu1 }
 0x130   :  { %v750_v16 = vadd.f32 %v749_v12, %v748_v8  ;;  %v1292_v17 = vpop.f32.mrb[31].mxu0  ;;  %v1385_v48 = vpop.f32.mrb[41].mxu1 }
 0x131   :  { %v543_v18 = vadd.f32 %v1290_v13, %v1712_v4  ;;  %v1293_v19 = vadd.f32 %v1292_v17, %v1291_v14  ;;  %v705_v53 = vpop.f32.mrb[42].mxu1 }
 0x132   :  { %v1386_v56 = vpop.f32.mrb[43].mxu1 }
 0x133   :  { %v1785_v20 = vadd.f32 %v678_v43, %v543_v18  ;;  %v546_v22 = vadd.f32 %v1293_v19, %v1712_v4 }
 0x135   :  { %v751_v25 = vsel %vm412_vm1, %v1785_v20, 0.0  ;;  %v1790_v27 = vadd.f32 %v681_v49, %v546_v22  ;;  %v1294_v29 = vpop.f32.mrb[32].mxu0 }
 0x136   :  { %v752_v31 = vadd.f32 %v751_v25, %v750_v16  ;;  %v1295_v32 = vpop.f32.mrb[33].mxu0 }
 0x137   :  { %v753_v35 = vsel %vm412_vm1, %v1790_v27, 0.0  ;;  %v1296_v36 = vadd.f32 %v1295_v32, %v1294_v29  ;;  %v1297_v37 = vpop.f32.mrb[34].mxu0 }
 0x138   :  { %v754_v38 = vadd.f32 %v753_v35, %v752_v31  ;;  %v1298_v39 = vpop.f32.mrb[35].mxu0 }
 0x139   :  { %v551_v40 = vadd.f32 %v1296_v36, %v1712_v4  ;;  %v1299_v42 = vadd.f32 %v1298_v39, %v1297_v37 }
 0x13b   :  { %v1795_v43 = vadd.f32 %v686_v63, %v551_v40  ;;  %v554_v44 = vadd.f32 %v1299_v42, %v1712_v4 }
 0x13d   :  { %v755_v49 = vsel %vm412_vm1, %v1795_v43, 0.0  ;;  %v1800_v50 = vadd.f32 %v689_v7, %v554_v44  ;;  %v1300_v52 = vpop.f32.mrb[36].mxu0  ;;  %v710_v7 = vpop.f32.mrb[44].mxu1 }
 0x13e   :  { %v756_v54 = vadd.f32 %v755_v49, %v754_v38  ;;  %v1301_v55 = vpop.f32.mrb[37].mxu0  ;;  %v1389_v8 = vpop.f32.mrb[45].mxu1 }
 0x13f   :  { %v757_v57 = vsel %vm412_vm1, %v1800_v50, 0.0  ;;  %v1302_v58 = vadd.f32 %v1301_v55, %v1300_v52  ;;  %v1303_v59 = vpop.f32.mrb[38].mxu0  ;;  %v713_v13 = vpop.f32.mrb[46].mxu1 }
 0x140   :  { %v758_v60 = vadd.f32 %v757_v57, %v756_v54  ;;  %v1304_v62 = vpop.f32.mrb[39].mxu0  ;;  %v1390_v17 = vpop.f32.mrb[47].mxu1 }
 0x141   :  { %v559_v63 = vadd.f32 %v1302_v58, %v1712_v4  ;;  %v1305_v1 = vadd.f32 %v1304_v62, %v1303_v59 }
 0x143   :  { %v1805_v2 = vadd.f32 %v694_v23, %v559_v63  ;;  %v562_v5 = vadd.f32 %v1305_v1, %v1712_v4 }
 0x145   :  { %v759_v9 = vsel %vm412_vm1, %v1805_v2, 0.0  ;;  %v1810_v10 = vadd.f32 %v697_v30, %v562_v5  ;;  %v1306_v12 = vpop.f32.mrb[40].mxu0  ;;  %v718_v30 = vpop.f32.mrb[48].mxu1 }
 0x146   :  { %v760_v14 = vadd.f32 %v759_v9, %v758_v60  ;;  %v1307_v16 = vpop.f32.mrb[41].mxu0  ;;  %v1393_v34 = vpop.f32.mrb[49].mxu1 }
 0x147   :  { %v761_v18 = vsel %vm412_vm1, %v1810_v10, 0.0  ;;  %v1308_v19 = vadd.f32 %v1307_v16, %v1306_v12  ;;  %v1309_v22 = vpop.f32.mrb[42].mxu0  ;;  %v721_v38 = vpop.f32.mrb[50].mxu1 }
 0x148   :  { %v762_v23 = vadd.f32 %v761_v18, %v760_v14  ;;  %v1310_v24 = vpop.f32.mrb[43].mxu0  ;;  %v1394_v42 = vpop.f32.mrb[51].mxu1 }
 0x149   :  { %v567_v25 = vadd.f32 %v1308_v19, %v1712_v4  ;;  %v1311_v29 = vadd.f32 %v1310_v24, %v1309_v22 }
 0x14b   :  { %v703_v31 = vadd.f32 %v702_v45, %v567_v25  ;;  %v570_v32 = vadd.f32 %v1311_v29, %v1712_v4 }
 0x14d   :  { %v763_v35 = vsel %vm412_vm1, %v703_v31, 0.0  ;;  %v706_v36 = vadd.f32 %v705_v53, %v570_v32  ;;  %v1312_v37 = vpop.f32.mrb[44].mxu0 }
 0x14e   :  { %v764_v39 = vadd.f32 %v763_v35, %v762_v23  ;;  %v1313_v40 = vpop.f32.mrb[45].mxu0 }
 0x14f   :  { %v765_v44 = vsel %vm412_vm1, %v706_v36, 0.0  ;;  %v1314_v48 = vadd.f32 %v1313_v40, %v1312_v37  ;;  %v1315_v49 = vpop.f32.mrb[46].mxu0 }
 0x150   :  { %v766_v52 = vadd.f32 %v765_v44, %v764_v39  ;;  %v1316_v54 = vpop.f32.mrb[47].mxu0 }
 0x151   :  { %v575_v45 = vadd.f32 %v1314_v48, %v1712_v4  ;;  %v1317_v55 = vadd.f32 %v1316_v54, %v1315_v49 }
 0x153   :  { %v711_v56 = vadd.f32 %v710_v7, %v575_v45  ;;  %v578_v57 = vadd.f32 %v1317_v55, %v1712_v4 }
 0x155   :  { %v767_v58 = vsel %vm412_vm1, %v711_v56, 0.0  ;;  %v714_v53 = vadd.f32 %v713_v13, %v578_v57  ;;  %v1318_v59 = vpop.f32.mrb[48].mxu0 }
 0x156   :  { %v768_v60 = vadd.f32 %v767_v58, %v766_v52  ;;  %v1319_v62 = vpop.f32.mrb[49].mxu0 }
 0x157   :  { %v769_v63 = vsel %vm412_vm1, %v714_v53, 0.0  ;;  %v1320_v1 = vadd.f32 %v1319_v62, %v1318_v59  ;;  %v1321_v5 = vpop.f32.mrb[50].mxu0 }
 0x158   :  { %v770_v8 = vadd.f32 %v769_v63, %v768_v60  ;;  %v1322_v9 = vpop.f32.mrb[51].mxu0 }
 0x159   :  { %v583_v12 = vadd.f32 %v1320_v1, %v1712_v4 }
 0x15b   :  { %v719_v14 = vadd.f32 %v718_v30, %v583_v12 }
 0x15d   :  { %v771_v16 = vsel %vm412_vm1, %v719_v14, 0.0 }
 0x15e   :  { %v772_v7 = vadd.f32 %v771_v16, %v770_v8 }
 0x160   :  { %v773_v17 = vrot.slane %v772_v7, 4 }
 0x162   :  { %v774_v18 = vadd.f32 %v773_v17, %v772_v7 }
 0x164   :  { %v775_v19 = vrot.slane %v774_v18, 2 }
 0x166   :  { %v776_v22 = vadd.f32 %v775_v19, %v774_v18 }
 0x168   :  { %v777_v13 = vrot.slane %v776_v22, 1 }
 0x16a   :  { %v778_v23 = vadd.f32 %v777_v13, %v776_v22 }
 0x16c   :  { %v780_v24 = vmul.f32 0.005, %v778_v23 }
 0x16e   :  { %v1825_v25 = vsub.f32 %v1715_v11, %v780_v24  ;;  %v1828_v29 = vsub.f32 %v1718_v15, %v780_v24  ;;  %v1831_v32 = vsub.f32 %v1725_v28, %v780_v24  ;;  %v1834_v4 = vsub.f32 %v1730_v33, %v780_v24 }
 0x16f   :  { %v1837_v30 = vsub.f32 %v1735_v46, %v780_v24  ;;  %v1840_v34 = vsub.f32 %v1740_v51, %v780_v24  ;;  %v1843_v35 = vsub.f32 %v1745_v0, %v780_v24  ;;  %v1846_v11 = vsub.f32 %v1750_v6, %v780_v24 }
 0x170   :  { %v1849_v15 = vsub.f32 %v1755_v21, %v780_v24  ;;  %v1852_v28 = vsub.f32 %v1760_v26, %v780_v24  ;;  %v1855_v33 = vsub.f32 %v1765_v41, %v780_v24  ;;  %v1858_v46 = vsub.f32 %v1770_v47, %v780_v24 }
 0x171   :  { %v1861_v51 = vsub.f32 %v1775_v61, %v780_v24  ;;  %v1864_v0 = vsub.f32 %v1780_v3, %v780_v24  ;;  %v1867_v6 = vsub.f32 %v1785_v20, %v780_v24  ;;  %v1870_v21 = vsub.f32 %v1790_v27, %v780_v24 }
 0x172   :  { %v1873_v26 = vsub.f32 %v1795_v43, %v780_v24  ;;  %v1876_v41 = vsub.f32 %v1800_v50, %v780_v24  ;;  %v1879_v47 = vsub.f32 %v1805_v2, %v780_v24  ;;  %v1882_v61 = vsub.f32 %v1810_v10, %v780_v24 }
 0x173   :  { %v1884_v3 = vsub.f32 %v703_v31, %v780_v24  ;;  %v1886_v37 = vsub.f32 %v706_v36, %v780_v24  ;;  %v1888_v20 = vsub.f32 %v711_v56, %v780_v24  ;;  %v1890_v27 = vsub.f32 %v714_v53, %v780_v24 }
 0x174   :  { %v1892_v38 = vsub.f32 %v719_v14, %v780_v24  ;;  %v806_v43 = vmul.f32 %v1825_v25, %v1825_v25  ;;  %v807_v50 = vmul.f32 %v1828_v29, %v1828_v29  ;;  %v808_v2 = vmul.f32 %v1831_v32, %v1831_v32 }
 0x175   :  { %v809_v10 = vmul.f32 %v1834_v4, %v1834_v4  ;;  %v810_v40 = vmul.f32 %v1837_v30, %v1837_v30  ;;  %v811_v48 = vmul.f32 %v1840_v34, %v1840_v34  ;;  %v812_v54 = vmul.f32 %v1843_v35, %v1843_v35 }
 0x176   :  { %v831_v31 = vsel %vm412_vm1, %v806_v43, 0.0  ;;  %v832_v36 = vsel %vm412_vm1, %v807_v50, 0.0  ;;  %v834_v42 = vsel %vm412_vm1, %v808_v2, 0.0  ;;  %v813_v56 = vmul.f32 %v1846_v11, %v1846_v11 }
 0x177   :  { %v833_v39 = vadd.f32 %v832_v36, %v831_v31  ;;  %v836_v49 = vsel %vm412_vm1, %v809_v10, 0.0  ;;  %v838_v45 = vsel %vm412_vm1, %v810_v40, 0.0  ;;  %v840_v57 = vsel %vm412_vm1, %v811_v48, 0.0 }
 0x178   :  { %v814_v53 = vmul.f32 %v1849_v15, %v1849_v15  ;;  %v842_v59 = vsel %vm412_vm1, %v812_v54, 0.0  ;;  %v815_v62 = vmul.f32 %v1852_v28, %v1852_v28  ;;  %v844_v63 = vsel %vm412_vm1, %v813_v56, 0.0 }
 0x179   :  { %v835_v44 = vadd.f32 %v834_v42, %v833_v39  ;;  %v816_v5 = vmul.f32 %v1855_v33, %v1855_v33  ;;  %v817_v12 = vmul.f32 %v1858_v46, %v1858_v46  ;;  %v818_v7 = vmul.f32 %v1861_v51, %v1861_v51 }
 0x17a   :  { %v846_v8 = vsel %vm412_vm1, %v814_v53, 0.0  ;;  %v848_v14 = vsel %vm412_vm1, %v815_v62, 0.0  ;;  %v819_v19 = vmul.f32 %v1864_v0, %v1864_v0  ;;  %v820_v23 = vmul.f32 %v1867_v6, %v1867_v6 }
 0x17b   :  { %v837_v52 = vadd.f32 %v836_v49, %v835_v44  ;;  %v850_v17 = vsel %vm412_vm1, %v816_v5, 0.0  ;;  %v852_v22 = vsel %vm412_vm1, %v817_v12, 0.0  ;;  %v854_v24 = vsel %vm412_vm1, %v818_v7, 0.0 }
 0x17c   :  { %v821_v50 = vmul.f32 %v1870_v21, %v1870_v21  ;;  %v856_v2 = vsel %vm412_vm1, %v819_v19, 0.0  ;;  %v822_v31 = vmul.f32 %v1873_v26, %v1873_v26  ;;  %v858_v36 = vsel %vm412_vm1, %v820_v23, 0.0 }
 0x17d   :  { %v839_v55 = vadd.f32 %v838_v45, %v837_v52  ;;  %v823_v40 = vmul.f32 %v1876_v41, %v1876_v41  ;;  %v824_v48 = vmul.f32 %v1879_v47, %v1879_v47  ;;  %v825_v54 = vmul.f32 %v1882_v61, %v1882_v61 }
 0x17e   :  { %v860_v42 = vsel %vm412_vm1, %v821_v50, 0.0  ;;  %v862_v49 = vsel %vm412_vm1, %v822_v31, 0.0  ;;  %v826_v56 = vmul.f32 %v1884_v3, %v1884_v3  ;;  %v827_v53 = vmul.f32 %v1886_v37, %v1886_v37 }
 0x17f   :  { %v841_v58 = vadd.f32 %v840_v57, %v839_v55  ;;  %v864_v45 = vsel %vm412_vm1, %v823_v40, 0.0  ;;  %v866_v57 = vsel %vm412_vm1, %v824_v48, 0.0  ;;  %v828_v62 = vmul.f32 %v1888_v20, %v1888_v20 }
 0x180   :  { %v829_v5 = vmul.f32 %v1890_v27, %v1890_v27  ;;  %v830_v12 = vmul.f32 %v1892_v38, %v1892_v38  ;;  %v891_v31 = vlaneseq }
 0x181   :  { %v843_v60 = vadd.f32 %v842_v59, %v841_v58  ;;  %v868_v59 = vsel %vm412_vm1, %v825_v54, 0.0 }
 0x182   :  { %v876_v7 = vsel %vm412_vm1, %v829_v5, 0.0 }
 0x183   :  { %v845_v1 = vadd.f32 %v844_v63, %v843_v60  ;;  %v870_v63 = vsel %vm412_vm1, %v826_v56, 0.0 }
 0x185   :  { %v847_v9 = vadd.f32 %v846_v8, %v845_v1  ;;  %v872_v8 = vsel %vm412_vm1, %v827_v53, 0.0 }
 0x187   :  { %v849_v16 = vadd.f32 %v848_v14, %v847_v9  ;;  %v874_v14 = vsel %vm412_vm1, %v828_v62, 0.0 }
 0x189   :  { %v851_v18 = vadd.f32 %v850_v17, %v849_v16 }
 0x18b   :  { %v853_v13 = vadd.f32 %v852_v22, %v851_v18  ;;  %v878_v18 = vsel %vm412_vm1, %v830_v12, 0.0 }
 0x18d   :  { %v855_v43 = vadd.f32 %v854_v24, %v853_v13 }
 0x18f   :  { %v857_v10 = vadd.f32 %v856_v2, %v855_v43 }
 0x191   :  { %v859_v39 = vadd.f32 %v858_v36, %v857_v10  ;;  %v892_v36 = vshrl.u32 %v891_v31, 7 }
 0x193   :  { %v861_v44 = vadd.f32 %v860_v42, %v859_v39  ;;  %v889_v39 = vld [vmem:[%s2115_s3] sm:$0x1]  ;;  %v893_v40 = vsub.s32 0, %v892_v36 }
 0x195   :  { %v863_v52 = vadd.f32 %v862_v49, %v861_v44 }
 0x197   :  { %v865_v55 = vadd.f32 %v864_v45, %v863_v52 }
 0x199   :  { %v867_v58 = vadd.f32 %v866_v57, %v865_v55 }
 0x19b   :  { %v869_v60 = vadd.f32 %v868_v59, %v867_v58 }
 0x19d   :  { %v871_v1 = vadd.f32 %v870_v63, %v869_v60 }
 0x19f   :  { %v873_v9 = vadd.f32 %v872_v8, %v871_v1 }
 0x1a1   :  { %v875_v16 = vadd.f32 %v874_v14, %v873_v9 }
 0x1a3   :  { %v877_v17 = vadd.f32 %v876_v7, %v875_v16 }
 0x1a5   :  { %v879_v19 = vadd.f32 %v878_v18, %v877_v17 }
 0x1a7   :  { %v880_v22 = vrot.slane %v879_v19, 4 }
 0x1a9   :  { %v881_v13 = vadd.f32 %v880_v22, %v879_v19 }
 0x1ab   :  { %v882_v23 = vrot.slane %v881_v13, 2 }
 0x1ad   :  { %v883_v24 = vadd.f32 %v882_v23, %v881_v13 }
 0x1af   :  { %v884_v43 = vrot.slane %v883_v24, 1 }
 0x1b1   :  { %v885_v50 = vadd.f32 %v884_v43, %v883_v24 }
 0x1b3   :  { %v886_v2 = vmul.f32 0.005, %v885_v50 }
 0x1b5   :  { %v887_v10 = vadd.f32 1e-05, %v886_v2 }
 0x1b7   :  { %1466 = vrsqrt.f32 %v887_v10 }
 0x1c1   :  { %v1467_v42 = vpop.eup %1466 }
 0x1c2   :  { %v890_v44 = vmul.f32 %v1467_v42, %v889_v39 }
 0x1c4   :  { %v894_v48 = vrot.slane %v890_v44, %v893_v40 }
 0x1c6   :  { %v895_v49 = vmul.f32 %v894_v48, %v1825_v25  ;;  %v896_v52 = vmul.f32 %v894_v48, %v1828_v29  ;;  %v897_v54 = vmul.f32 %v894_v48, %v1831_v32  ;;  %v898_v45 = vmul.f32 %v894_v48, %v1834_v4 }
 0x1c7   :  { %v899_v55 = vmul.f32 %v894_v48, %v1837_v30  ;;  %v900_v56 = vmul.f32 %v894_v48, %v1840_v34  ;;  %v901_v57 = vmul.f32 %v894_v48, %v1843_v35  ;;  %v902_v58 = vmul.f32 %v894_v48, %v1846_v11  ;;  %v1179_v35 = vld [vmem:[%s2116_s4] ss:$0 sm:$0xff] }
 0x1c8   :  { %v903_v53 = vmul.f32 %v894_v48, %v1849_v15  ;;  %v904_v59 = vmul.f32 %v894_v48, %v1852_v28  ;;  %v905_v25 = vmul.f32 %v894_v48, %v1855_v33  ;;  %v906_v29 = vmul.f32 %v894_v48, %v1858_v46 }
 0x1c9   :  { %v907_v32 = vmul.f32 %v894_v48, %v1861_v51  ;;  %v908_v4 = vmul.f32 %v894_v48, %v1864_v0  ;;  %v909_v30 = vmul.f32 %v894_v48, %v1867_v6  ;;  %v910_v34 = vmul.f32 %v894_v48, %v1870_v21 }
 0x1ca   :  { %v911_v11 = vmul.f32 %v894_v48, %v1873_v26  ;;  %v912_v15 = vmul.f32 %v894_v48, %v1876_v41  ;;  %v913_v28 = vmul.f32 %v894_v48, %v1879_v47  ;;  %v914_v33 = vmul.f32 %v894_v48, %v1882_v61 }
 0x1cb   :  { %v915_v46 = vmul.f32 %v894_v48, %v1884_v3  ;;  %v916_v51 = vmul.f32 %v894_v48, %v1886_v37  ;;  %v917_v0 = vmul.f32 %v894_v48, %v1888_v20  ;;  %v918_v6 = vmul.f32 %v894_v48, %v1890_v27 }
 0x1cc   :  { %v919_v21 = vmul.f32 %v894_v48, %v1892_v38  ;;  %v927_v60 = vadd.f32 %v1179_v35, %v895_v49  ;;  %v928_v62 = vadd.f32 %v1179_v35, %v896_v52  ;;  %v929_v63 = vadd.f32 %v1179_v35, %v897_v54 }
 0x1cd   :  { %v930_v26 = vadd.f32 %v1179_v35, %v898_v45  ;;  %v931_v1 = vadd.f32 %v1179_v35, %v899_v55  ;;  %v932_v41 = vadd.f32 %v1179_v35, %v900_v56  ;;  %v933_v5 = vadd.f32 %v1179_v35, %v901_v57 }
 0x1ce   :  { %v934_v47 = vadd.f32 %v1179_v35, %v902_v58  ;;  %v935_v8 = vadd.f32 %v1179_v35, %v903_v53  ;;  %v936_v61 = vadd.f32 %v1179_v35, %v904_v59  ;;  %v937_v9 = vadd.f32 %v1179_v35, %v905_v25 }
 0x1cf   :  { %v938_v3 = vadd.f32 %v1179_v35, %v906_v29  ;;  %v939_v12 = vadd.f32 %v1179_v35, %v907_v32  ;;  %v940_v37 = vadd.f32 %v1179_v35, %v908_v4  ;;  %v941_v14 = vadd.f32 %v1179_v35, %v909_v30 }
 0x1d0   :  { %v942_v20 = vadd.f32 %v1179_v35, %v910_v34  ;;  %v943_v27 = vadd.f32 %v1179_v35, %v911_v11  ;;  %v944_v16 = vadd.f32 %v1179_v35, %v912_v15  ;;  %v945_v38 = vadd.f32 %v1179_v35, %v913_v28 }
 0x1d1   :  { %v946_v7 = vadd.f32 %v1179_v35, %v914_v33  ;;  %v947_v17 = vadd.f32 %v1179_v35, %v915_v46  ;;  %v2000_v18 = vadd.f32 %v1179_v35, %v916_v51  ;;  %v2002_v19 = vadd.f32 %v1179_v35, %v917_v0 }
 0x1d2   :  { %v2004_v22 = vadd.f32 %v1179_v35, %v918_v6  ;;  %v2006_v13 = vadd.f32 %v1179_v35, %v919_v21  ;;  %v952_v23 = vmax.f32 %v927_v60, 0.0  ;;  %v953_v24 = vmax.f32 %v928_v62, 0.0 }
 0x1d3   :  { %v954_v43 = vmax.f32 %v929_v63, 0.0  ;;  %v955_v50 = vmax.f32 %v930_v26, 0.0  ;;  %v956_v2 = vmax.f32 %v931_v1, 0.0  ;;  %v957_v10 = vmax.f32 %v932_v41, 0.0 }
 0x1d4   :  { %v958_v31 = vmax.f32 %v933_v5, 0.0  ;;  %v959_v36 = vmax.f32 %v934_v47, 0.0  ;;  %v960_v39 = vmax.f32 %v935_v8, 0.0  ;;  %v961_v40 = vmax.f32 %v936_v61, 0.0 }
 0x1d5   :  { %v962_v42 = vmax.f32 %v937_v9, 0.0  ;;  %v963_v44 = vmax.f32 %v938_v3, 0.0  ;;  %v964_v48 = vmax.f32 %v939_v12, 0.0  ;;  %v965_v49 = vmax.f32 %v940_v37, 0.0 }
 0x1d6   :  { %v966_v52 = vmax.f32 %v941_v14, 0.0  ;;  %v967_v54 = vmax.f32 %v942_v20, 0.0  ;;  %v968_v45 = vmax.f32 %v943_v27, 0.0  ;;  %v969_v55 = vmax.f32 %v944_v16, 0.0 }
 0x1d7   :  { %v970_v56 = vmax.f32 %v945_v38, 0.0  ;;  %v971_v57 = vmax.f32 %v946_v7, 0.0  ;;  %v972_v58 = vmax.f32 %v947_v17, 0.0  ;;  %v973_v53 = vmax.f32 %v2000_v18, 0.0 }
 0x1d8   :  { %v974_v59 = vmax.f32 %v2002_v19, 0.0  ;;  %v975_v25 = vmax.f32 %v2004_v22, 0.0  ;;  %v976_v29 = vmax.f32 %v2006_v13, 0.0  ;;  %v1205_v32 = vpack.c.bf16 %v952_v23, %v952_v23 }
 0x1d9   :  { %v1206_v4 = vpack.c.bf16 %v953_v24, %v953_v24  ;;  %v1207_v30 = vpack.c.bf16 %v954_v43, %v954_v43  ;;  %v1208_v34 = vpack.c.bf16 %v955_v50, %v955_v50  ;;  %v1209_v35 = vpack.c.bf16 %v956_v2, %v956_v2 }
 0x1da   :  { %v1210_v11 = vpack.c.bf16 %v957_v10, %v957_v10  ;;  %v1211_v15 = vpack.c.bf16 %v958_v31, %v958_v31  ;;  %v1212_v28 = vpack.c.bf16 %v959_v36, %v959_v36  ;;  %v1213_v33 = vpack.c.bf16 %v960_v39, %v960_v39  ;;  %1079 = vst.msk [vmem:[%s2117_s5] sm:$0xf] %vm1078_vm2, %v1205_v32 }
 0x1db   :  { %v1214_v46 = vpack.c.bf16 %v961_v40, %v961_v40  ;;  %v1215_v51 = vpack.c.bf16 %v962_v42, %v962_v42  ;;  %v1216_v0 = vpack.c.bf16 %v963_v44, %v963_v44  ;;  %v1217_v6 = vpack.c.bf16 %v964_v48, %v964_v48  ;;  %1080 = vst.msk [vmem:[%s2117_s5 + $0x4] sm:$0xf] %vm1078_vm2, %v1206_v4 }
 0x1dc   :  { %1081 = vst.msk [vmem:[%s2117_s5 + $0x8] sm:$0xf] %vm1078_vm2, %v1207_v30  ;;  %1082 = vst.msk [vmem:[%s2117_s5 + $0xc] sm:$0xf] %vm1078_vm2, %v1208_v34  ;;  %v1218_v21 = vpack.c.bf16 %v965_v49, %v965_v49  ;;  %v1219_v60 = vpack.c.bf16 %v966_v52, %v966_v52  ;;  %v1220_v62 = vpack.c.bf16 %v967_v54, %v967_v54 }
 0x1dd   :  { %1083 = vst.msk [vmem:[%s2117_s5 + $0x10] sm:$0xf] %vm1078_vm2, %v1209_v35  ;;  %v1221_v63 = vpack.c.bf16 %v968_v45, %v968_v45  ;;  %1084 = vst.msk [vmem:[%s2117_s5 + $0x14] sm:$0xf] %vm1078_vm2, %v1210_v11  ;;  %v1222_v26 = vpack.c.bf16 %v969_v55, %v969_v55  ;;  %v1223_v1 = vpack.c.bf16 %v970_v56, %v970_v56 }
 0x1de   :  { %1085 = vst.msk [vmem:[%s2117_s5 + $0x18] sm:$0xf] %vm1078_vm2, %v1211_v15  ;;  %1086 = vst.msk [vmem:[%s2117_s5 + $0x1c] sm:$0xf] %vm1078_vm2, %v1212_v28  ;;  %v1224_v41 = vpack.c.bf16 %v971_v57, %v971_v57  ;;  %v1225_v5 = vpack.c.bf16 %v972_v58, %v972_v58  ;;  %v1226_v47 = vpack.c.bf16 %v973_v53, %v973_v53 }
 0x1df   :  { %1087 = vst.msk [vmem:[%s2117_s5 + $0x20] sm:$0xf] %vm1078_vm2, %v1213_v33  ;;  %1088 = vst.msk [vmem:[%s2117_s5 + $0x24] sm:$0xf] %vm1078_vm2, %v1214_v46  ;;  %v1227_v8 = vpack.c.bf16 %v974_v59, %v974_v59  ;;  %v1228_v61 = vpack.c.bf16 %v975_v25, %v975_v25  ;;  %v1229_v9 = vpack.c.bf16 %v976_v29, %v976_v29 }
 0x1e0   :  { %1089 = vst.msk [vmem:[%s2117_s5 + $0x28] sm:$0xf] %vm1078_vm2, %v1215_v51  ;;  %1090 = vst.msk [vmem:[%s2117_s5 + $0x2c] sm:$0xf] %vm1078_vm2, %v1216_v0 }
 0x1e1   :  { %1091 = vst.msk [vmem:[%s2117_s5 + $0x30] sm:$0xf] %vm1078_vm2, %v1217_v6  ;;  %1092 = vst.msk [vmem:[%s2117_s5 + $0x34] sm:$0xf] %vm1078_vm2, %v1218_v21 }
 0x1e2   :  { %1093 = vst.msk [vmem:[%s2117_s5 + $0x38] sm:$0xf] %vm1078_vm2, %v1219_v60  ;;  %1094 = vst.msk [vmem:[%s2117_s5 + $0x3c] sm:$0xf] %vm1078_vm2, %v1220_v62 }
 0x1e3   :  { %1095 = vst.msk [vmem:[%s2117_s5 + $0x40] sm:$0xf] %vm1078_vm2, %v1221_v63  ;;  %1096 = vst.msk [vmem:[%s2117_s5 + $0x44] sm:$0xf] %vm1078_vm2, %v1222_v26 }
 0x1e4   :  { %1097 = vst.msk [vmem:[%s2117_s5 + $0x48] sm:$0xf] %vm1078_vm2, %v1223_v1  ;;  %1098 = vst.msk [vmem:[%s2117_s5 + $0x4c] sm:$0xf] %vm1078_vm2, %v1224_v41 }
 0x1e5   :  { %1099 = vst.msk [vmem:[%s2117_s5 + $0x50] sm:$0xf] %vm1078_vm2, %v1225_v5  ;;  %1100 = vst.msk [vmem:[%s2117_s5 + $0x54] sm:$0xf] %vm1078_vm2, %v1226_v47 }
 0x1e6   :  { %1101 = vst.msk [vmem:[%s2117_s5 + $0x58] sm:$0xf] %vm1078_vm2, %v1227_v8  ;;  %1102 = vst.msk [vmem:[%s2117_s5 + $0x5c] sm:$0xf] %vm1078_vm2, %v1228_v61 }
 0x1e7   :  { %1103 = vst.msk [vmem:[%s2117_s5 + $0x60] sm:$0xf] %vm1078_vm2, %v1229_v9 }

// kernel: dqn_forward.7
= control target key start
LH: loop header
LB: loop body
LE: loop exit
PB: predicated region body
PF: predicated region fallthrough
CT: control target
= control target key end

     0   :  { %v435_v27 = vlaneseq  ;;  %v3083_v35 = vmov 1966171168   ;;  %s3770_s0 = inlined_call_operand.vmem [shape: bf16[2,3200], index: 0, kind: input, shape index: {}]   ;;  %s3771_s1 = inlined_call_operand.vmem [shape: bf16[3200,5], index: 1, kind: input, shape index: {}]   ;;  %s3772_s2 = inlined_call_operand.vmem [shape: f32[1,5], index: 2, kind: input, shape index: {}]   ;;  %s3773_s3 = inlined_call_operand.hbm [shape: f32[2,5], index: 3, kind: output, shape index: {}]  }
   0x1   :  { %v2854_v0 = vld [vmem:[%s3771_s1 + $0x40] sm:$0xff]   ;;  %v2858_v4 = vld [vmem:[%s3771_s1 + $0x48] sm:$0xff]   ;;  %v2862_v8 = vld [vmem:[%s3771_s1 + $0x50] sm:$0xff]   ;;  %v433_v36 = vunpack.c.l.s4 %v3083_v35 }
   0x2   :  { %v2855_v1 = vld [vmem:[%s3771_s1] sm:$0xff]   ;;  %2557 = vmatprep.subr.bf16.mxu0 %v2854_v0  ;;  %v2859_v5 = vld [vmem:[%s3771_s1 + $0x8] sm:$0xff]   ;;  %v2863_v9 = vld [vmem:[%s3771_s1 + $0x10] sm:$0xff]   ;;  %v436_v32 = vshrl.u32 %v435_v27, 7 }
   0x3   :  { %v2856_v2 = vld [vmem:[%s3771_s1 + $0xc0] sm:$0xff]   ;;  %2558 = vmatpush3.bf16.msra.mxu0 %v2855_v1  ;;  %v2860_v6 = vld [vmem:[%s3771_s1 + $0xc8] sm:$0xff]   ;;  %v2864_v10 = vld [vmem:[%s3771_s1 + $0xd0] sm:$0xff]   ;;  %v434_v39 = vunpack.c.0.s8 %v433_v36 }
   0x4   :  { %v2857_v3 = vld [vmem:[%s3771_s1 + $0x80] sm:$0xff]   ;;  %2579 = vmatprep.subr.bf16.mxu1 %v2856_v2  ;;  %2559 = vmatprep.subr.bf16.mxu0 %v2858_v4  ;;  %v2861_v7 = vld [vmem:[%s3771_s1 + $0x88] sm:$0xff]   ;;  %v2865_v11 = vld [vmem:[%s3771_s1 + $0x90] sm:$0xff]  }
   0x5   :  { %2580 = vmatpush3.bf16.msra.mxu1 %v2857_v3  ;;  %v2866_v12 = vld [vmem:[%s3771_s1 + $0x58] sm:$0xff]   ;;  %v2870_v16 = vld [vmem:[%s3771_s1 + $0x60] sm:$0xff]   ;;  %v2874_v20 = vld [vmem:[%s3771_s1 + $0x68] sm:$0xff]   ;;  %v3212_v41 = vsub.s32 %v434_v39, %v436_v32 }
   0x6   :  { %2581 = vmatprep.subr.bf16.mxu1 %v2860_v6  ;;  %v2867_v13 = vld [vmem:[%s3771_s1 + $0x18] sm:$0xff]   ;;  %v2871_v17 = vld [vmem:[%s3771_s1 + $0x20] sm:$0xff]   ;;  %v2875_v21 = vld [vmem:[%s3771_s1 + $0x28] sm:$0xff]  }
   0x7   :  { %2560 = vmatpush3.bf16.msra.mxu0 %v2859_v5  ;;  %v2868_v14 = vld [vmem:[%s3771_s1 + $0xd8] sm:$0xff]   ;;  %v2872_v18 = vld [vmem:[%s3771_s1 + $0xe0] sm:$0xff]   ;;  %v2876_v22 = vld [vmem:[%s3771_s1 + $0xe8] sm:$0xff]  }
   0x8   :  { %2561 = vmatprep.subr.bf16.mxu0 %v2862_v8  ;;  %v2869_v15 = vld [vmem:[%s3771_s1 + $0x98] sm:$0xff]   ;;  %v2873_v19 = vld [vmem:[%s3771_s1 + $0xa0] sm:$0xff]   ;;  %v2877_v23 = vld [vmem:[%s3771_s1 + $0xa8] sm:$0xff]  }
   0x9   :  { %2582 = vmatpush3.bf16.msra.mxu1 %v2861_v7  ;;  %v2878_v24 = vld [vmem:[%s3771_s1 + $0x70] sm:$0xff]   ;;  %v2882_v29 = vld [vmem:[%s3771_s1 + $0x78] sm:$0xff]   ;;  %v16_v33 = vld [vmem:[%s3770_s0] sm:$0xff] }
   0xa   :  { %2583 = vmatprep.subr.bf16.mxu1 %v2864_v10  ;;  %v2879_v25 = vld [vmem:[%s3771_s1 + $0x30] sm:$0xff]   ;;  %v2883_v30 = vld [vmem:[%s3771_s1 + $0x38] sm:$0xff]   ;;  %v2887_v37 = vld [vmem:[%s3771_s1 + $0x140] sm:$0xff]   ;;  %v431_v38 = vcombine.high %v16_v33, %v16_v33  ;;  %v438_v42 = vrot.slane %v16_v33, %v3212_v41 }
   0xb   :  { %2562 = vmatpush3.bf16.msra.mxu0 %v2863_v9  ;;  %v2880_v26 = vld [vmem:[%s3771_s1 + $0xf0] sm:$0xff]   ;;  %v2884_v31 = vld [vmem:[%s3771_s1 + $0xf8] sm:$0xff]   ;;  %v2889_v40 = vld [vmem:[%s3771_s1 + $0x1c0] sm:$0xff]  }
   0xc   :  { %2563 = vmatprep.subr.bf16.mxu0 %v2866_v12  ;;  %v2881_v28 = vld [vmem:[%s3771_s1 + $0xb0] sm:$0xff]   ;;  %v2886_v34 = vld [vmem:[%s3771_s1 + $0xb8] sm:$0xff]   ;;  %v3216_v43 = vrot.slane %v431_v38, %v3212_v41  ;;  %v446_v44 = vcombine.high %v438_v42, %v438_v42  ;;  %v454_v45 = vrot.slane %v438_v42, %v3212_v41  ;;  %v2888_v48 = vld [vmem:[%s3771_s1 + $0x100] sm:$0xff]  }
   0xd   :  { %2584 = vmatpush3.bf16.msra.mxu1 %v2865_v11  ;;  %v2891_v51 = vld [vmem:[%s3771_s1 + $0x148] sm:$0xff]   ;;  %v2890_v53 = vld [vmem:[%s3771_s1 + $0x180] sm:$0xff]   ;;  %v2895_v57 = vld [vmem:[%s3771_s1 + $0x150] sm:$0xff]  }
   0xe   :  { %2585 = vmatprep.subr.bf16.mxu1 %v2868_v14  ;;  %v447_v46 = vcombine.high %v3216_v43, %v3216_v43  ;;  %v468_v47 = vrot.slane %v446_v44, %v3212_v41  ;;  %v476_v50 = vcombine.high %v454_v45, %v454_v45  ;;  %v2893_v54 = vld [vmem:[%s3771_s1 + $0x1c8] sm:$0xff]   ;;  %v2897_v59 = vld [vmem:[%s3771_s1 + $0x1d0] sm:$0xff]   ;;  %v2899_v61 = vld [vmem:[%s3771_s1 + $0x158] sm:$0xff]  }
   0xf   :  { %2564 = vmatpush3.bf16.msra.mxu0 %v2867_v13  ;;  %v2892_v56 = vld [vmem:[%s3771_s1 + $0x108] sm:$0xff]   ;;  %v2896_v60 = vld [vmem:[%s3771_s1 + $0x110] sm:$0xff]   ;;  %v2901_v63 = vld [vmem:[%s3771_s1 + $0x1d8] sm:$0xff]  }
  0x10   :  { %2565 = vmatprep.subr.bf16.mxu0 %v2870_v16  ;;  %v475_v49 = vrot.slane %v447_v46, %v3212_v41  ;;  %1849 = vmatprep.mubr.bf16.mxu0 %v468_v47  ;;  %v478_v52 = vcombine.high %v468_v47, %v468_v47  ;;  %v2894_v58 = vld [vmem:[%s3771_s1 + $0x188] sm:$0xff]   ;;  %v2898_v62 = vld [vmem:[%s3771_s1 + $0x190] sm:$0xff]   ;;  %v2900_v0 = vld [vmem:[%s3771_s1 + $0x118] sm:$0xff]  }
  0x11   :  { %2586 = vmatpush3.bf16.msra.mxu1 %v2869_v15  ;;  %v2903_v1 = vld [vmem:[%s3771_s1 + $0x160] sm:$0xff]   ;;  %v2902_v2 = vld [vmem:[%s3771_s1 + $0x198] sm:$0xff]   ;;  %v2907_v5 = vld [vmem:[%s3771_s1 + $0x168] sm:$0xff]  }
  0x12   :  { %2587 = vmatprep.subr.bf16.mxu1 %v2872_v18  ;;  %v479_v55 = vcombine.high %v475_v49, %v475_v49  ;;  %1889 = vmatprep.mubr.bf16.mxu1 %v478_v52  ;;  %v2905_v3 = vld [vmem:[%s3771_s1 + $0x1e0] sm:$0xff]   ;;  %v2909_v7 = vld [vmem:[%s3771_s1 + $0x1e8] sm:$0xff]   ;;  %v2911_v9 = vld [vmem:[%s3771_s1 + $0x170] sm:$0xff]  }
  0x13   :  { %2566 = vmatpush3.bf16.msra.mxu0 %v2871_v17  ;;  %v2904_v4 = vld [vmem:[%s3771_s1 + $0x120] sm:$0xff]   ;;  %v2908_v8 = vld [vmem:[%s3771_s1 + $0x128] sm:$0xff]   ;;  %v2913_v11 = vld [vmem:[%s3771_s1 + $0x1f0] sm:$0xff]   ;;  %v461_v17 = vrot.slane %v3216_v43, %v3212_v41 }
  0x14   :  { %2567 = vmatprep.subr.bf16.mxu0 %v2874_v20  ;;  %v2906_v6 = vld [vmem:[%s3771_s1 + $0x1a0] sm:$0xff]   ;;  %v2910_v10 = vld [vmem:[%s3771_s1 + $0x1a8] sm:$0xff]   ;;  %v2912_v12 = vld [vmem:[%s3771_s1 + $0x130] sm:$0xff]  }
  0x15   :  { %2588 = vmatpush3.bf16.msra.mxu1 %v2873_v19  ;;  %v2915_v13 = vld [vmem:[%s3771_s1 + $0x178] sm:$0xff]   ;;  %v2914_v14 = vld [vmem:[%s3771_s1 + $0x1b0] sm:$0xff]   ;;  %v2919_v18 = vld [vmem:[%s3771_s1 + $0x240] sm:$0xff]  }
  0x16   :  { %2589 = vmatprep.subr.bf16.mxu1 %v2876_v22  ;;  %v2917_v15 = vld [vmem:[%s3771_s1 + $0x1f8] sm:$0xff]   ;;  %v2921_v20 = vld [vmem:[%s3771_s1 + $0x2c0] sm:$0xff]   ;;  %v477_v22 = vcombine.high %v461_v17, %v461_v17  ;;  %v2927_v27 = vld [vmem:[%s3771_s1 + $0x250] sm:$0xff]  }
  0x17   :  { %2568 = vmatpush3.bf16.msra.mxu0 %v2875_v21  ;;  %v2916_v16 = vld [vmem:[%s3771_s1 + $0x138] sm:$0xff]   ;;  %v2920_v21 = vld [vmem:[%s3771_s1 + $0x200] sm:$0xff]   ;;  %v2930_v32 = vld [vmem:[%s3771_s1 + $0x290] sm:$0xff]  }
  0x18   :  { %2569 = vmatprep.subr.bf16.mxu0 %v2878_v24  ;;  %v2918_v19 = vld [vmem:[%s3771_s1 + $0x1b8] sm:$0xff]   ;;  %v2922_v24 = vld [vmem:[%s3771_s1 + $0x280] sm:$0xff]   ;;  %v2939_v39 = vld [vmem:[%s3771_s1 + $0x268] sm:$0xff]  }
  0x19   :  { %2590 = vmatpush3.bf16.msra.mxu1 %v2877_v23  ;;  %v2923_v23 = vld [vmem:[%s3771_s1 + $0x248] sm:$0xff]   ;;  %v2933_v33 = vld [vmem:[%s3771_s1 + $0x2d8] sm:$0xff]   ;;  %v2935_v35 = vld [vmem:[%s3771_s1 + $0x260] sm:$0xff]  }
  0x1a   :  { %2591 = vmatprep.subr.bf16.mxu1 %v2880_v26  ;;  %v2924_v26 = vld [vmem:[%s3771_s1 + $0x208] sm:$0xff]   ;;  %v2934_v36 = vld [vmem:[%s3771_s1 + $0x298] sm:$0xff]   ;;  %v2936_v38 = vld [vmem:[%s3771_s1 + $0x220] sm:$0xff]  }
  0x1b   :  { %2570 = vmatpush3.bf16.msra.mxu0 %v2879_v25  ;;  %v2925_v25 = vld [vmem:[%s3771_s1 + $0x2c8] sm:$0xff]   ;;  %v2943_v44 = vld [vmem:[%s3771_s1 + $0x270] sm:$0xff]  }
  0x1c   :  { %2571 = vmatprep.subr.bf16.mxu0 %v2882_v29  ;;  %v2929_v29 = vld [vmem:[%s3771_s1 + $0x2d0] sm:$0xff]   ;;  %v2941_v42 = vld [vmem:[%s3771_s1 + $0x2e8] sm:$0xff]  }
  0x1d   :  { %2592 = vmatpush3.bf16.msra.mxu1 %v2881_v28  ;;  %v2926_v28 = vld [vmem:[%s3771_s1 + $0x288] sm:$0xff]  }
  0x1e   :  { %2593 = vmatprep.subr.bf16.mxu1 %v2884_v31  ;;  %v2931_v31 = vld [vmem:[%s3771_s1 + $0x258] sm:$0xff]   ;;  %v2940_v43 = vld [vmem:[%s3771_s1 + $0x228] sm:$0xff]  }
  0x1f   :  { %2572 = vmatpush3.bf16.msra.mxu0 %v2883_v30  ;;  %v2928_v30 = vld [vmem:[%s3771_s1 + $0x210] sm:$0xff]   ;;  %v2942_v46 = vld [vmem:[%s3771_s1 + $0x2a8] sm:$0xff]  }
  0x20   :  { %2601 = vmatprep.subr.bf16.mxu0 %v2887_v37  ;;  %v2937_v37 = vld [vmem:[%s3771_s1 + $0x2e0] sm:$0xff]  }
  0x21   :  { %2594 = vmatpush3.bf16.msra.mxu1 %v2886_v34  ;;  %v2932_v34 = vld [vmem:[%s3771_s1 + $0x218] sm:$0xff]  }
  0x22   :  { %2623 = vmatprep.subr.bf16.mxu1 %v2889_v40  ;;  %1850 = vmatmul.mubr.bf16.vlgmr.msra.gmra.mrb[0].mxu0 %v454_v45  ;;  %v2938_v40 = vld [vmem:[%s3771_s1 + $0x2a0] sm:$0xff]   ;;  %v17_v45 = vld [vmem:[%s3770_s0 + $0x8] sm:$0xff] }
  0x23   :  { %2602 = vmatpush3.bf16.msra.mxu0 %v2888_v48  ;;  %1929 = vmatprep.mubr.bf16.mxu0 %v475_v49  ;;  %v487_v47 = vrot.slane %v17_v45, %v3212_v41  ;;  %v480_v48 = vcombine.high %v17_v45, %v17_v45  ;;  %v2945_v49 = vld [vmem:[%s3771_s1 + $0x2f0] sm:$0xff]  }
  0x24   :  { %1890 = vmatmul.mubr.bf16.vlgmr.msra.gmra.mrb[0].mxu1 %v476_v50  ;;  %2603 = vmatprep.subr.bf16.mxu0 %v2891_v51  ;;  %v2944_v50 = vld [vmem:[%s3771_s1 + $0x230] sm:$0xff]  }
  0x25   :  { %2624 = vmatpush3.bf16.msra.mxu1 %v2890_v53  ;;  %1969 = vmatprep.mubr.bf16.mxu1 %v479_v55  ;;  %v495_v51 = vcombine.high %v487_v47, %v487_v47  ;;  %v3401_v52 = vrot.slane %v480_v48, %v3212_v41  ;;  %v2947_v53 = vld [vmem:[%s3771_s1 + $0x278] sm:$0xff]   ;;  %v2994_v45 = vld [vmem:[%s3771_s1 + $0x4d0] sm:$0xff]  }
  0x26   :  { %2625 = vmatprep.subr.bf16.mxu1 %v2893_v54  ;;  %v2946_v54 = vld [vmem:[%s3771_s1 + $0x2b0] sm:$0xff]  }
  0x27   :  { %2604 = vmatpush3.bf16.msra.mxu0 %v2892_v56  ;;  %v517_v55 = vrot.slane %v495_v51, %v3212_v41  ;;  %v496_v56 = vcombine.high %v3401_v52, %v3401_v52  ;;  %v2995_v48 = vld [vmem:[%s3771_s1 + $0x490] sm:$0xff]   ;;  %v3000_v51 = vld [vmem:[%s3771_s1 + $0x460] sm:$0xff]  }
  0x28   :  { %2605 = vmatprep.subr.bf16.mxu0 %v2895_v57  ;;  %v2949_v57 = vld [vmem:[%s3771_s1 + $0x2f8] sm:$0xff]  }
  0x29   :  { %2626 = vmatpush3.bf16.msra.mxu1 %v2894_v58  ;;  %v2948_v58 = vld [vmem:[%s3771_s1 + $0x238] sm:$0xff]  }
  0x2a   :  { %2627 = vmatprep.subr.bf16.mxu1 %v2897_v59  ;;  %v527_v59 = vcombine.high %v517_v55, %v517_v55 }
  0x2b   :  { %2606 = vmatpush3.bf16.msra.mxu0 %v2896_v60  ;;  %v503_v60 = vrot.slane %v487_v47, %v3212_v41  ;;  %v2996_v47 = vld [vmem:[%s3771_s1 + $0x458] sm:$0xff]  }
  0x2c   :  { %2607 = vmatprep.subr.bf16.mxu0 %v2899_v61  ;;  %v2951_v61 = vld [vmem:[%s3771_s1 + $0x340] sm:$0xff]  }
  0x2d   :  { %2628 = vmatpush3.bf16.msra.mxu1 %v2898_v62  ;;  %v2950_v62 = vld [vmem:[%s3771_s1 + $0x2b8] sm:$0xff]  }
  0x2e   :  { %2629 = vmatprep.subr.bf16.mxu1 %v2901_v63  ;;  %v524_v63 = vrot.slane %v496_v56, %v3212_v41  ;;  %v3003_v56 = vld [vmem:[%s3771_s1 + $0x4a0] sm:$0xff]  }
  0x2f   :  { %2608 = vmatpush3.bf16.msra.mxu0 %v2900_v0  ;;  %v2953_v0 = vld [vmem:[%s3771_s1 + $0x3c0] sm:$0xff]  }
  0x30   :  { %2609 = vmatprep.subr.bf16.mxu0 %v2903_v1  ;;  %v2952_v1 = vld [vmem:[%s3771_s1 + $0x300] sm:$0xff]  }
  0x31   :  { %2630 = vmatpush3.bf16.msra.mxu1 %v2902_v2  ;;  %v525_v2 = vcombine.high %v503_v60, %v503_v60 }
  0x32   :  { %2631 = vmatprep.subr.bf16.mxu1 %v2905_v3  ;;  %v2955_v3 = vld [vmem:[%s3771_s1 + $0x348] sm:$0xff]  }
  0x33   :  { %2610 = vmatpush3.bf16.msra.mxu0 %v2904_v4  ;;  %v2954_v4 = vld [vmem:[%s3771_s1 + $0x380] sm:$0xff]  }
  0x34   :  { %2611 = vmatprep.subr.bf16.mxu0 %v2907_v5  ;;  %v528_v5 = vcombine.high %v524_v63, %v524_v63 }
  0x35   :  { %2632 = vmatpush3.bf16.msra.mxu1 %v2906_v6  ;;  %v2957_v6 = vld [vmem:[%s3771_s1 + $0x3c8] sm:$0xff]  }
  0x36   :  { %2633 = vmatprep.subr.bf16.mxu1 %v2909_v7  ;;  %v2956_v7 = vld [vmem:[%s3771_s1 + $0x308] sm:$0xff]  }
  0x37   :  { %2612 = vmatpush3.bf16.msra.mxu0 %v2908_v8  ;;  %v2959_v8 = vld [vmem:[%s3771_s1 + $0x350] sm:$0xff]  }
  0x38   :  { %2613 = vmatprep.subr.bf16.mxu0 %v2911_v9  ;;  %v2958_v9 = vld [vmem:[%s3771_s1 + $0x388] sm:$0xff]  }
  0x39   :  { %2634 = vmatpush3.bf16.msra.mxu1 %v2910_v10  ;;  %v2961_v10 = vld [vmem:[%s3771_s1 + $0x3d0] sm:$0xff]  }
  0x3a   :  { %2635 = vmatprep.subr.bf16.mxu1 %v2913_v11  ;;  %v2960_v11 = vld [vmem:[%s3771_s1 + $0x310] sm:$0xff]  }
  0x3b   :  { %2614 = vmatpush3.bf16.msra.mxu0 %v2912_v12  ;;  %v2963_v12 = vld [vmem:[%s3771_s1 + $0x358] sm:$0xff]  }
  0x3c   :  { %2615 = vmatprep.subr.bf16.mxu0 %v2915_v13  ;;  %v2962_v13 = vld [vmem:[%s3771_s1 + $0x390] sm:$0xff]  }
  0x3d   :  { %2636 = vmatpush3.bf16.msra.mxu1 %v2914_v14  ;;  %v2965_v14 = vld [vmem:[%s3771_s1 + $0x3d8] sm:$0xff]  }
  0x3e   :  { %2637 = vmatprep.subr.bf16.mxu1 %v2917_v15  ;;  %v2964_v15 = vld [vmem:[%s3771_s1 + $0x318] sm:$0xff]  }
  0x3f   :  { %2616 = vmatpush3.bf16.msra.mxu0 %v2916_v16  ;;  %v2967_v16 = vld [vmem:[%s3771_s1 + $0x360] sm:$0xff]  }
  0x40   :  { %2645 = vmatprep.subr.bf16.mxu0 %v2919_v18  ;;  %v2969_v18 = vld [vmem:[%s3771_s1 + $0x3e0] sm:$0xff]  }
  0x41   :  { %2638 = vmatpush3.bf16.msra.mxu1 %v2918_v19  ;;  %v2968_v19 = vld [vmem:[%s3771_s1 + $0x320] sm:$0xff]  }
  0x42   :  { %1930 = vmatmul.mubr.bf16.vlgmr.msra.gmra.mrb[4].mxu0 %v461_v17  ;;  %2667 = vmatprep.subr.bf16.mxu1 %v2921_v20  ;;  %v2966_v17 = vld [vmem:[%s3771_s1 + $0x398] sm:$0xff]   ;;  %v2971_v20 = vld [vmem:[%s3771_s1 + $0x368] sm:$0xff]  }
  0x43   :  { %2646 = vmatpush3.bf16.msra.mxu0 %v2920_v21  ;;  %2009 = vmatprep.mubr.bf16.mxu0 %v517_v55  ;;  %v2970_v21 = vld [vmem:[%s3771_s1 + $0x3a0] sm:$0xff]   ;;  %v3004_v55 = vld [vmem:[%s3771_s1 + $0x468] sm:$0xff]  }
  0x44   :  { %1970 = vmatmul.mubr.bf16.vlgmr.msra.gmra.mrb[4].mxu1 %v477_v22  ;;  %2647 = vmatprep.subr.bf16.mxu0 %v2923_v23  ;;  %v2973_v22 = vld [vmem:[%s3771_s1 + $0x3e8] sm:$0xff]  }
  0x45   :  { %2668 = vmatpush3.bf16.msra.mxu1 %v2922_v24  ;;  %2049 = vmatprep.mubr.bf16.mxu1 %v527_v59  ;;  %v2972_v23 = vld [vmem:[%s3771_s1 + $0x328] sm:$0xff]   ;;  %v2975_v24 = vld [vmem:[%s3771_s1 + $0x370] sm:$0xff]  }
  0x46   :  { %2669 = vmatprep.subr.bf16.mxu1 %v2925_v25  ;;  %v2974_v25 = vld [vmem:[%s3771_s1 + $0x3a8] sm:$0xff]   ;;  %v3008_v59 = vld [vmem:[%s3771_s1 + $0x470] sm:$0xff]  }
  0x47   :  { %2648 = vmatpush3.bf16.msra.mxu0 %v2924_v26  ;;  %v2977_v26 = vld [vmem:[%s3771_s1 + $0x3f0] sm:$0xff]  }
  0x48   :  { %2649 = vmatprep.subr.bf16.mxu0 %v2927_v27  ;;  %v2976_v27 = vld [vmem:[%s3771_s1 + $0x330] sm:$0xff]  }
  0x49   :  { %2670 = vmatpush3.bf16.msra.mxu1 %v2926_v28  ;;  %v2979_v28 = vld [vmem:[%s3771_s1 + $0x378] sm:$0xff]  }
  0x4a   :  { %2671 = vmatprep.subr.bf16.mxu1 %v2929_v29  ;;  %v2978_v29 = vld [vmem:[%s3771_s1 + $0x3b0] sm:$0xff]  }
  0x4b   :  { %2650 = vmatpush3.bf16.msra.mxu0 %v2928_v30  ;;  %v2981_v30 = vld [vmem:[%s3771_s1 + $0x3f8] sm:$0xff]  }
  0x4c   :  { %2651 = vmatprep.subr.bf16.mxu0 %v2931_v31  ;;  %v2980_v31 = vld [vmem:[%s3771_s1 + $0x338] sm:$0xff]  }
  0x4d   :  { %2672 = vmatpush3.bf16.msra.mxu1 %v2930_v32  ;;  %v510_v32 = vrot.slane %v3401_v52, %v3212_v41  ;;  %v2999_v52 = vld [vmem:[%s3771_s1 + $0x498] sm:$0xff]  }
  0x4e   :  { %2673 = vmatprep.subr.bf16.mxu1 %v2933_v33  ;;  %v2984_v33 = vld [vmem:[%s3771_s1 + $0x440] sm:$0xff]  }
  0x4f   :  { %2652 = vmatpush3.bf16.msra.mxu0 %v2932_v34  ;;  %v2983_v34 = vld [vmem:[%s3771_s1 + $0x3b8] sm:$0xff]  }
  0x50   :  { %2653 = vmatprep.subr.bf16.mxu0 %v2935_v35  ;;  %v2986_v35 = vld [vmem:[%s3771_s1 + $0x4c0] sm:$0xff]  }
  0x51   :  { %2674 = vmatpush3.bf16.msra.mxu1 %v2934_v36  ;;  %v2985_v36 = vld [vmem:[%s3771_s1 + $0x400] sm:$0xff]  }
  0x52   :  { %2675 = vmatprep.subr.bf16.mxu1 %v2937_v37  ;;  %v526_v37 = vcombine.high %v510_v32, %v510_v32 }
  0x53   :  { %2654 = vmatpush3.bf16.msra.mxu0 %v2936_v38  ;;  %v2988_v38 = vld [vmem:[%s3771_s1 + $0x448] sm:$0xff]  }
  0x54   :  { %2655 = vmatprep.subr.bf16.mxu0 %v2939_v39  ;;  %v2987_v39 = vld [vmem:[%s3771_s1 + $0x480] sm:$0xff]  }
  0x55   :  { %2676 = vmatpush3.bf16.msra.mxu1 %v2938_v40  ;;  %v2990_v40 = vld [vmem:[%s3771_s1 + $0x4c8] sm:$0xff]  }
  0x56   :  { %2677 = vmatprep.subr.bf16.mxu1 %v2941_v42  ;;  %v2989_v42 = vld [vmem:[%s3771_s1 + $0x408] sm:$0xff]  }
  0x57   :  { %2656 = vmatpush3.bf16.msra.mxu0 %v2940_v43  ;;  %v2992_v43 = vld [vmem:[%s3771_s1 + $0x450] sm:$0xff]  }
  0x58   :  { %2657 = vmatprep.subr.bf16.mxu0 %v2943_v44  ;;  %v2991_v44 = vld [vmem:[%s3771_s1 + $0x488] sm:$0xff]  }
  0x59   :  { %2678 = vmatpush3.bf16.msra.mxu1 %v2942_v46  ;;  %v2993_v46 = vld [vmem:[%s3771_s1 + $0x410] sm:$0xff]  }
  0x5a   :  { %2679 = vmatprep.subr.bf16.mxu1 %v2945_v49  ;;  %v2998_v49 = vld [vmem:[%s3771_s1 + $0x4d8] sm:$0xff]  }
  0x5b   :  { %2658 = vmatpush3.bf16.msra.mxu0 %v2944_v50  ;;  %v2997_v50 = vld [vmem:[%s3771_s1 + $0x418] sm:$0xff]  }
  0x5c   :  { %2659 = vmatprep.subr.bf16.mxu0 %v2947_v53  ;;  %v3002_v53 = vld [vmem:[%s3771_s1 + $0x4e0] sm:$0xff]  }
  0x5d   :  { %2680 = vmatpush3.bf16.msra.mxu1 %v2946_v54  ;;  %v3001_v54 = vld [vmem:[%s3771_s1 + $0x420] sm:$0xff]  }
  0x5e   :  { %2681 = vmatprep.subr.bf16.mxu1 %v2949_v57  ;;  %v3006_v57 = vld [vmem:[%s3771_s1 + $0x4e8] sm:$0xff]  }
  0x5f   :  { %2660 = vmatpush3.bf16.msra.mxu0 %v2948_v58  ;;  %v3005_v58 = vld [vmem:[%s3771_s1 + $0x428] sm:$0xff]  }
  0x60   :  { %2689 = vmatprep.subr.bf16.mxu0 %v2951_v61  ;;  %v3007_v61 = vld [vmem:[%s3771_s1 + $0x4a8] sm:$0xff]  }
  0x61   :  { %2682 = vmatpush3.bf16.msra.mxu1 %v2950_v62 }
  0x62   :  { %2010 = vmatmul.mubr.bf16.vlgmr.msra.gmra.mrb[8].mxu0 %v503_v60  ;;  %2711 = vmatprep.subr.bf16.mxu1 %v2953_v0  ;;  %v18_v60 = vld [vmem:[%s3770_s0 + $0x10] sm:$0xff] }
  0x63   :  { %2690 = vmatpush3.bf16.msra.mxu0 %v2952_v1  ;;  %2089 = vmatprep.mubr.bf16.mxu0 %v524_v63  ;;  %v536_v62 = vrot.slane %v18_v60, %v3212_v41  ;;  %v529_v63 = vcombine.high %v18_v60, %v18_v60  ;;  %v3010_v0 = vld [vmem:[%s3771_s1 + $0x4f0] sm:$0xff]  }
  0x64   :  { %2050 = vmatmul.mubr.bf16.vlgmr.msra.gmra.mrb[8].mxu1 %v525_v2  ;;  %2691 = vmatprep.subr.bf16.mxu0 %v2955_v3  ;;  %v3009_v1 = vld [vmem:[%s3771_s1 + $0x430] sm:$0xff]  }
  0x65   :  { %2712 = vmatpush3.bf16.msra.mxu1 %v2954_v4  ;;  %2129 = vmatprep.mubr.bf16.mxu1 %v528_v5  ;;  %v544_v2 = vcombine.high %v536_v62, %v536_v62  ;;  %v3607_v3 = vrot.slane %v529_v63, %v3212_v41  ;;  %v3012_v4 = vld [vmem:[%s3771_s1 + $0x478] sm:$0xff]   ;;  %v3011_v5 = vld [vmem:[%s3771_s1 + $0x4b0] sm:$0xff]  }
  0x66   :  { %2713 = vmatprep.subr.bf16.mxu1 %v2957_v6 }
  0x67   :  { %2692 = vmatpush3.bf16.msra.mxu0 %v2956_v7  ;;  %v566_v6 = vrot.slane %v544_v2, %v3212_v41  ;;  %v545_v7 = vcombine.high %v3607_v3, %v3607_v3 }
  0x68   :  { %2693 = vmatprep.subr.bf16.mxu0 %v2959_v8  ;;  %v3014_v8 = vld [vmem:[%s3771_s1 + $0x4f8] sm:$0xff]  }
  0x69   :  { %2714 = vmatpush3.bf16.msra.mxu1 %v2958_v9  ;;  %v3013_v9 = vld [vmem:[%s3771_s1 + $0x438] sm:$0xff]  }
  0x6a   :  { %2715 = vmatprep.subr.bf16.mxu1 %v2961_v10  ;;  %v576_v10 = vcombine.high %v566_v6, %v566_v6 }
  0x6b   :  { %2694 = vmatpush3.bf16.msra.mxu0 %v2960_v11  ;;  %v552_v11 = vrot.slane %v536_v62, %v3212_v41 }
  0x6c   :  { %2695 = vmatprep.subr.bf16.mxu0 %v2963_v12  ;;  %v3016_v12 = vld [vmem:[%s3771_s1 + $0x540] sm:$0xff]  }
  0x6d   :  { %2716 = vmatpush3.bf16.msra.mxu1 %v2962_v13  ;;  %v3015_v13 = vld [vmem:[%s3771_s1 + $0x4b8] sm:$0xff]  }
  0x6e   :  { %2717 = vmatprep.subr.bf16.mxu1 %v2965_v14  ;;  %v573_v14 = vrot.slane %v545_v7, %v3212_v41 }
  0x6f   :  { %2696 = vmatpush3.bf16.msra.mxu0 %v2964_v15  ;;  %v3018_v15 = vld [vmem:[%s3771_s1 + $0x5c0] sm:$0xff]  }
  0x70   :  { %2697 = vmatprep.subr.bf16.mxu0 %v2967_v16  ;;  %v3017_v16 = vld [vmem:[%s3771_s1 + $0x500] sm:$0xff]  }
  0x71   :  { %2718 = vmatpush3.bf16.msra.mxu1 %v2966_v17  ;;  %v574_v17 = vcombine.high %v552_v11, %v552_v11 }
  0x72   :  { %2719 = vmatprep.subr.bf16.mxu1 %v2969_v18  ;;  %v3020_v18 = vld [vmem:[%s3771_s1 + $0x548] sm:$0xff]  }
  0x73   :  { %2698 = vmatpush3.bf16.msra.mxu0 %v2968_v19  ;;  %v3019_v19 = vld [vmem:[%s3771_s1 + $0x580] sm:$0xff]  }
  0x74   :  { %2699 = vmatprep.subr.bf16.mxu0 %v2971_v20  ;;  %v577_v20 = vcombine.high %v573_v14, %v573_v14 }
  0x75   :  { %2720 = vmatpush3.bf16.msra.mxu1 %v2970_v21  ;;  %v3022_v21 = vld [vmem:[%s3771_s1 + $0x5c8] sm:$0xff]  }
  0x76   :  { %2721 = vmatprep.subr.bf16.mxu1 %v2973_v22  ;;  %v3021_v22 = vld [vmem:[%s3771_s1 + $0x508] sm:$0xff]  }
  0x77   :  { %2700 = vmatpush3.bf16.msra.mxu0 %v2972_v23  ;;  %v3024_v23 = vld [vmem:[%s3771_s1 + $0x550] sm:$0xff]  }
  0x78   :  { %2701 = vmatprep.subr.bf16.mxu0 %v2975_v24  ;;  %v3023_v24 = vld [vmem:[%s3771_s1 + $0x588] sm:$0xff]  }
  0x79   :  { %2722 = vmatpush3.bf16.msra.mxu1 %v2974_v25  ;;  %v3026_v25 = vld [vmem:[%s3771_s1 + $0x5d0] sm:$0xff]  }
  0x7a   :  { %2723 = vmatprep.subr.bf16.mxu1 %v2977_v26  ;;  %v3025_v26 = vld [vmem:[%s3771_s1 + $0x510] sm:$0xff]  }
  0x7b   :  { %2702 = vmatpush3.bf16.msra.mxu0 %v2976_v27  ;;  %v3028_v27 = vld [vmem:[%s3771_s1 + $0x558] sm:$0xff]  }
  0x7c   :  { %2703 = vmatprep.subr.bf16.mxu0 %v2979_v28  ;;  %v3027_v28 = vld [vmem:[%s3771_s1 + $0x590] sm:$0xff]  }
  0x7d   :  { %2724 = vmatpush3.bf16.msra.mxu1 %v2978_v29  ;;  %v3030_v29 = vld [vmem:[%s3771_s1 + $0x5d8] sm:$0xff]  }
  0x7e   :  { %2725 = vmatprep.subr.bf16.mxu1 %v2981_v30  ;;  %v3029_v30 = vld [vmem:[%s3771_s1 + $0x518] sm:$0xff]  }
  0x7f   :  { %2704 = vmatpush3.bf16.msra.mxu0 %v2980_v31  ;;  %v3032_v31 = vld [vmem:[%s3771_s1 + $0x560] sm:$0xff]  }
  0x80   :  { %2733 = vmatprep.subr.bf16.mxu0 %v2984_v33  ;;  %v3034_v33 = vld [vmem:[%s3771_s1 + $0x5e0] sm:$0xff]  }
  0x81   :  { %2726 = vmatpush3.bf16.msra.mxu1 %v2983_v34  ;;  %v3033_v34 = vld [vmem:[%s3771_s1 + $0x520] sm:$0xff]  }
  0x82   :  { %2090 = vmatmul.mubr.bf16.vlgmr.msra.gmra.mrb[12].mxu0 %v510_v32  ;;  %2755 = vmatprep.subr.bf16.mxu1 %v2986_v35  ;;  %v3031_v32 = vld [vmem:[%s3771_s1 + $0x598] sm:$0xff]   ;;  %v3036_v35 = vld [vmem:[%s3771_s1 + $0x568] sm:$0xff]  }
  0x83   :  { %2734 = vmatpush3.bf16.msra.mxu0 %v2985_v36  ;;  %2169 = vmatprep.mubr.bf16.mxu0 %v566_v6  ;;  %v3035_v36 = vld [vmem:[%s3771_s1 + $0x5a0] sm:$0xff]  }
  0x84   :  { %2130 = vmatmul.mubr.bf16.vlgmr.msra.gmra.mrb[12].mxu1 %v526_v37  ;;  %2735 = vmatprep.subr.bf16.mxu0 %v2988_v38  ;;  %v3038_v37 = vld [vmem:[%s3771_s1 + $0x5e8] sm:$0xff]  }
  0x85   :  { %2756 = vmatpush3.bf16.msra.mxu1 %v2987_v39  ;;  %2209 = vmatprep.mubr.bf16.mxu1 %v576_v10  ;;  %v3037_v38 = vld [vmem:[%s3771_s1 + $0x528] sm:$0xff]   ;;  %v3040_v39 = vld [vmem:[%s3771_s1 + $0x570] sm:$0xff]  }
  0x86   :  { %2757 = vmatprep.subr.bf16.mxu1 %v2990_v40  ;;  %v3039_v40 = vld [vmem:[%s3771_s1 + $0x5a8] sm:$0xff]  }
  0x87   :  { %2736 = vmatpush3.bf16.msra.mxu0 %v2989_v42  ;;  %v3042_v42 = vld [vmem:[%s3771_s1 + $0x5f0] sm:$0xff]  }
  0x88   :  { %2737 = vmatprep.subr.bf16.mxu0 %v2992_v43  ;;  %v3041_v43 = vld [vmem:[%s3771_s1 + $0x530] sm:$0xff]  }
  0x89   :  { %2758 = vmatpush3.bf16.msra.mxu1 %v2991_v44  ;;  %v3044_v44 = vld [vmem:[%s3771_s1 + $0x578] sm:$0xff]  }
  0x8a   :  { %2759 = vmatprep.subr.bf16.mxu1 %v2994_v45  ;;  %v3043_v45 = vld [vmem:[%s3771_s1 + $0x5b0] sm:$0xff]  }
  0x8b   :  { %2738 = vmatpush3.bf16.msra.mxu0 %v2993_v46  ;;  %v3046_v46 = vld [vmem:[%s3771_s1 + $0x5f8] sm:$0xff]  }
  0x8c   :  { %2739 = vmatprep.subr.bf16.mxu0 %v2996_v47  ;;  %v3045_v47 = vld [vmem:[%s3771_s1 + $0x538] sm:$0xff]  }
  0x8d   :  { %2760 = vmatpush3.bf16.msra.mxu1 %v2995_v48  ;;  %v559_v48 = vrot.slane %v3607_v3, %v3212_v41 }
  0x8e   :  { %2761 = vmatprep.subr.bf16.mxu1 %v2998_v49  ;;  %v3048_v49 = vld [vmem:[%s3771_s1 + $0x5b8] sm:$0xff]  }
  0x8f   :  { %2740 = vmatpush3.bf16.msra.mxu0 %v2997_v50  ;;  %v3049_v50 = vld [vmem:[%s3771_s1 + $0x600] sm:$0xff]  }
  0x90   :  { %2741 = vmatprep.subr.bf16.mxu0 %v3000_v51 }
  0x91   :  { %2762 = vmatpush3.bf16.msra.mxu1 %v2999_v52 }
  0x92   :  { %2763 = vmatprep.subr.bf16.mxu1 %v3002_v53 }
  0x93   :  { %2742 = vmatpush3.bf16.msra.mxu0 %v3001_v54 }
  0x94   :  { %2743 = vmatprep.subr.bf16.mxu0 %v3004_v55 }
  0x95   :  { %2764 = vmatpush3.bf16.msra.mxu1 %v3003_v56 }
  0x96   :  { %2765 = vmatprep.subr.bf16.mxu1 %v3006_v57 }
  0x97   :  { %2744 = vmatpush3.bf16.msra.mxu0 %v3005_v58 }
  0x98   :  { %2745 = vmatprep.subr.bf16.mxu0 %v3008_v59 }
  0x99   :  { %2766 = vmatpush3.bf16.msra.mxu1 %v3007_v61 }
  0x9a   :  { %2767 = vmatprep.subr.bf16.mxu1 %v3010_v0 }
  0x9b   :  { %2746 = vmatpush3.bf16.msra.mxu0 %v3009_v1 }
  0x9c   :  { %2747 = vmatprep.subr.bf16.mxu0 %v3012_v4 }
  0x9d   :  { %2768 = vmatpush3.bf16.msra.mxu1 %v3011_v5 }
  0x9e   :  { %2769 = vmatprep.subr.bf16.mxu1 %v3014_v8 }
  0x9f   :  { %2748 = vmatpush3.bf16.msra.mxu0 %v3013_v9 }
  0xa0   :  { %2777 = vmatprep.subr.bf16.mxu0 %v3016_v12 }
  0xa1   :  { %2770 = vmatpush3.bf16.msra.mxu1 %v3015_v13 }
  0xa2   :  { %2170 = vmatmul.mubr.bf16.vlgmr.msra.gmra.mrb[16].mxu0 %v552_v11  ;;  %2799 = vmatprep.subr.bf16.mxu1 %v3018_v15 }
  0xa3   :  { %2778 = vmatpush3.bf16.msra.mxu0 %v3017_v16  ;;  %2249 = vmatprep.mubr.bf16.mxu0 %v573_v14 }
  0xa4   :  { %2210 = vmatmul.mubr.bf16.vlgmr.msra.gmra.mrb[16].mxu1 %v574_v17  ;;  %2779 = vmatprep.subr.bf16.mxu0 %v3020_v18 }
  0xa5   :  { %2800 = vmatpush3.bf16.msra.mxu1 %v3019_v19  ;;  %2289 = vmatprep.mubr.bf16.mxu1 %v577_v20 }
  0xa6   :  { %2801 = vmatprep.subr.bf16.mxu1 %v3022_v21 }
  0xa7   :  { %2780 = vmatpush3.bf16.msra.mxu0 %v3021_v22 }
  0xa8   :  { %2781 = vmatprep.subr.bf16.mxu0 %v3024_v23 }
  0xa9   :  { %2802 = vmatpush3.bf16.msra.mxu1 %v3023_v24 }
  0xaa   :  { %2803 = vmatprep.subr.bf16.mxu1 %v3026_v25 }
  0xab   :  { %2782 = vmatpush3.bf16.msra.mxu0 %v3025_v26 }
  0xac   :  { %2783 = vmatprep.subr.bf16.mxu0 %v3028_v27 }
  0xad   :  { %2804 = vmatpush3.bf16.msra.mxu1 %v3027_v28 }
  0xae   :  { %2805 = vmatprep.subr.bf16.mxu1 %v3030_v29 }
  0xaf   :  { %2784 = vmatpush3.bf16.msra.mxu0 %v3029_v30 }
  0xb0   :  { %2785 = vmatprep.subr.bf16.mxu0 %v3032_v31 }
  0xb1   :  { %2806 = vmatpush3.bf16.msra.mxu1 %v3031_v32 }
  0xb2   :  { %2807 = vmatprep.subr.bf16.mxu1 %v3034_v33 }
  0xb3   :  { %2786 = vmatpush3.bf16.msra.mxu0 %v3033_v34 }
  0xb4   :  { %2787 = vmatprep.subr.bf16.mxu0 %v3036_v35 }
  0xb5   :  { %2808 = vmatpush3.bf16.msra.mxu1 %v3035_v36 }
  0xb6   :  { %2809 = vmatprep.subr.bf16.mxu1 %v3038_v37 }
  0xb7   :  { %2788 = vmatpush3.bf16.msra.mxu0 %v3037_v38 }
  0xb8   :  { %2789 = vmatprep.subr.bf16.mxu0 %v3040_v39 }
  0xb9   :  { %2810 = vmatpush3.bf16.msra.mxu1 %v3039_v40 }
  0xba   :  { %2811 = vmatprep.subr.bf16.mxu1 %v3042_v42 }
  0xbb   :  { %2790 = vmatpush3.bf16.msra.mxu0 %v3041_v43 }
  0xbc   :  { %2791 = vmatprep.subr.bf16.mxu0 %v3044_v44 }
  0xbd   :  { %2812 = vmatpush3.bf16.msra.mxu1 %v3043_v45 }
  0xbe   :  { %2813 = vmatprep.subr.bf16.mxu1 %v3046_v46 }
  0xbf   :  { %2792 = vmatpush3.bf16.msra.mxu0 %v3045_v47 }
  0xc0   :  { %8 = vsyncpa [#allocation3], 0  ;;  %v3084_v51 = vmov 0.0   ;;  %v575_v52 = vcombine.high %v559_v48, %v559_v48  ;;  %v3050_v53 = vld [vmem:[%s3771_s1 + $0x608] sm:$0xff]   ;;  %vm3085_vm0 = vmmov 0   ;;  %v3051_v54 = vld [vmem:[%s3771_s1 + $0x610] sm:$0xff]  }
  0xc1   :  { %2830 = vmatprep.subr.bf16.mxu0 %v3084_v51  ;;  %2814 = vmatpush3.bf16.msra.mxu1 %v3048_v49  ;;  %v3052_v55 = vld [vmem:[%s3771_s1 + $0x618] sm:$0xff]   ;;  %v3053_v56 = vld [vmem:[%s3771_s1 + $0x620] sm:$0xff]   ;;  %v3054_v57 = vld [vmem:[%s3771_s1 + $0x628] sm:$0xff]   ;;  %vm2339_vm1 = vcmask 33792  }
  0xc2   :  { %2250 = vmatmul.mubr.bf16.vlgmr.msra.gmra.mrb[20].mxu0 %v559_v48  ;;  %v3055_v58 = vld [vmem:[%s3771_s1 + $0x630] sm:$0xff]   ;;  %v3056_v59 = vld [vmem:[%s3771_s1 + $0x638] sm:$0xff]   ;;  %v2355_v63 = vld [vmem:[%s3772_s2] ss:$0 sm:$0xff] }
  0xc3   :  { %2831 = vmatpush3.bf16.msra.mxu0 %v3049_v50  ;;  %2846 = vmatprep.mubr.msk.bf16.mxu0 %vm3085_vm0, %v3084_v51  ;;  %v2356_v60 = vld.sshfl [vmem:[%s3770_s0 + $0x18] sm:$0x1 pattern:$0x75316420]  ;;  %s3086_s0 = smov [#allocation2]  }
  0xc4   :  { %2290 = vmatmul.mubr.bf16.vlgmr.msra.gmra.mrb[20].mxu1 %v575_v52  ;;  %2832 = vmatprep.subr.bf16.mxu0 %v3084_v51  ;;  %v591_v61 = vrot.slane %v2356_v60, %v3212_v41  ;;  %s2347_s1 = sshll.u32 %s3086_s0, 4  ;;  %s2348_s1 = int_to_ptr.vmem [resolvable:$true] %s2347_s1 }
  0xc5   :  { %s3059_s2 = scalar_lea.vmem %s2348_s1, 32  ;;  %p3064_p1 = scmp.lt.s32.totalorder %s2348_s1, %s2348_s1 }
  0xc6   :  { %p3060_p0 = scmp.ne.s32.totalorder %s2348_s1, %s3059_s2  ;;  %p3065_p2 = scmp.lt.s32.totalorder %s3059_s2, %s3059_s2 }
  0xc7   :  { %2833 = vmatpush3.bf16.msra.mxu0 %v3050_v53 }
  0xc8   :  { %2834 = vmatprep.subr.bf16.mxu0 %v3084_v51  ;;  %p3066_p3 = por %p3065_p2, %p3064_p1 }
  0xca   :  { %p3067_p4 = pnand %p3066_p3, %p3060_p0 }
  0xcb   :  { %2835 = vmatpush3.bf16.msra.mxu0 %v3051_v54 }
  0xcc   :  { %2836 = vmatprep.subr.bf16.mxu0 %v3084_v51 }
  0xcf   :  { %2837 = vmatpush3.bf16.msra.mxu0 %v3052_v55 }
  0xd0   :  { %2838 = vmatprep.subr.bf16.mxu0 %v3084_v51 }
  0xd3   :  { %2839 = vmatpush3.bf16.msra.mxu0 %v3053_v56 }
  0xd4   :  { %2840 = vmatprep.subr.bf16.mxu0 %v3084_v51 }
  0xd7   :  { %2841 = vmatpush3.bf16.msra.mxu0 %v3054_v57 }
  0xd8   :  { %2842 = vmatprep.subr.bf16.mxu0 %v3084_v51 }
  0xdb   :  { %2843 = vmatpush3.bf16.msra.mxu0 %v3055_v58 }
  0xdc   :  { %2844 = vmatprep.subr.bf16.mxu0 %v3084_v51 }
  0xdf   :  { %2845 = vmatpush3.bf16.msra.mxu0 %v3056_v59 }
  0xe2   :  { %2847 = vmatmul.mubr.bf16.vlgmr.msra.gmra.mrb[24].mxu0 %v591_v61 }
  0xf5   :  { %v2573_v62 = vpop.f32.mrb[0].mxu0 }
  0xf6   :  { %v2574_v0 = vpop.f32.mrb[1].mxu0 }
  0xf7   :  { %v2575_v1 = vadd.f32 %v2574_v0, %v2573_v62  ;;  %v2576_v2 = vpop.f32.mrb[2].mxu0  ;;  %v2595_v3 = vpop.f32.mrb[0].mxu1 }
  0xf8   :  { %v2577_v4 = vpop.f32.mrb[3].mxu0  ;;  %v2596_v5 = vpop.f32.mrb[1].mxu1 }
  0xf9   :  { %v1852_v6 = vadd.f32 %v2575_v1, %v2355_v63  ;;  %v2597_v7 = vadd.f32 %v2596_v5, %v2595_v3  ;;  %v2598_v8 = vpop.f32.mrb[2].mxu1 }
  0xfa   :  { %v2599_v9 = vpop.f32.mrb[3].mxu1 }
  0xfb   :  { %v1892_v10 = vadd.f32 %v2597_v7, %v1852_v6 }
 0x115   :  { %v2617_v11 = vpop.f32.mrb[4].mxu0 }
 0x116   :  { %v2618_v41 = vpop.f32.mrb[5].mxu0 }
 0x117   :  { %v2619_v12 = vadd.f32 %v2618_v41, %v2617_v11  ;;  %v2620_v13 = vpop.f32.mrb[6].mxu0  ;;  %v2639_v14 = vpop.f32.mrb[4].mxu1 }
 0x118   :  { %v2621_v15 = vpop.f32.mrb[7].mxu0  ;;  %v2640_v16 = vpop.f32.mrb[5].mxu1 }
 0x119   :  { %v1932_v17 = vadd.f32 %v2619_v12, %v1892_v10  ;;  %v2641_v18 = vadd.f32 %v2640_v16, %v2639_v14  ;;  %v2642_v19 = vpop.f32.mrb[6].mxu1 }
 0x11a   :  { %v2643_v20 = vpop.f32.mrb[7].mxu1 }
 0x11b   :  { %v1972_v21 = vadd.f32 %v2641_v18, %v1932_v17 }
 0x135   :  { %v2661_v22 = vpop.f32.mrb[8].mxu0 }
 0x136   :  { %v2662_v23 = vpop.f32.mrb[9].mxu0 }
 0x137   :  { %v2663_v24 = vadd.f32 %v2662_v23, %v2661_v22  ;;  %v2664_v25 = vpop.f32.mrb[10].mxu0  ;;  %v2683_v26 = vpop.f32.mrb[8].mxu1 }
 0x138   :  { %v2665_v27 = vpop.f32.mrb[11].mxu0  ;;  %v2684_v28 = vpop.f32.mrb[9].mxu1 }
 0x139   :  { %v2012_v29 = vadd.f32 %v2663_v24, %v1972_v21  ;;  %v2685_v30 = vadd.f32 %v2684_v28, %v2683_v26  ;;  %v2686_v31 = vpop.f32.mrb[10].mxu1 }
 0x13a   :  { %v2687_v32 = vpop.f32.mrb[11].mxu1 }
 0x13b   :  { %v2052_v33 = vadd.f32 %v2685_v30, %v2012_v29 }
 0x155   :  { %v2705_v34 = vpop.f32.mrb[12].mxu0 }
 0x156   :  { %v2706_v35 = vpop.f32.mrb[13].mxu0 }
 0x157   :  { %v2707_v36 = vadd.f32 %v2706_v35, %v2705_v34  ;;  %v2708_v37 = vpop.f32.mrb[14].mxu0  ;;  %v2727_v38 = vpop.f32.mrb[12].mxu1 }
 0x158   :  { %v2709_v39 = vpop.f32.mrb[15].mxu0  ;;  %v2728_v40 = vpop.f32.mrb[13].mxu1 }
 0x159   :  { %v2092_v42 = vadd.f32 %v2707_v36, %v2052_v33  ;;  %v2729_v43 = vadd.f32 %v2728_v40, %v2727_v38  ;;  %v2730_v44 = vpop.f32.mrb[14].mxu1 }
 0x15a   :  { %v2731_v45 = vpop.f32.mrb[15].mxu1 }
 0x15b   :  { %v2132_v46 = vadd.f32 %v2729_v43, %v2092_v42 }
 0x175   :  { %v2749_v47 = vpop.f32.mrb[16].mxu0 }
 0x176   :  { %v2750_v48 = vpop.f32.mrb[17].mxu0 }
 0x177   :  { %v2751_v49 = vadd.f32 %v2750_v48, %v2749_v47  ;;  %v2752_v50 = vpop.f32.mrb[18].mxu0  ;;  %v2771_v51 = vpop.f32.mrb[16].mxu1 }
 0x178   :  { %v2753_v52 = vpop.f32.mrb[19].mxu0  ;;  %v2772_v53 = vpop.f32.mrb[17].mxu1 }
 0x179   :  { %v2172_v54 = vadd.f32 %v2751_v49, %v2132_v46  ;;  %v2773_v55 = vadd.f32 %v2772_v53, %v2771_v51  ;;  %v2774_v56 = vpop.f32.mrb[18].mxu1 }
 0x17a   :  { %v2775_v57 = vpop.f32.mrb[19].mxu1 }
 0x17b   :  { %v2212_v58 = vadd.f32 %v2773_v55, %v2172_v54 }
 0x195   :  { %v2793_v59 = vpop.f32.mrb[20].mxu0 }
 0x196   :  { %v2794_v60 = vpop.f32.mrb[21].mxu0 }
 0x197   :  { %v2795_v61 = vadd.f32 %v2794_v60, %v2793_v59  ;;  %v2796_v62 = vpop.f32.mrb[22].mxu0  ;;  %v2815_v63 = vpop.f32.mrb[20].mxu1 }
 0x198   :  { %v2797_v0 = vpop.f32.mrb[23].mxu0  ;;  %v2816_v1 = vpop.f32.mrb[21].mxu1 }
 0x199   :  { %v2252_v2 = vadd.f32 %v2795_v61, %v2212_v58  ;;  %v2817_v3 = vadd.f32 %v2816_v1, %v2815_v63  ;;  %v2818_v4 = vpop.f32.mrb[22].mxu1 }
 0x19a   :  { %v2819_v5 = vpop.f32.mrb[23].mxu1 }
 0x19b   :  { %v2292_v6 = vadd.f32 %v2817_v3, %v2252_v2 }
 0x1b5   :  { %v2331_v7 = vpop.f32.mrb[24].mxu0 }
 0x1b6   :  { %v2332_v8 = vadd.f32 %v2331_v7, %v2292_v6  ;;  %v2848_v9 = vpop.f32.mrb[25].mxu0 }
 0x1b7   :  { %v2334_v10 = vpop.f32.mrb[26].mxu0 }
 0x1b8   :  { %3057 = vtanh.f32 %v2332_v8  ;;  %v2849_v11 = vpop.f32.mrb[27].mxu0 }
 0x1c2   :  { %v3058_v41 = vpop.eup %3057 }
 0x1c3   :  { %v2338_v12 = vmul.f32 2.0, %v3058_v41 }
 0x1c5   :  { %2340 = vst.msk [vmem:[#allocation2] sm:$0x3] %vm2339_vm1, %v2338_v12 }
 0x1c6   :  { %3070 = shalt.err (!%p3067_p4)
}
 0x1c7   :  { %s3071_s19 = scalar_lea.hbm %s3773_s3, 32 }
 0x1c8   :  { %p3072_p5 = scmp.ne.s32.totalorder %s3773_s3, %s3071_s19  ;;  %p3075_p6 = scmp.lt.u32.totalorder %s3071_s19, %s3773_s3 }
 0x1ca   :  { %p3077_p7 = pnand %p3075_p6, %p3072_p5 }
 0x1cc   :  { %3080 = shalt.err (!%p3077_p7)
}
 0x1cd   :  { %2350 = dma.vmem_to_hbm [thread:$0]  %s2348_s1, 32, %s3773_s3, [#allocation3]  }
 0x1ce   :  { %3081 = dma.done.wait [#allocation3], 32  }
 0x1cf   :  { %3082 = vsyncadd [#allocation3], 4294967264 }
 0x1d0   :  { %2354 = vsyncpa [#allocation3], 1 }

</bundles_post_ra>
